<compile_context>
chip_gen: v6e
topology: v6e:2x2x1
jax: 0.10.0
libtpu: 0.0.40
codegen_flags: <defaults>
</compile_context>

<pallas_src>
import numpy as np
import jax
import jax.numpy as jnp
from jax.experimental import pallas as pl
from jax.experimental.pallas import tpu as pltpu

# Fixed problem configuration (asserted below): frame_length = 8, 16x16 frames, n_feats = 8.
F = 8
H = W = 16
NF = 8
H2, W2 = H // 2, W // 2          # 8, 8
M3D = F * H2 * W2                # 512 conv3d output positions per batch (lane axis of the GEMM)
K3D = 64                         # im2col K = 2 planes * 27 taps = 54, zero-padded to 64


# ----------------------------------------------------------------------------
# The single fused Pallas kernel
# ----------------------------------------------------------------------------
def _fused_forward_kernel(a_ref, w3_ref, b3_ref, c1_ref, c1b_ref,
                          l1_ref, r1_ref, b1_ref, l2_ref, r2_ref, b2_ref,
                          o_ref):
    # --- Conv3d(3->NF, k3, s=(1,2,2), p=1) with the pool/cat folded into the weights.
    #     Transposed GEMM (NF, K) @ (K, M=512): the big M axis is lane-dense.
    a = a_ref[0]                                                         # (64, 512)
    feat = jnp.dot(w3_ref[...], a, preferred_element_type=jnp.float32)   # (8, 512)
    feat = jnp.maximum(feat + b3_ref[...], 0.0)                          # bias + ReLU

    # --- 1x1 Conv2d over the (c f)-merged channels, folded per frame:
    #     out1[o, i*8+j] = sum_f C1_f @ feat[:, frame-f block]
    out1 = jnp.zeros((NF, H2 * W2), jnp.float32)
    for f in range(F):
        out1 = out1 + jnp.dot(c1_ref[f], feat[:, f * H2 * W2:(f + 1) * H2 * W2],
                              preferred_element_type=jnp.float32)
    out1 = out1 + c1b_ref[...]                                           # (8, 64)

    # --- relayout to (spatial-row * channel, spatial-col) = (i*NF + c, j) for the deconv stages
    z1 = jnp.concatenate([out1[:, i * W2:(i + 1) * W2] for i in range(H2)], axis=0)   # (64, 8)

    # --- ConvTranspose2d(NF->NF, k3, s2, p1, op1): 9 Kron-factored taps, no zero-dilated input
    acc1 = jnp.zeros((2 * H2 * NF, 2 * W2), jnp.float32)                 # (128, 16), rows = p*NF + c'
    for t in range(9):
        tmp = jnp.dot(l1_ref[t], z1, preferred_element_type=jnp.float32)          # (128, 8)
        acc1 = acc1 + jnp.dot(tmp, r1_ref[t], preferred_element_type=jnp.float32) # (128, 16)
    z2 = acc1 + b1_ref[...]

    # --- ConvTranspose2d(NF->1, k3, s2, p1, op1) + Sigmoid
    acc2 = jnp.zeros((2 * H, 2 * W), jnp.float32)                        # (32, 32)
    for t in range(9):
        tmp = jnp.dot(l2_ref[t], z2, preferred_element_type=jnp.float32)          # (32, 16)
        acc2 = acc2 + jnp.dot(tmp, r2_ref[t], preferred_element_type=jnp.float32) # (32, 32)
    o_ref[0] = jax.nn.sigmoid(acc2 + b2_ref[...]).astype(o_ref.dtype)


def _fused_call(batch):
    return pl.pallas_call(
        _fused_forward_kernel,
        out_shape=jax.ShapeDtypeStruct((batch, 2 * H, 2 * W), jnp.float32),
        grid=(batch,),
        in_specs=[
            pl.BlockSpec((1, K3D, M3D), lambda b: (b, 0, 0)),            # per-batch im2col^T
            pl.BlockSpec((NF, K3D), lambda b: (0, 0)),                   # folded conv3d weights
            pl.BlockSpec((NF, 1), lambda b: (0, 0)),                     # conv3d bias
            pl.BlockSpec((F, NF, NF), lambda b: (0, 0, 0)),              # per-frame 1x1 weights
            pl.BlockSpec((NF, 1), lambda b: (0, 0)),                     # 1x1 bias
            pl.BlockSpec((9, 2 * H2 * NF, H2 * NF), lambda b: (0, 0, 0)),  # d1 tap L operators
            pl.BlockSpec((9, W2, 2 * W2), lambda b: (0, 0, 0)),          # d1 tap R operators
            pl.BlockSpec((2 * H2 * NF, 1), lambda b: (0, 0)),            # d1 bias (row layout)
            pl.BlockSpec((9, 2 * H, H * NF), lambda b: (0, 0, 0)),       # d2 tap L operators
            pl.BlockSpec((9, W, 2 * W), lambda b: (0, 0, 0)),            # d2 tap R operators
            pl.BlockSpec((1, 1), lambda b: (0, 0)),                      # d2 bias
        ],
        out_specs=pl.BlockSpec((1, 2 * H, 2 * W), lambda b: (b, 0, 0)),
        compiler_params=pltpu.CompilerParams(dimension_semantics=("parallel",)),
    )


# ----------------------------------------------------------------------------
# Input-side glue (cheap XLA on the raw input only): im2col^T for the folded conv3d
# ----------------------------------------------------------------------------
def _build_conv3d_im2col(x):
    """x: (B, F, H, W) -> (B, K3D, M3D).

    Rows 0..26  : input-plane taps, tap = kf*9 + kh*3 + kw     (stride (1,2,2), pad 1)
    Rows 27..53 : temporal-mean-plane taps (same ordering)     -> pool/cat folded into weights
    Rows 54..63 : zero padding (K aligned to 8 sublanes)
    Columns     : output positions ordered f*64 + i*8 + j
    """
    B = x.shape[0]
    m = jnp.mean(x, axis=1)                                   # temporal mean (AdaptiveAvgPool3d)
    mrep = jnp.broadcast_to(m[:, None], (B, F, H, W))

    def taps(v):
        vp = jnp.pad(v, ((0, 0), (1, 1), (1, 1), (1, 1)))
        cols = []
        for kf in range(3):
            for kh in range(3):
                for kw in range(3):
                    cols.append(vp[:, kf:kf + F, kh:kh + H:2, kw:kw + W:2])
        return jnp.stack(cols, axis=1)                        # (B, 27, F, H2, W2)

    a = jnp.concatenate([taps(x), taps(mrep)], axis=1)        # (B, 54, F, H2, W2)
    a = a.reshape(B, 54, M3D)
    return jnp.pad(a, ((0, 0), (0, K3D - 54), (0, 0)))        # (B, 64, 512)


# ----------------------------------------------------------------------------
# One-time (hoisted) parameter repacking
# ----------------------------------------------------------------------------
def _deconv_tap_selectors(kh, kw, hin, win):
    rsel = np.zeros((2 * hin, hin), np.float32)
    for p in range(2 * hin):
        r = p + kh - 1
        if r % 2 == 0 and 0 <= r // 2 < hin:
            rsel[p, r // 2] = 1.0
    csel = np.zeros((win, 2 * win), np.float32)
    for q in range(2 * win):
        s = q + kw - 1
        if s % 2 == 0 and 0 <= s // 2 < win:
            csel[s // 2, q] = 1.0
    return rsel, csel


def _build_deconv_ops(wt, hin, win):
    """ConvTranspose2d(k=3, s=2, p=1, op=1) as 9 Kron-factored tap operators.

    wt: torch layout (Cin, Cout, 3, 3).  Returns L (9, 2*hin*Cout, hin*Cin) and R (9, win, 2*win)
    such that out[(p*Cout + co), q] = sum_t (L[t] @ z @ R[t]) with z[(i*Cin + ci), j] = in[ci, i, j].
    """
    w_conv = np.flip(np.asarray(wt, np.float32), axis=(2, 3)).transpose(1, 0, 2, 3)  # (Cout,Cin,kh,kw)
    ls, rs = [], []
    for kh in range(3):
        for kw in range(3):
            rsel, csel = _deconv_tap_selectors(kh, kw, hin, win)
            ls.append(np.kron(rsel, w_conv[:, :, kh, kw]))
            rs.append(csel)
    return jnp.asarray(np.stack(ls)), jnp.asarray(np.stack(rs))


def prepare_params(params):
    """Repack torch-layout parameters into kernel operands (runs once, outside the forward)."""
    w = np.asarray(params["cnn1_w"], np.float32)              # (NF, 3, 3, 3, 3)
    assert w.shape == (NF, 3, 3, 3, 3)
    w_x = (w[:, 0] + w[:, 1] - w[:, 2]).reshape(NF, 27)       # cat([x, x-m, m-x]) folded onto x ...
    w_m = (w[:, 2] - w[:, 1]).reshape(NF, 27)                 # ... and onto the temporal mean m
    w3 = np.zeros((NF, K3D), np.float32)
    w3[:, :27] = w_x
    w3[:, 27:54] = w_m

    c1 = np.asarray(params["c1_w"], np.float32).reshape(NF, NF, F)   # (o, n, f); col index = n*F + f
    c1_stack = np.ascontiguousarray(np.transpose(c1, (2, 0, 1)))     # (f, o, n)

    l1, r1 = _build_deconv_ops(params["d1_w"], H2, W2)        # (9,128,64), (9,8,16)
    l2, r2 = _build_deconv_ops(params["d2_w"], H, W)          # (9,32,128), (9,16,32)

    b1 = np.tile(np.asarray(params["d1_b"], np.float32), 2 * H2).reshape(2 * H2 * NF, 1)

    return {
        "w3": jnp.asarray(w3),
        "b3": jnp.asarray(params["cnn1_b"], jnp.float32).reshape(NF, 1),
        "c1": jnp.asarray(c1_stack),
        "c1b": jnp.asarray(params["c1_b"], jnp.float32).reshape(NF, 1),
        "l1": l1, "r1": r1, "b1": jnp.asarray(b1),
        "l2": l2, "r2": r2,
        "b2": jnp.asarray(params["d2_b"], jnp.float32).reshape(1, 1),
    }


# ----------------------------------------------------------------------------
# Forward
# ----------------------------------------------------------------------------
@jax.jit
def deep_model_forward(input_data, prep):
    b, f, c, h, w = input_data.shape
    assert (f, c, h, w) == (F, 1, H, W), "kernel is specialized to frame_length=8, 1x16x16 frames"
    x = input_data[:, :, 0]                                   # (B, F, H, W)
    a3d_t = _build_conv3d_im2col(x)                           # (B, 64, 512)
    out = _fused_call(b)(
        a3d_t, prep["w3"], prep["b3"], prep["c1"], prep["c1b"],
        prep["l1"], prep["r1"], prep["b1"], prep["l2"], prep["r2"], prep["b2"])
    return out.reshape(b, 1, 2 * H, 2 * W)


# ----------------------------------------------------------------------------
# Pure-XLA reference of the same forward (used as an in-script correctness check)
# ----------------------------------------------------------------------------
def reference_forward(input_data, params):
    b = input_data.shape[0]
    x0 = jnp.transpose(input_data, (0, 2, 1, 3, 4))           # (B, 1, F, H, W)
    m = jnp.mean(x0, axis=2, keepdims=True)
    mb = jnp.broadcast_to(m, x0.shape)
    x = jnp.concatenate([x0, x0 - mb, mb - x0], axis=1)       # (B, 3, F, H, W)

    dn3 = jax.lax.conv_dimension_numbers(x.shape, params["cnn1_w"].shape,
                                         ("NCDHW", "OIDHW", "NCDHW"))
    f = jax.lax.conv_general_dilated(x, params["cnn1_w"], window_strides=(1, 2, 2),
                                     padding=((1, 1), (1, 1), (1, 1)), dimension_numbers=dn3,
                                     precision=jax.lax.Precision.HIGHEST)
    f = jnp.maximum(f + params["cnn1_b"].reshape(1, -1, 1, 1, 1), 0.0)
    nf = f.shape[1]
    f = f.reshape(b, nf * F, H2, W2)

    w1x1 = params["c1_w"].reshape(nf, nf * F, 1, 1)
    dn2 = jax.lax.conv_dimension_numbers(f.shape, w1x1.shape, ("NCHW", "OIHW", "NCHW"))
    y = jax.lax.conv_general_dilated(f, w1x1, (1, 1), "VALID", dimension_numbers=dn2,
                                     precision=jax.lax.Precision.HIGHEST)
    y = y + params["c1_b"].reshape(1, -1, 1, 1)

    def deconv(v, wt, bias):
        w_conv = jnp.transpose(jnp.flip(wt, (2, 3)), (1, 0, 2, 3))
        dn = jax.lax.conv_dimension_numbers(v.shape, w_conv.shape, ("NCHW", "OIHW", "NCHW"))
        o = jax.lax.conv_general_dilated(v, w_conv, (1, 1), ((1, 2), (1, 2)),
                                         lhs_dilation=(2, 2), dimension_numbers=dn,
                                         precision=jax.lax.Precision.HIGHEST)
        return o + bias.reshape(1, -1, 1, 1)

    y = deconv(y, params["d1_w"], params["d1_b"])
    return jax.nn.sigmoid(deconv(y, params["d2_w"], params["d2_b"]))


# ----------------------------------------------------------------------------
if __name__ == "__main__":
    key = jax.random.PRNGKey(0)
    B = 2
    n_feats = NF
    ks = jax.random.split(key, 9)

    input_data = jax.random.normal(ks[0], (B, F, 1, H, W), jnp.float32)

    params = {
        # CNN3D: Conv3d(3 -> n_feats, k=3, stride=(1,2,2), pad=1)
        "cnn1_w": 0.05 * jax.random.normal(ks[1], (n_feats, 3, 3, 3, 3), jnp.float32),
        "cnn1_b": 0.01 * jax.random.normal(ks[2], (n_feats,), jnp.float32),
        # conv1x1(frame_length * n_feats -> n_feats)
        "c1_w": 0.05 * jax.random.normal(ks[3], (n_feats, n_feats * F), jnp.float32),
        "c1_b": 0.01 * jax.random.normal(ks[4], (n_feats,), jnp.float32),
        # ConvTranspose2d(n_feats -> n_feats, k=3, s=2, p=1, op=1); torch layout (Cin, Cout, 3, 3)
        "d1_w": 0.05 * jax.random.normal(ks[5], (n_feats, n_feats, 3, 3), jnp.float32),
        "d1_b": 0.01 * jax.random.normal(ks[6], (n_feats,), jnp.float32),
        # ConvTranspose2d(n_feats -> 1, k=3, s=2, p=1, op=1)
        "d2_w": 0.05 * jax.random.normal(ks[7], (n_feats, 1, 3, 3), jnp.float32),
        "d2_b": 0.01 * jax.random.normal(ks[8], (1,), jnp.float32),
    }

    prep = prepare_params(params)                 # one-time weight repack (hoisted out of forward)

    y = deep_model_forward(input_data, prep)
    y = jax.block_until_ready(y)

    assert y.shape == (B, 1, 2 * H, 2 * W), y.shape
    assert bool(jnp.all(jnp.isfinite(y)))
    assert bool(jnp.all((y >= 0.0) & (y <= 1.0)))             # sigmoid output range

    # cross-check the fused Pallas kernel against the pure-XLA reference
    y_ref = jax.block_until_ready(jax.jit(reference_forward)(input_data, params))
    assert bool(jnp.allclose(y, y_ref, atol=2e-3, rtol=0.0)), \
        float(jnp.max(jnp.abs(y - y_ref)))

    print("KERNEL_OK")
</pallas_src>

<mosaic_0001>
module attributes {stable_mosaic.version = 11 : i64} {
  func.func @_fused_forward_kernel(%arg0: i32, %arg1: memref<1x64x512xf32, #tpu.memory_space<vmem>>, %arg2: memref<8x64xf32, #tpu.memory_space<vmem>>, %arg3: memref<8x1xf32, #tpu.memory_space<vmem>>, %arg4: memref<8x8x8xf32, #tpu.memory_space<vmem>>, %arg5: memref<8x1xf32, #tpu.memory_space<vmem>>, %arg6: memref<9x128x64xf32, #tpu.memory_space<vmem>>, %arg7: memref<9x8x16xf32, #tpu.memory_space<vmem>>, %arg8: memref<128x1xf32, #tpu.memory_space<vmem>>, %arg9: memref<9x32x128xf32, #tpu.memory_space<vmem>>, %arg10: memref<9x16x32xf32, #tpu.memory_space<vmem>>, %arg11: memref<1x1xf32, #tpu.memory_space<vmem>>, %arg12: memref<1x32x32xf32, #tpu.memory_space<vmem>>) attributes {dimension_semantics = [#tpu.dimension_semantics<parallel>], iteration_bounds = array<i64: 2>, scalar_prefetch = 0 : i64, scratch_operands = 0 : i64, tpu.core_type = #tpu.core_type<tc>, window_params = [{transform_indices = @transform_0, window_bounds = array<i64: 1, 64, 512>}, {pipeline_mode = #tpu.pipeline_mode<synchronous>, transform_indices = @transform_1, window_bounds = array<i64: 8, 64>}, {pipeline_mode = #tpu.pipeline_mode<synchronous>, transform_indices = @transform_2, window_bounds = array<i64: 8, 1>}, {pipeline_mode = #tpu.pipeline_mode<synchronous>, transform_indices = @transform_3, window_bounds = array<i64: 8, 8, 8>}, {pipeline_mode = #tpu.pipeline_mode<synchronous>, transform_indices = @transform_4, window_bounds = array<i64: 8, 1>}, {pipeline_mode = #tpu.pipeline_mode<synchronous>, transform_indices = @transform_5, window_bounds = array<i64: 9, 128, 64>}, {pipeline_mode = #tpu.pipeline_mode<synchronous>, transform_indices = @transform_6, window_bounds = array<i64: 9, 8, 16>}, {pipeline_mode = #tpu.pipeline_mode<synchronous>, transform_indices = @transform_7, window_bounds = array<i64: 128, 1>}, {pipeline_mode = #tpu.pipeline_mode<synchronous>, transform_indices = @transform_8, window_bounds = array<i64: 9, 32, 128>}, {pipeline_mode = #tpu.pipeline_mode<synchronous>, transform_indices = @transform_9, window_bounds = array<i64: 9, 16, 32>}, {pipeline_mode = #tpu.pipeline_mode<synchronous>, transform_indices = @transform_10, window_bounds = array<i64: 1, 1>}, {transform_indices = @transform_11, window_bounds = array<i64: 1, 32, 32>}]} {
    %c0 = arith.constant 0 : index
    %c0_0 = arith.constant 0 : index
    %c0_1 = arith.constant 0 : index
    %0 = vector.load %arg1[%c0, %c0_0, %c0_1] : memref<1x64x512xf32, #tpu.memory_space<vmem>>, vector<1x64x512xf32>
    %1 = vector.shape_cast %0 : vector<1x64x512xf32> to vector<64x512xf32>
    %c0_2 = arith.constant 0 : index
    %c0_3 = arith.constant 0 : index
    %2 = vector.load %arg2[%c0_2, %c0_3] : memref<8x64xf32, #tpu.memory_space<vmem>>, vector<8x64xf32>
    %cst = arith.constant dense<0.000000e+00> : vector<8x512xf32>
    %3 = tpu.matmul %2, %1, %cst {dimension_numbers = #tpu.dot_dimension_numbers<[1], [0], [0], [1], [0, 0, 1, 1], [], []>} : vector<8x64xf32>, vector<64x512xf32>, vector<8x512xf32> -> vector<8x512xf32>
    %c0_4 = arith.constant 0 : index
    %c0_5 = arith.constant 0 : index
    %4 = vector.load %arg3[%c0_4, %c0_5] : memref<8x1xf32, #tpu.memory_space<vmem>>, vector<8x1xf32>
    %5 = vector.broadcast %4 : vector<8x1xf32> to vector<8x512xf32>
    %6 = arith.addf %3, %5 : vector<8x512xf32>
    %cst_6 = arith.constant 0.000000e+00 : f32
    %7 = vector.broadcast %cst_6 : f32 to vector<8x512xf32>
    %8 = arith.maximumf %6, %7 : vector<8x512xf32>
    %cst_7 = arith.constant 0.000000e+00 : f32
    %9 = vector.broadcast %cst_7 : f32 to vector<8x64xf32>
    %c0_8 = arith.constant 0 : index
    %c0_9 = arith.constant 0 : index
    %c0_10 = arith.constant 0 : index
    %10 = vector.load %arg4[%c0_8, %c0_9, %c0_10] : memref<8x8x8xf32, #tpu.memory_space<vmem>>, vector<1x8x8xf32>
    %11 = vector.shape_cast %10 : vector<1x8x8xf32> to vector<8x8xf32>
    %12 = vector.extract_strided_slice %8 {offsets = [0, 0], sizes = [8, 64], strides = [1, 1]} : vector<8x512xf32> to vector<8x64xf32>
    %cst_11 = arith.constant dense<0.000000e+00> : vector<8x64xf32>
    %13 = tpu.matmul %11, %12, %cst_11 {dimension_numbers = #tpu.dot_dimension_numbers<[1], [0], [0], [1], [0, 0, 1, 1], [], []>} : vector<8x8xf32>, vector<8x64xf32>, vector<8x64xf32> -> vector<8x64xf32>
    %14 = arith.addf %9, %13 : vector<8x64xf32>
    %c1 = arith.constant 1 : index
    %c0_12 = arith.constant 0 : index
    %c0_13 = arith.constant 0 : index
    %15 = vector.load %arg4[%c1, %c0_12, %c0_13] : memref<8x8x8xf32, #tpu.memory_space<vmem>>, vector<1x8x8xf32>
    %16 = vector.shape_cast %15 : vector<1x8x8xf32> to vector<8x8xf32>
    %17 = vector.extract_strided_slice %8 {offsets = [0, 64], sizes = [8, 64], strides = [1, 1]} : vector<8x512xf32> to vector<8x64xf32>
    %cst_14 = arith.constant dense<0.000000e+00> : vector<8x64xf32>
    %18 = tpu.matmul %16, %17, %cst_14 {dimension_numbers = #tpu.dot_dimension_numbers<[1], [0], [0], [1], [0, 0, 1, 1], [], []>} : vector<8x8xf32>, vector<8x64xf32>, vector<8x64xf32> -> vector<8x64xf32>
    %19 = arith.addf %14, %18 : vector<8x64xf32>
    %c2 = arith.constant 2 : index
    %c0_15 = arith.constant 0 : index
    %c0_16 = arith.constant 0 : index
    %20 = vector.load %arg4[%c2, %c0_15, %c0_16] : memref<8x8x8xf32, #tpu.memory_space<vmem>>, vector<1x8x8xf32>
    %21 = vector.shape_cast %20 : vector<1x8x8xf32> to vector<8x8xf32>
    %22 = vector.extract_strided_slice %8 {offsets = [0, 128], sizes = [8, 64], strides = [1, 1]} : vector<8x512xf32> to vector<8x64xf32>
    %cst_17 = arith.constant dense<0.000000e+00> : vector<8x64xf32>
    %23 = tpu.matmul %21, %22, %cst_17 {dimension_numbers = #tpu.dot_dimension_numbers<[1], [0], [0], [1], [0, 0, 1, 1], [], []>} : vector<8x8xf32>, vector<8x64xf32>, vector<8x64xf32> -> vector<8x64xf32>
    %24 = arith.addf %19, %23 : vector<8x64xf32>
    %c3 = arith.constant 3 : index
    %c0_18 = arith.constant 0 : index
    %c0_19 = arith.constant 0 : index
    %25 = vector.load %arg4[%c3, %c0_18, %c0_19] : memref<8x8x8xf32, #tpu.memory_space<vmem>>, vector<1x8x8xf32>
    %26 = vector.shape_cast %25 : vector<1x8x8xf32> to vector<8x8xf32>
    %27 = vector.extract_strided_slice %8 {offsets = [0, 192], sizes = [8, 64], strides = [1, 1]} : vector<8x512xf32> to vector<8x64xf32>
    %cst_20 = arith.constant dense<0.000000e+00> : vector<8x64xf32>
    %28 = tpu.matmul %26, %27, %cst_20 {dimension_numbers = #tpu.dot_dimension_numbers<[1], [0], [0], [1], [0, 0, 1, 1], [], []>} : vector<8x8xf32>, vector<8x64xf32>, vector<8x64xf32> -> vector<8x64xf32>
    %29 = arith.addf %24, %28 : vector<8x64xf32>
    %c4 = arith.constant 4 : index
    %c0_21 = arith.constant 0 : index
    %c0_22 = arith.constant 0 : index
    %30 = vector.load %arg4[%c4, %c0_21, %c0_22] : memref<8x8x8xf32, #tpu.memory_space<vmem>>, vector<1x8x8xf32>
    %31 = vector.shape_cast %30 : vector<1x8x8xf32> to vector<8x8xf32>
    %32 = vector.extract_strided_slice %8 {offsets = [0, 256], sizes = [8, 64], strides = [1, 1]} : vector<8x512xf32> to vector<8x64xf32>
    %cst_23 = arith.constant dense<0.000000e+00> : vector<8x64xf32>
    %33 = tpu.matmul %31, %32, %cst_23 {dimension_numbers = #tpu.dot_dimension_numbers<[1], [0], [0], [1], [0, 0, 1, 1], [], []>} : vector<8x8xf32>, vector<8x64xf32>, vector<8x64xf32> -> vector<8x64xf32>
    %34 = arith.addf %29, %33 : vector<8x64xf32>
    %c5 = arith.constant 5 : index
    %c0_24 = arith.constant 0 : index
    %c0_25 = arith.constant 0 : index
    %35 = vector.load %arg4[%c5, %c0_24, %c0_25] : memref<8x8x8xf32, #tpu.memory_space<vmem>>, vector<1x8x8xf32>
    %36 = vector.shape_cast %35 : vector<1x8x8xf32> to vector<8x8xf32>
    %37 = vector.extract_strided_slice %8 {offsets = [0, 320], sizes = [8, 64], strides = [1, 1]} : vector<8x512xf32> to vector<8x64xf32>
    %cst_26 = arith.constant dense<0.000000e+00> : vector<8x64xf32>
    %38 = tpu.matmul %36, %37, %cst_26 {dimension_numbers = #tpu.dot_dimension_numbers<[1], [0], [0], [1], [0, 0, 1, 1], [], []>} : vector<8x8xf32>, vector<8x64xf32>, vector<8x64xf32> -> vector<8x64xf32>
    %39 = arith.addf %34, %38 : vector<8x64xf32>
    %c6 = arith.constant 6 : index
    %c0_27 = arith.constant 0 : index
    %c0_28 = arith.constant 0 : index
    %40 = vector.load %arg4[%c6, %c0_27, %c0_28] : memref<8x8x8xf32, #tpu.memory_space<vmem>>, vector<1x8x8xf32>
    %41 = vector.shape_cast %40 : vector<1x8x8xf32> to vector<8x8xf32>
    %42 = vector.extract_strided_slice %8 {offsets = [0, 384], sizes = [8, 64], strides = [1, 1]} : vector<8x512xf32> to vector<8x64xf32>
    %cst_29 = arith.constant dense<0.000000e+00> : vector<8x64xf32>
    %43 = tpu.matmul %41, %42, %cst_29 {dimension_numbers = #tpu.dot_dimension_numbers<[1], [0], [0], [1], [0, 0, 1, 1], [], []>} : vector<8x8xf32>, vector<8x64xf32>, vector<8x64xf32> -> vector<8x64xf32>
    %44 = arith.addf %39, %43 : vector<8x64xf32>
    %c7 = arith.constant 7 : index
    %c0_30 = arith.constant 0 : index
    %c0_31 = arith.constant 0 : index
    %45 = vector.load %arg4[%c7, %c0_30, %c0_31] : memref<8x8x8xf32, #tpu.memory_space<vmem>>, vector<1x8x8xf32>
    %46 = vector.shape_cast %45 : vector<1x8x8xf32> to vector<8x8xf32>
    %47 = vector.extract_strided_slice %8 {offsets = [0, 448], sizes = [8, 64], strides = [1, 1]} : vector<8x512xf32> to vector<8x64xf32>
    %cst_32 = arith.constant dense<0.000000e+00> : vector<8x64xf32>
    %48 = tpu.matmul %46, %47, %cst_32 {dimension_numbers = #tpu.dot_dimension_numbers<[1], [0], [0], [1], [0, 0, 1, 1], [], []>} : vector<8x8xf32>, vector<8x64xf32>, vector<8x64xf32> -> vector<8x64xf32>
    %49 = arith.addf %44, %48 : vector<8x64xf32>
    %c0_33 = arith.constant 0 : index
    %c0_34 = arith.constant 0 : index
    %50 = vector.load %arg5[%c0_33, %c0_34] : memref<8x1xf32, #tpu.memory_space<vmem>>, vector<8x1xf32>
    %51 = vector.broadcast %50 : vector<8x1xf32> to vector<8x64xf32>
    %52 = arith.addf %49, %51 : vector<8x64xf32>
    %53 = vector.extract_strided_slice %52 {offsets = [0, 0], sizes = [8, 8], strides = [1, 1]} : vector<8x64xf32> to vector<8x8xf32>
    %54 = vector.extract_strided_slice %52 {offsets = [0, 8], sizes = [8, 8], strides = [1, 1]} : vector<8x64xf32> to vector<8x8xf32>
    %55 = vector.extract_strided_slice %52 {offsets = [0, 16], sizes = [8, 8], strides = [1, 1]} : vector<8x64xf32> to vector<8x8xf32>
    %56 = vector.extract_strided_slice %52 {offsets = [0, 24], sizes = [8, 8], strides = [1, 1]} : vector<8x64xf32> to vector<8x8xf32>
    %57 = vector.extract_strided_slice %52 {offsets = [0, 32], sizes = [8, 8], strides = [1, 1]} : vector<8x64xf32> to vector<8x8xf32>
    %58 = vector.extract_strided_slice %52 {offsets = [0, 40], sizes = [8, 8], strides = [1, 1]} : vector<8x64xf32> to vector<8x8xf32>
    %59 = vector.extract_strided_slice %52 {offsets = [0, 48], sizes = [8, 8], strides = [1, 1]} : vector<8x64xf32> to vector<8x8xf32>
    %60 = vector.extract_strided_slice %52 {offsets = [0, 56], sizes = [8, 8], strides = [1, 1]} : vector<8x64xf32> to vector<8x8xf32>
    %61 = tpu.concatenate %53, %54, %55, %56, %57, %58, %59, %60 in 0 : vector<8x8xf32>, vector<8x8xf32>, vector<8x8xf32>, vector<8x8xf32>, vector<8x8xf32>, vector<8x8xf32>, vector<8x8xf32>, vector<8x8xf32> -> vector<64x8xf32>
    %cst_35 = arith.constant 0.000000e+00 : f32
    %62 = vector.broadcast %cst_35 : f32 to vector<128x16xf32>
    %c0_36 = arith.constant 0 : index
    %c0_37 = arith.constant 0 : index
    %c0_38 = arith.constant 0 : index
    %63 = vector.load %arg6[%c0_36, %c0_37, %c0_38] : memref<9x128x64xf32, #tpu.memory_space<vmem>>, vector<1x128x64xf32>
    %64 = vector.shape_cast %63 : vector<1x128x64xf32> to vector<128x64xf32>
    %cst_39 = arith.constant dense<0.000000e+00> : vector<128x8xf32>
    %65 = tpu.matmul %64, %61, %cst_39 {dimension_numbers = #tpu.dot_dimension_numbers<[1], [0], [0], [1], [0, 0, 1, 1], [], []>} : vector<128x64xf32>, vector<64x8xf32>, vector<128x8xf32> -> vector<128x8xf32>
    %c0_40 = arith.constant 0 : index
    %c0_41 = arith.constant 0 : index
    %c0_42 = arith.constant 0 : index
    %66 = vector.load %arg7[%c0_40, %c0_41, %c0_42] : memref<9x8x16xf32, #tpu.memory_space<vmem>>, vector<1x8x16xf32>
    %67 = vector.shape_cast %66 : vector<1x8x16xf32> to vector<8x16xf32>
    %cst_43 = arith.constant dense<0.000000e+00> : vector<128x16xf32>
    %68 = tpu.matmul %65, %67, %cst_43 {dimension_numbers = #tpu.dot_dimension_numbers<[1], [0], [0], [1], [0, 0, 1, 1], [], []>} : vector<128x8xf32>, vector<8x16xf32>, vector<128x16xf32> -> vector<128x16xf32>
    %69 = arith.addf %62, %68 : vector<128x16xf32>
    %c1_44 = arith.constant 1 : index
    %c0_45 = arith.constant 0 : index
    %c0_46 = arith.constant 0 : index
    %70 = vector.load %arg6[%c1_44, %c0_45, %c0_46] : memref<9x128x64xf32, #tpu.memory_space<vmem>>, vector<1x128x64xf32>
    %71 = vector.shape_cast %70 : vector<1x128x64xf32> to vector<128x64xf32>
    %cst_47 = arith.constant dense<0.000000e+00> : vector<128x8xf32>
    %72 = tpu.matmul %71, %61, %cst_47 {dimension_numbers = #tpu.dot_dimension_numbers<[1], [0], [0], [1], [0, 0, 1, 1], [], []>} : vector<128x64xf32>, vector<64x8xf32>, vector<128x8xf32> -> vector<128x8xf32>
    %c1_48 = arith.constant 1 : index
    %c0_49 = arith.constant 0 : index
    %c0_50 = arith.constant 0 : index
    %73 = vector.load %arg7[%c1_48, %c0_49, %c0_50] : memref<9x8x16xf32, #tpu.memory_space<vmem>>, vector<1x8x16xf32>
    %74 = vector.shape_cast %73 : vector<1x8x16xf32> to vector<8x16xf32>
    %cst_51 = arith.constant dense<0.000000e+00> : vector<128x16xf32>
    %75 = tpu.matmul %72, %74, %cst_51 {dimension_numbers = #tpu.dot_dimension_numbers<[1], [0], [0], [1], [0, 0, 1, 1], [], []>} : vector<128x8xf32>, vector<8x16xf32>, vector<128x16xf32> -> vector<128x16xf32>
    %76 = arith.addf %69, %75 : vector<128x16xf32>
    %c2_52 = arith.constant 2 : index
    %c0_53 = arith.constant 0 : index
    %c0_54 = arith.constant 0 : index
    %77 = vector.load %arg6[%c2_52, %c0_53, %c0_54] : memref<9x128x64xf32, #tpu.memory_space<vmem>>, vector<1x128x64xf32>
    %78 = vector.shape_cast %77 : vector<1x128x64xf32> to vector<128x64xf32>
    %cst_55 = arith.constant dense<0.000000e+00> : vector<128x8xf32>
    %79 = tpu.matmul %78, %61, %cst_55 {dimension_numbers = #tpu.dot_dimension_numbers<[1], [0], [0], [1], [0, 0, 1, 1], [], []>} : vector<128x64xf32>, vector<64x8xf32>, vector<128x8xf32> -> vector<128x8xf32>
    %c2_56 = arith.constant 2 : index
    %c0_57 = arith.constant 0 : index
    %c0_58 = arith.constant 0 : index
    %80 = vector.load %arg7[%c2_56, %c0_57, %c0_58] : memref<9x8x16xf32, #tpu.memory_space<vmem>>, vector<1x8x16xf32>
    %81 = vector.shape_cast %80 : vector<1x8x16xf32> to vector<8x16xf32>
    %cst_59 = arith.constant dense<0.000000e+00> : vector<128x16xf32>
    %82 = tpu.matmul %79, %81, %cst_59 {dimension_numbers = #tpu.dot_dimension_numbers<[1], [0], [0], [1], [0, 0, 1, 1], [], []>} : vector<128x8xf32>, vector<8x16xf32>, vector<128x16xf32> -> vector<128x16xf32>
    %83 = arith.addf %76, %82 : vector<128x16xf32>
    %c3_60 = arith.constant 3 : index
    %c0_61 = arith.constant 0 : index
    %c0_62 = arith.constant 0 : index
    %84 = vector.load %arg6[%c3_60, %c0_61, %c0_62] : memref<9x128x64xf32, #tpu.memory_space<vmem>>, vector<1x128x64xf32>
    %85 = vector.shape_cast %84 : vector<1x128x64xf32> to vector<128x64xf32>
    %cst_63 = arith.constant dense<0.000000e+00> : vector<128x8xf32>
    %86 = tpu.matmul %85, %61, %cst_63 {dimension_numbers = #tpu.dot_dimension_numbers<[1], [0], [0], [1], [0, 0, 1, 1], [], []>} : vector<128x64xf32>, vector<64x8xf32>, vector<128x8xf32> -> vector<128x8xf32>
    %c3_64 = arith.constant 3 : index
    %c0_65 = arith.constant 0 : index
    %c0_66 = arith.constant 0 : index
    %87 = vector.load %arg7[%c3_64, %c0_65, %c0_66] : memref<9x8x16xf32, #tpu.memory_space<vmem>>, vector<1x8x16xf32>
    %88 = vector.shape_cast %87 : vector<1x8x16xf32> to vector<8x16xf32>
    %cst_67 = arith.constant dense<0.000000e+00> : vector<128x16xf32>
    %89 = tpu.matmul %86, %88, %cst_67 {dimension_numbers = #tpu.dot_dimension_numbers<[1], [0], [0], [1], [0, 0, 1, 1], [], []>} : vector<128x8xf32>, vector<8x16xf32>, vector<128x16xf32> -> vector<128x16xf32>
    %90 = arith.addf %83, %89 : vector<128x16xf32>
    %c4_68 = arith.constant 4 : index
    %c0_69 = arith.constant 0 : index
    %c0_70 = arith.constant 0 : index
    %91 = vector.load %arg6[%c4_68, %c0_69, %c0_70] : memref<9x128x64xf32, #tpu.memory_space<vmem>>, vector<1x128x64xf32>
    %92 = vector.shape_cast %91 : vector<1x128x64xf32> to vector<128x64xf32>
    %cst_71 = arith.constant dense<0.000000e+00> : vector<128x8xf32>
    %93 = tpu.matmul %92, %61, %cst_71 {dimension_numbers = #tpu.dot_dimension_numbers<[1], [0], [0], [1], [0, 0, 1, 1], [], []>} : vector<128x64xf32>, vector<64x8xf32>, vector<128x8xf32> -> vector<128x8xf32>
    %c4_72 = arith.constant 4 : index
    %c0_73 = arith.constant 0 : index
    %c0_74 = arith.constant 0 : index
    %94 = vector.load %arg7[%c4_72, %c0_73, %c0_74] : memref<9x8x16xf32, #tpu.memory_space<vmem>>, vector<1x8x16xf32>
    %95 = vector.shape_cast %94 : vector<1x8x16xf32> to vector<8x16xf32>
    %cst_75 = arith.constant dense<0.000000e+00> : vector<128x16xf32>
    %96 = tpu.matmul %93, %95, %cst_75 {dimension_numbers = #tpu.dot_dimension_numbers<[1], [0], [0], [1], [0, 0, 1, 1], [], []>} : vector<128x8xf32>, vector<8x16xf32>, vector<128x16xf32> -> vector<128x16xf32>
    %97 = arith.addf %90, %96 : vector<128x16xf32>
    %c5_76 = arith.constant 5 : index
    %c0_77 = arith.constant 0 : index
    %c0_78 = arith.constant 0 : index
    %98 = vector.load %arg6[%c5_76, %c0_77, %c0_78] : memref<9x128x64xf32, #tpu.memory_space<vmem>>, vector<1x128x64xf32>
    %99 = vector.shape_cast %98 : vector<1x128x64xf32> to vector<128x64xf32>
    %cst_79 = arith.constant dense<0.000000e+00> : vector<128x8xf32>
    %100 = tpu.matmul %99, %61, %cst_79 {dimension_numbers = #tpu.dot_dimension_numbers<[1], [0], [0], [1], [0, 0, 1, 1], [], []>} : vector<128x64xf32>, vector<64x8xf32>, vector<128x8xf32> -> vector<128x8xf32>
    %c5_80 = arith.constant 5 : index
    %c0_81 = arith.constant 0 : index
    %c0_82 = arith.constant 0 : index
    %101 = vector.load %arg7[%c5_80, %c0_81, %c0_82] : memref<9x8x16xf32, #tpu.memory_space<vmem>>, vector<1x8x16xf32>
    %102 = vector.shape_cast %101 : vector<1x8x16xf32> to vector<8x16xf32>
    %cst_83 = arith.constant dense<0.000000e+00> : vector<128x16xf32>
    %103 = tpu.matmul %100, %102, %cst_83 {dimension_numbers = #tpu.dot_dimension_numbers<[1], [0], [0], [1], [0, 0, 1, 1], [], []>} : vector<128x8xf32>, vector<8x16xf32>, vector<128x16xf32> -> vector<128x16xf32>
    %104 = arith.addf %97, %103 : vector<128x16xf32>
    %c6_84 = arith.constant 6 : index
    %c0_85 = arith.constant 0 : index
    %c0_86 = arith.constant 0 : index
    %105 = vector.load %arg6[%c6_84, %c0_85, %c0_86] : memref<9x128x64xf32, #tpu.memory_space<vmem>>, vector<1x128x64xf32>
    %106 = vector.shape_cast %105 : vector<1x128x64xf32> to vector<128x64xf32>
    %cst_87 = arith.constant dense<0.000000e+00> : vector<128x8xf32>
    %107 = tpu.matmul %106, %61, %cst_87 {dimension_numbers = #tpu.dot_dimension_numbers<[1], [0], [0], [1], [0, 0, 1, 1], [], []>} : vector<128x64xf32>, vector<64x8xf32>, vector<128x8xf32> -> vector<128x8xf32>
    %c6_88 = arith.constant 6 : index
    %c0_89 = arith.constant 0 : index
    %c0_90 = arith.constant 0 : index
    %108 = vector.load %arg7[%c6_88, %c0_89, %c0_90] : memref<9x8x16xf32, #tpu.memory_space<vmem>>, vector<1x8x16xf32>
    %109 = vector.shape_cast %108 : vector<1x8x16xf32> to vector<8x16xf32>
    %cst_91 = arith.constant dense<0.000000e+00> : vector<128x16xf32>
    %110 = tpu.matmul %107, %109, %cst_91 {dimension_numbers = #tpu.dot_dimension_numbers<[1], [0], [0], [1], [0, 0, 1, 1], [], []>} : vector<128x8xf32>, vector<8x16xf32>, vector<128x16xf32> -> vector<128x16xf32>
    %111 = arith.addf %104, %110 : vector<128x16xf32>
    %c7_92 = arith.constant 7 : index
    %c0_93 = arith.constant 0 : index
    %c0_94 = arith.constant 0 : index
    %112 = vector.load %arg6[%c7_92, %c0_93, %c0_94] : memref<9x128x64xf32, #tpu.memory_space<vmem>>, vector<1x128x64xf32>
    %113 = vector.shape_cast %112 : vector<1x128x64xf32> to vector<128x64xf32>
    %cst_95 = arith.constant dense<0.000000e+00> : vector<128x8xf32>
    %114 = tpu.matmul %113, %61, %cst_95 {dimension_numbers = #tpu.dot_dimension_numbers<[1], [0], [0], [1], [0, 0, 1, 1], [], []>} : vector<128x64xf32>, vector<64x8xf32>, vector<128x8xf32> -> vector<128x8xf32>
    %c7_96 = arith.constant 7 : index
    %c0_97 = arith.constant 0 : index
    %c0_98 = arith.constant 0 : index
    %115 = vector.load %arg7[%c7_96, %c0_97, %c0_98] : memref<9x8x16xf32, #tpu.memory_space<vmem>>, vector<1x8x16xf32>
    %116 = vector.shape_cast %115 : vector<1x8x16xf32> to vector<8x16xf32>
    %cst_99 = arith.constant dense<0.000000e+00> : vector<128x16xf32>
    %117 = tpu.matmul %114, %116, %cst_99 {dimension_numbers = #tpu.dot_dimension_numbers<[1], [0], [0], [1], [0, 0, 1, 1], [], []>} : vector<128x8xf32>, vector<8x16xf32>, vector<128x16xf32> -> vector<128x16xf32>
    %118 = arith.addf %111, %117 : vector<128x16xf32>
    %c8 = arith.constant 8 : index
    %c0_100 = arith.constant 0 : index
    %c0_101 = arith.constant 0 : index
    %119 = vector.load %arg6[%c8, %c0_100, %c0_101] : memref<9x128x64xf32, #tpu.memory_space<vmem>>, vector<1x128x64xf32>
    %120 = vector.shape_cast %119 : vector<1x128x64xf32> to vector<128x64xf32>
    %cst_102 = arith.constant dense<0.000000e+00> : vector<128x8xf32>
    %121 = tpu.matmul %120, %61, %cst_102 {dimension_numbers = #tpu.dot_dimension_numbers<[1], [0], [0], [1], [0, 0, 1, 1], [], []>} : vector<128x64xf32>, vector<64x8xf32>, vector<128x8xf32> -> vector<128x8xf32>
    %c8_103 = arith.constant 8 : index
    %c0_104 = arith.constant 0 : index
    %c0_105 = arith.constant 0 : index
    %122 = vector.load %arg7[%c8_103, %c0_104, %c0_105] : memref<9x8x16xf32, #tpu.memory_space<vmem>>, vector<1x8x16xf32>
    %123 = vector.shape_cast %122 : vector<1x8x16xf32> to vector<8x16xf32>
    %cst_106 = arith.constant dense<0.000000e+00> : vector<128x16xf32>
    %124 = tpu.matmul %121, %123, %cst_106 {dimension_numbers = #tpu.dot_dimension_numbers<[1], [0], [0], [1], [0, 0, 1, 1], [], []>} : vector<128x8xf32>, vector<8x16xf32>, vector<128x16xf32> -> vector<128x16xf32>
    %125 = arith.addf %118, %124 : vector<128x16xf32>
    %c0_107 = arith.constant 0 : index
    %c0_108 = arith.constant 0 : index
    %126 = vector.load %arg8[%c0_107, %c0_108] : memref<128x1xf32, #tpu.memory_space<vmem>>, vector<128x1xf32>
    %127 = vector.broadcast %126 : vector<128x1xf32> to vector<128x16xf32>
    %128 = arith.addf %125, %127 : vector<128x16xf32>
    %cst_109 = arith.constant 0.000000e+00 : f32
    %129 = vector.broadcast %cst_109 : f32 to vector<32x32xf32>
    %c0_110 = arith.constant 0 : index
    %c0_111 = arith.constant 0 : index
    %c0_112 = arith.constant 0 : index
    %130 = vector.load %arg9[%c0_110, %c0_111, %c0_112] : memref<9x32x128xf32, #tpu.memory_space<vmem>>, vector<1x32x128xf32>
    %131 = vector.shape_cast %130 : vector<1x32x128xf32> to vector<32x128xf32>
    %cst_113 = arith.constant dense<0.000000e+00> : vector<32x16xf32>
    %132 = tpu.matmul %131, %128, %cst_113 {dimension_numbers = #tpu.dot_dimension_numbers<[1], [0], [0], [1], [0, 0, 1, 1], [], []>} : vector<32x128xf32>, vector<128x16xf32>, vector<32x16xf32> -> vector<32x16xf32>
    %c0_114 = arith.constant 0 : index
    %c0_115 = arith.constant 0 : index
    %c0_116 = arith.constant 0 : index
    %133 = vector.load %arg10[%c0_114, %c0_115, %c0_116] : memref<9x16x32xf32, #tpu.memory_space<vmem>>, vector<1x16x32xf32>
    %134 = vector.shape_cast %133 : vector<1x16x32xf32> to vector<16x32xf32>
    %cst_117 = arith.constant dense<0.000000e+00> : vector<32x32xf32>
    %135 = tpu.matmul %132, %134, %cst_117 {dimension_numbers = #tpu.dot_dimension_numbers<[1], [0], [0], [1], [0, 0, 1, 1], [], []>} : vector<32x16xf32>, vector<16x32xf32>, vector<32x32xf32> -> vector<32x32xf32>
    %136 = arith.addf %129, %135 : vector<32x32xf32>
    %c1_118 = arith.constant 1 : index
    %c0_119 = arith.constant 0 : index
    %c0_120 = arith.constant 0 : index
    %137 = vector.load %arg9[%c1_118, %c0_119, %c0_120] : memref<9x32x128xf32, #tpu.memory_space<vmem>>, vector<1x32x128xf32>
    %138 = vector.shape_cast %137 : vector<1x32x128xf32> to vector<32x128xf32>
    %cst_121 = arith.constant dense<0.000000e+00> : vector<32x16xf32>
    %139 = tpu.matmul %138, %128, %cst_121 {dimension_numbers = #tpu.dot_dimension_numbers<[1], [0], [0], [1], [0, 0, 1, 1], [], []>} : vector<32x128xf32>, vector<128x16xf32>, vector<32x16xf32> -> vector<32x16xf32>
    %c1_122 = arith.constant 1 : index
    %c0_123 = arith.constant 0 : index
    %c0_124 = arith.constant 0 : index
    %140 = vector.load %arg10[%c1_122, %c0_123, %c0_124] : memref<9x16x32xf32, #tpu.memory_space<vmem>>, vector<1x16x32xf32>
    %141 = vector.shape_cast %140 : vector<1x16x32xf32> to vector<16x32xf32>
    %cst_125 = arith.constant dense<0.000000e+00> : vector<32x32xf32>
    %142 = tpu.matmul %139, %141, %cst_125 {dimension_numbers = #tpu.dot_dimension_numbers<[1], [0], [0], [1], [0, 0, 1, 1], [], []>} : vector<32x16xf32>, vector<16x32xf32>, vector<32x32xf32> -> vector<32x32xf32>
    %143 = arith.addf %136, %142 : vector<32x32xf32>
    %c2_126 = arith.constant 2 : index
    %c0_127 = arith.constant 0 : index
    %c0_128 = arith.constant 0 : index
    %144 = vector.load %arg9[%c2_126, %c0_127, %c0_128] : memref<9x32x128xf32, #tpu.memory_space<vmem>>, vector<1x32x128xf32>
    %145 = vector.shape_cast %144 : vector<1x32x128xf32> to vector<32x128xf32>
    %cst_129 = arith.constant dense<0.000000e+00> : vector<32x16xf32>
    %146 = tpu.matmul %145, %128, %cst_129 {dimension_numbers = #tpu.dot_dimension_numbers<[1], [0], [0], [1], [0, 0, 1, 1], [], []>} : vector<32x128xf32>, vector<128x16xf32>, vector<32x16xf32> -> vector<32x16xf32>
    %c2_130 = arith.constant 2 : index
    %c0_131 = arith.constant 0 : index
    %c0_132 = arith.constant 0 : index
    %147 = vector.load %arg10[%c2_130, %c0_131, %c0_132] : memref<9x16x32xf32, #tpu.memory_space<vmem>>, vector<1x16x32xf32>
    %148 = vector.shape_cast %147 : vector<1x16x32xf32> to vector<16x32xf32>
    %cst_133 = arith.constant dense<0.000000e+00> : vector<32x32xf32>
    %149 = tpu.matmul %146, %148, %cst_133 {dimension_numbers = #tpu.dot_dimension_numbers<[1], [0], [0], [1], [0, 0, 1, 1], [], []>} : vector<32x16xf32>, vector<16x32xf32>, vector<32x32xf32> -> vector<32x32xf32>
    %150 = arith.addf %143, %149 : vector<32x32xf32>
    %c3_134 = arith.constant 3 : index
    %c0_135 = arith.constant 0 : index
    %c0_136 = arith.constant 0 : index
    %151 = vector.load %arg9[%c3_134, %c0_135, %c0_136] : memref<9x32x128xf32, #tpu.memory_space<vmem>>, vector<1x32x128xf32>
    %152 = vector.shape_cast %151 : vector<1x32x128xf32> to vector<32x128xf32>
    %cst_137 = arith.constant dense<0.000000e+00> : vector<32x16xf32>
    %153 = tpu.matmul %152, %128, %cst_137 {dimension_numbers = #tpu.dot_dimension_numbers<[1], [0], [0], [1], [0, 0, 1, 1], [], []>} : vector<32x128xf32>, vector<128x16xf32>, vector<32x16xf32> -> vector<32x16xf32>
    %c3_138 = arith.constant 3 : index
    %c0_139 = arith.constant 0 : index
    %c0_140 = arith.constant 0 : index
    %154 = vector.load %arg10[%c3_138, %c0_139, %c0_140] : memref<9x16x32xf32, #tpu.memory_space<vmem>>, vector<1x16x32xf32>
    %155 = vector.shape_cast %154 : vector<1x16x32xf32> to vector<16x32xf32>
    %cst_141 = arith.constant dense<0.000000e+00> : vector<32x32xf32>
    %156 = tpu.matmul %153, %155, %cst_141 {dimension_numbers = #tpu.dot_dimension_numbers<[1], [0], [0], [1], [0, 0, 1, 1], [], []>} : vector<32x16xf32>, vector<16x32xf32>, vector<32x32xf32> -> vector<32x32xf32>
    %157 = arith.addf %150, %156 : vector<32x32xf32>
    %c4_142 = arith.constant 4 : index
    %c0_143 = arith.constant 0 : index
    %c0_144 = arith.constant 0 : index
    %158 = vector.load %arg9[%c4_142, %c0_143, %c0_144] : memref<9x32x128xf32, #tpu.memory_space<vmem>>, vector<1x32x128xf32>
    %159 = vector.shape_cast %158 : vector<1x32x128xf32> to vector<32x128xf32>
    %cst_145 = arith.constant dense<0.000000e+00> : vector<32x16xf32>
    %160 = tpu.matmul %159, %128, %cst_145 {dimension_numbers = #tpu.dot_dimension_numbers<[1], [0], [0], [1], [0, 0, 1, 1], [], []>} : vector<32x128xf32>, vector<128x16xf32>, vector<32x16xf32> -> vector<32x16xf32>
    %c4_146 = arith.constant 4 : index
    %c0_147 = arith.constant 0 : index
    %c0_148 = arith.constant 0 : index
    %161 = vector.load %arg10[%c4_146, %c0_147, %c0_148] : memref<9x16x32xf32, #tpu.memory_space<vmem>>, vector<1x16x32xf32>
    %162 = vector.shape_cast %161 : vector<1x16x32xf32> to vector<16x32xf32>
    %cst_149 = arith.constant dense<0.000000e+00> : vector<32x32xf32>
    %163 = tpu.matmul %160, %162, %cst_149 {dimension_numbers = #tpu.dot_dimension_numbers<[1], [0], [0], [1], [0, 0, 1, 1], [], []>} : vector<32x16xf32>, vector<16x32xf32>, vector<32x32xf32> -> vector<32x32xf32>
    %164 = arith.addf %157, %163 : vector<32x32xf32>
    %c5_150 = arith.constant 5 : index
    %c0_151 = arith.constant 0 : index
    %c0_152 = arith.constant 0 : index
    %165 = vector.load %arg9[%c5_150, %c0_151, %c0_152] : memref<9x32x128xf32, #tpu.memory_space<vmem>>, vector<1x32x128xf32>
    %166 = vector.shape_cast %165 : vector<1x32x128xf32> to vector<32x128xf32>
    %cst_153 = arith.constant dense<0.000000e+00> : vector<32x16xf32>
    %167 = tpu.matmul %166, %128, %cst_153 {dimension_numbers = #tpu.dot_dimension_numbers<[1], [0], [0], [1], [0, 0, 1, 1], [], []>} : vector<32x128xf32>, vector<128x16xf32>, vector<32x16xf32> -> vector<32x16xf32>
    %c5_154 = arith.constant 5 : index
    %c0_155 = arith.constant 0 : index
    %c0_156 = arith.constant 0 : index
    %168 = vector.load %arg10[%c5_154, %c0_155, %c0_156] : memref<9x16x32xf32, #tpu.memory_space<vmem>>, vector<1x16x32xf32>
    %169 = vector.shape_cast %168 : vector<1x16x32xf32> to vector<16x32xf32>
    %cst_157 = arith.constant dense<0.000000e+00> : vector<32x32xf32>
    %170 = tpu.matmul %167, %169, %cst_157 {dimension_numbers = #tpu.dot_dimension_numbers<[1], [0], [0], [1], [0, 0, 1, 1], [], []>} : vector<32x16xf32>, vector<16x32xf32>, vector<32x32xf32> -> vector<32x32xf32>
    %171 = arith.addf %164, %170 : vector<32x32xf32>
    %c6_158 = arith.constant 6 : index
    %c0_159 = arith.constant 0 : index
    %c0_160 = arith.constant 0 : index
    %172 = vector.load %arg9[%c6_158, %c0_159, %c0_160] : memref<9x32x128xf32, #tpu.memory_space<vmem>>, vector<1x32x128xf32>
    %173 = vector.shape_cast %172 : vector<1x32x128xf32> to vector<32x128xf32>
    %cst_161 = arith.constant dense<0.000000e+00> : vector<32x16xf32>
    %174 = tpu.matmul %173, %128, %cst_161 {dimension_numbers = #tpu.dot_dimension_numbers<[1], [0], [0], [1], [0, 0, 1, 1], [], []>} : vector<32x128xf32>, vector<128x16xf32>, vector<32x16xf32> -> vector<32x16xf32>
    %c6_162 = arith.constant 6 : index
    %c0_163 = arith.constant 0 : index
    %c0_164 = arith.constant 0 : index
    %175 = vector.load %arg10[%c6_162, %c0_163, %c0_164] : memref<9x16x32xf32, #tpu.memory_space<vmem>>, vector<1x16x32xf32>
    %176 = vector.shape_cast %175 : vector<1x16x32xf32> to vector<16x32xf32>
    %cst_165 = arith.constant dense<0.000000e+00> : vector<32x32xf32>
    %177 = tpu.matmul %174, %176, %cst_165 {dimension_numbers = #tpu.dot_dimension_numbers<[1], [0], [0], [1], [0, 0, 1, 1], [], []>} : vector<32x16xf32>, vector<16x32xf32>, vector<32x32xf32> -> vector<32x32xf32>
    %178 = arith.addf %171, %177 : vector<32x32xf32>
    %c7_166 = arith.constant 7 : index
    %c0_167 = arith.constant 0 : index
    %c0_168 = arith.constant 0 : index
    %179 = vector.load %arg9[%c7_166, %c0_167, %c0_168] : memref<9x32x128xf32, #tpu.memory_space<vmem>>, vector<1x32x128xf32>
    %180 = vector.shape_cast %179 : vector<1x32x128xf32> to vector<32x128xf32>
    %cst_169 = arith.constant dense<0.000000e+00> : vector<32x16xf32>
    %181 = tpu.matmul %180, %128, %cst_169 {dimension_numbers = #tpu.dot_dimension_numbers<[1], [0], [0], [1], [0, 0, 1, 1], [], []>} : vector<32x128xf32>, vector<128x16xf32>, vector<32x16xf32> -> vector<32x16xf32>
    %c7_170 = arith.constant 7 : index
    %c0_171 = arith.constant 0 : index
    %c0_172 = arith.constant 0 : index
    %182 = vector.load %arg10[%c7_170, %c0_171, %c0_172] : memref<9x16x32xf32, #tpu.memory_space<vmem>>, vector<1x16x32xf32>
    %183 = vector.shape_cast %182 : vector<1x16x32xf32> to vector<16x32xf32>
    %cst_173 = arith.constant dense<0.000000e+00> : vector<32x32xf32>
    %184 = tpu.matmul %181, %183, %cst_173 {dimension_numbers = #tpu.dot_dimension_numbers<[1], [0], [0], [1], [0, 0, 1, 1], [], []>} : vector<32x16xf32>, vector<16x32xf32>, vector<32x32xf32> -> vector<32x32xf32>
    %185 = arith.addf %178, %184 : vector<32x32xf32>
    %c8_174 = arith.constant 8 : index
    %c0_175 = arith.constant 0 : index
    %c0_176 = arith.constant 0 : index
    %186 = vector.load %arg9[%c8_174, %c0_175, %c0_176] : memref<9x32x128xf32, #tpu.memory_space<vmem>>, vector<1x32x128xf32>
    %187 = vector.shape_cast %186 : vector<1x32x128xf32> to vector<32x128xf32>
    %cst_177 = arith.constant dense<0.000000e+00> : vector<32x16xf32>
    %188 = tpu.matmul %187, %128, %cst_177 {dimension_numbers = #tpu.dot_dimension_numbers<[1], [0], [0], [1], [0, 0, 1, 1], [], []>} : vector<32x128xf32>, vector<128x16xf32>, vector<32x16xf32> -> vector<32x16xf32>
    %c8_178 = arith.constant 8 : index
    %c0_179 = arith.constant 0 : index
    %c0_180 = arith.constant 0 : index
    %189 = vector.load %arg10[%c8_178, %c0_179, %c0_180] : memref<9x16x32xf32, #tpu.memory_space<vmem>>, vector<1x16x32xf32>
    %190 = vector.shape_cast %189 : vector<1x16x32xf32> to vector<16x32xf32>
    %cst_181 = arith.constant dense<0.000000e+00> : vector<32x32xf32>
    %191 = tpu.matmul %188, %190, %cst_181 {dimension_numbers = #tpu.dot_dimension_numbers<[1], [0], [0], [1], [0, 0, 1, 1], [], []>} : vector<32x16xf32>, vector<16x32xf32>, vector<32x32xf32> -> vector<32x32xf32>
    %192 = arith.addf %185, %191 : vector<32x32xf32>
    %c0_182 = arith.constant 0 : index
    %c0_183 = arith.constant 0 : index
    %193 = vector.load %arg11[%c0_182, %c0_183] : memref<1x1xf32, #tpu.memory_space<vmem>>, vector<1x1xf32>
    %194 = vector.broadcast %193 : vector<1x1xf32> to vector<32x32xf32>
    %195 = arith.addf %192, %194 : vector<32x32xf32>
    %196 = arith.negf %195 : vector<32x32xf32>
    %197 = math.exp %196 : vector<32x32xf32>
    %cst_184 = arith.constant 1.000000e+00 : f32
    %198 = vector.broadcast %cst_184 : f32 to vector<32x32xf32>
    %199 = arith.addf %198, %197 : vector<32x32xf32>
    %200 = arith.divf %198, %199 : vector<32x32xf32>
    %c0_185 = arith.constant 0 : index
    %c0_186 = arith.constant 0 : index
    %c0_187 = arith.constant 0 : index
    %201 = vector.load %arg12[%c0_185, %c0_186, %c0_187] : memref<1x32x32xf32, #tpu.memory_space<vmem>>, vector<1x32x32xf32>
    %202 = vector.shape_cast %201 : vector<1x32x32xf32> to vector<32x32xf32>
    %203 = vector.shape_cast %200 : vector<32x32xf32> to vector<1x32x32xf32>
    tpu.vector_store %arg12[%c0_185, %c0_186, %c0_187], %203 {strides = array<i32>} : memref<1x32x32xf32, #tpu.memory_space<vmem>>, vector<1x32x32xf32>,
    return
  }
  func.func @transform_0(%arg0: i32) -> (i32, i32, i32) {
    %c0_i32 = arith.constant 0 : i32
    %c0_i32_0 = arith.constant 0 : i32
    %c0_i32_1 = arith.constant 0 : i32
    return %arg0, %c0_i32, %c0_i32_0 : i32, i32, i32
  }
  func.func @transform_1(%arg0: i32) -> (i32, i32) {
    %c0_i32 = arith.constant 0 : i32
    %c0_i32_0 = arith.constant 0 : i32
    %c0_i32_1 = arith.constant 0 : i32
    return %c0_i32, %c0_i32_0 : i32, i32
  }
  func.func @transform_2(%arg0: i32) -> (i32, i32) {
    %c0_i32 = arith.constant 0 : i32
    %c0_i32_0 = arith.constant 0 : i32
    %c0_i32_1 = arith.constant 0 : i32
    return %c0_i32, %c0_i32_0 : i32, i32
  }
  func.func @transform_3(%arg0: i32) -> (i32, i32, i32) {
    %c0_i32 = arith.constant 0 : i32
    %c0_i32_0 = arith.constant 0 : i32
    %c0_i32_1 = arith.constant 0 : i32
    %c0_i32_2 = arith.constant 0 : i32
    return %c0_i32, %c0_i32_0, %c0_i32_1 : i32, i32, i32
  }
  func.func @transform_4(%arg0: i32) -> (i32, i32) {
    %c0_i32 = arith.constant 0 : i32
    %c0_i32_0 = arith.constant 0 : i32
    %c0_i32_1 = arith.constant 0 : i32
    return %c0_i32, %c0_i32_0 : i32, i32
  }
  func.func @transform_5(%arg0: i32) -> (i32, i32, i32) {
    %c0_i32 = arith.constant 0 : i32
    %c0_i32_0 = arith.constant 0 : i32
    %c0_i32_1 = arith.constant 0 : i32
    %c0_i32_2 = arith.constant 0 : i32
    return %c0_i32, %c0_i32_0, %c0_i32_1 : i32, i32, i32
  }
  func.func @transform_6(%arg0: i32) -> (i32, i32, i32) {
    %c0_i32 = arith.constant 0 : i32
    %c0_i32_0 = arith.constant 0 : i32
    %c0_i32_1 = arith.constant 0 : i32
    %c0_i32_2 = arith.constant 0 : i32
    return %c0_i32, %c0_i32_0, %c0_i32_1 : i32, i32, i32
  }
  func.func @transform_7(%arg0: i32) -> (i32, i32) {
    %c0_i32 = arith.constant 0 : i32
    %c0_i32_0 = arith.constant 0 : i32
    %c0_i32_1 = arith.constant 0 : i32
    return %c0_i32, %c0_i32_0 : i32, i32
  }
  func.func @transform_8(%arg0: i32) -> (i32, i32, i32) {
    %c0_i32 = arith.constant 0 : i32
    %c0_i32_0 = arith.constant 0 : i32
    %c0_i32_1 = arith.constant 0 : i32
    %c0_i32_2 = arith.constant 0 : i32
    return %c0_i32, %c0_i32_0, %c0_i32_1 : i32, i32, i32
  }
  func.func @transform_9(%arg0: i32) -> (i32, i32, i32) {
    %c0_i32 = arith.constant 0 : i32
    %c0_i32_0 = arith.constant 0 : i32
    %c0_i32_1 = arith.constant 0 : i32
    %c0_i32_2 = arith.constant 0 : i32
    return %c0_i32, %c0_i32_0, %c0_i32_1 : i32, i32, i32
  }
  func.func @transform_10(%arg0: i32) -> (i32, i32) {
    %c0_i32 = arith.constant 0 : i32
    %c0_i32_0 = arith.constant 0 : i32
    %c0_i32_1 = arith.constant 0 : i32
    return %c0_i32, %c0_i32_0 : i32, i32
  }
  func.func @transform_11(%arg0: i32) -> (i32, i32, i32) {
    %c0_i32 = arith.constant 0 : i32
    %c0_i32_0 = arith.constant 0 : i32
    %c0_i32_1 = arith.constant 0 : i32
    return %arg0, %c0_i32, %c0_i32_0 : i32, i32, i32
  }
}

</mosaic_0001>

<bundles_post_ra>
// kernel: deep_model_forward.1
= control target key start
LH: loop header
LB: loop body
LE: loop exit
PB: predicated region body
PF: predicated region fallthrough
CT: control target
= control target key end

     0   :  { %s11314_s0 = inlined_call_operand.vmem [shape: f32[2,64,512], index: 0, kind: input, shape index: {}]   ;;  %s11315_s1 = inlined_call_operand.vmem [shape: f32[8,64], index: 1, kind: input, shape index: {}]   ;;  %s11316_s2 = inlined_call_operand.vmem [shape: f32[8,1], index: 2, kind: input, shape index: {}]   ;;  %s11317_s3 = inlined_call_operand.vmem [shape: f32[8,8,8], index: 3, kind: input, shape index: {}]   ;;  %s11318_s4 = inlined_call_operand.vmem [shape: f32[8,1], index: 4, kind: input, shape index: {}]   ;;  %s11319_s5 = inlined_call_operand.vmem [shape: f32[9,128,64], index: 5, kind: input, shape index: {}]   ;;  %s11320_s6 = inlined_call_operand.vmem [shape: f32[9,8,16], index: 6, kind: input, shape index: {}]   ;;  %s11321_s7 = inlined_call_operand.vmem [shape: f32[128,1], index: 7, kind: input, shape index: {}]   ;;  %s11322_s8 = inlined_call_operand.vmem [shape: f32[9,32,128], index: 8, kind: input, shape index: {}]   ;;  %s11323_s9 = inlined_call_operand.vmem [shape: f32[9,16,32], index: 9, kind: input, shape index: {}]   ;;  %s11324_s10 = inlined_call_operand.<no memory space> [shape: f32[1,1], index: 10, kind: input, shape index: {}]   ;;  %s11325_s11 = inlined_call_operand.hbm [shape: f32[2,32,32], index: 11, kind: output, shape index: {}]  }
   0x1   :  { %v16_v0 = vstv %s11324_s10 }
   0x2   :  { %17 = vst [vmem:[#allocation2] sm:$0x1] %v16_v0 }
   0x3   :  { %18 = vsyncpa [#allocation4], 0 }
   0x4   :  { %20 = vsyncpa [#allocation4 + $0x1], 0  ;;  %s9390_s19 = smov 0   ;;  %s9392_s20 = smov 0  }
   0x5   :  { %s9394_s21 = smov 0   ;;  %s9396_s22 = smov 0  }
   0x6 LB: > { %s9411_s10 = sadd.s32 4294967295, %s9311_s22   ;;  %s6950_s23 = sadd.s32 4294967294, %s9311_s22   ;;  %s9311_s22 = sphi %s9396_s22, %s11331_s22   ;;  %s9307_s21 = sphi %s9394_s21, %s11330_s21   ;;  %s9303_s20 = sphi %s9392_s20, %s11329_s20   ;;  %s9299_s19 = sphi %s9390_s19, %s11328_s19  }
   0x7   : > { %s9415_s24 = sadd.s32 1, %s9311_s22   ;;  %s269_s25 = sadd.s32 1, %s9307_s21 }
   0x8   : > { %s266_s26 = ssub.s32 %s9311_s22, %s9415_s24  ;;  %p279_p0 = scmp.ne.s32.totalorder %s9307_s21, %s9303_s20 }
   0x9   : > { %p267_p1 = scmp.eq.s32.totalorder %s266_s26, 0  ;;  %p280_p2 = scmp.eq.s32.totalorder %s9411_s10, 1 }
   0xa   : > { %p285_p3 = scmp.ne.s32.totalorder %s9303_s20, %s9299_s19  ;;  %p286_p4 = scmp.eq.s32.totalorder %s6950_s23, 1 }
   0xb   : > { %s9426_s27 = scalar_select %p267_p1, %s9307_s21, %s269_s25  }
   0xc   : > { %p9428_p5 = por %p280_p2, %p279_p0  ;;  %p9432_p6 = por %p286_p4, %p285_p3 }
   0xd   : > { %p6953_p7 = scmp.ge.s32.totalorder %s9311_s22, 1  ;;  %p342_p8 = scmp.lt.s32.totalorder %s9311_s22, 3 }
   0xf   : > { %p343_p9 = pnand %p6953_p7, %p342_p8 }
  0x10   : > { %p382_p10 = scmp.lt.s32.totalorder (!%p343_p9), %s9411_s10, 1  ;;  %s9316_s30 = smov (!%p343_p9), 64  }
  0x11   : > { %346 = sbr.rel (%p343_p9) target bundleno = 3601 (0xe11), region = 64  ;;  %s9318_s18 = smov (!%p343_p9), 72  }
  0x12   : > { %s9319_s12 = smov (!%p343_p9), 96   ;;  %s9322_s15 = smov (!%p343_p9), 104  }
  0x13   : > { %s379_s23 = sand.u32 (!%p343_p9), 1, %s9303_s20  }
  0x14   : > { %s6954_s25 = sshll.u32 (!%p343_p9), %s379_s23, 5  ;;  %s11274_s16 = scalar_lea.sflag (!%p343_p9), [#allocation4], %s379_s23 }
  0x15   : > { %s381_s26 = scalar_lea.vmem (!%p343_p9), [#allocation3], %s6954_s25 }
  0x16   : > { %v420_v1 = vld [vmem:[%s11316_s2] sm:$0xff]  ;;  %v9313_v2 = vmov 0.0   ;;  %s383_s13 = scalar_select %p382_p10, %s9411_s10, 1  ;;  %v9314_v3 = vmov 0   ;;  %vm426_vm0 = vcmask 523264   ;;  %vm9315_vm1 = vmmov 0  }
  0x17   : > { %494 = vmatprep.mubr.f32.mxu0 %v9313_v2  ;;  %565 = vmatprep.mubr.f32.mxu1 %v9313_v2  ;;  %v419_v36 = vld [vmem:[%s11315_s1] sm:$0xff]  ;;  %vm583_vm2 = vcmask 64512   ;;  %v6959_v52 = vld [vmem:[%s11317_s3 + $0x8] sm:$0xff]  ;;  %v6964_v54 = vld [vmem:[%s11317_s3 + $0x18] sm:$0xff]  ;;  %vm5278_vm3 = vcmask 130048   ;;  %vm6869_vm4 = vcmask 261120  }
  0x18   : > { %9233 = vset.pattern.permute.xlu0 %v9314_v3  ;;  %9234 = vset.pattern.permute.xlu1 %v9314_v3  ;;  %s7492_s14 = sshll.u32 %s383_s13, 8  ;;  %v576_v46 = vld [vmem:[%s11317_s3] sm:$0xff]  ;;  %v6962_v56 = vld [vmem:[%s11317_s3 + $0x10] sm:$0xff]  ;;  %v6968_v58 = vld [vmem:[%s11317_s3 + $0x28] sm:$0xff]  ;;  %s9320_s13 = smov 88  }
  0x19   : > { %423 = vperm.xlu0 %9233, %v420_v1   ;;  %s9448_s17 = scalar_lea.vmem %s11314_s0, %s7492_s14  ;;  %v1198_v51 = vld [vmem:[%s11318_s4] sm:$0xff]  ;;  %v6972_v61 = vld [vmem:[%s11317_s3 + $0x38] sm:$0xff]  ;;  %v6970_v62 = vld [vmem:[%s11317_s3 + $0x30] sm:$0xff]  ;;  %s9321_s14 = smov 112  }
  0x1a   : > { %v416_v4 = vld [vmem:[%s9448_s17 + $0xe8] sm:$0xff]  ;;  %v418_v5 = vld [vmem:[%s9448_s17 + $0xf8] sm:$0xff]  ;;  %v415_v6 = vld [vmem:[%s9448_s17 + $0xe0] sm:$0xff] }
  0x1b   : > { %446 = vmatprep.subr.mxu0 %v416_v4  ;;  %517 = vmatprep.subr.mxu1 %v418_v5  ;;  %v417_v7 = vld [vmem:[%s9448_s17 + $0xf0] sm:$0xff]  ;;  %v412_v8 = vld [vmem:[%s9448_s17 + $0xc8] sm:$0xff]  ;;  %v414_v9 = vld [vmem:[%s9448_s17 + $0xd8] sm:$0xff] }
  0x1c   : > { %447 = vmatpush1.msra.mxu0 %v415_v6  ;;  %518 = vmatpush1.msra.mxu1 %v417_v7  ;;  %v411_v10 = vld [vmem:[%s9448_s17 + $0xc0] sm:$0xff]  ;;  %v413_v11 = vld [vmem:[%s9448_s17 + $0xd0] sm:$0xff]  ;;  %v408_v12 = vld [vmem:[%s9448_s17 + $0xa8] sm:$0xff] }
  0x1d   : > { %448 = vmatprep.subr.mxu0 %v412_v8  ;;  %519 = vmatprep.subr.mxu1 %v414_v9  ;;  %v410_v13 = vld [vmem:[%s9448_s17 + $0xb8] sm:$0xff]  ;;  %v407_v14 = vld [vmem:[%s9448_s17 + $0xa0] sm:$0xff]  ;;  %v409_v15 = vld [vmem:[%s9448_s17 + $0xb0] sm:$0xff] }
  0x1e   : > { %449 = vmatpush1.msra.mxu0 %v411_v10  ;;  %520 = vmatpush1.msra.mxu1 %v413_v11  ;;  %v404_v16 = vld [vmem:[%s9448_s17 + $0x88] sm:$0xff]  ;;  %v406_v17 = vld [vmem:[%s9448_s17 + $0x98] sm:$0xff]  ;;  %v403_v18 = vld [vmem:[%s9448_s17 + $0x80] sm:$0xff] }
  0x1f   : > { %450 = vmatprep.subr.mxu0 %v408_v12  ;;  %521 = vmatprep.subr.mxu1 %v410_v13  ;;  %v405_v19 = vld [vmem:[%s9448_s17 + $0x90] sm:$0xff]  ;;  %v400_v20 = vld [vmem:[%s9448_s17 + $0x68] sm:$0xff]  ;;  %v402_v21 = vld [vmem:[%s9448_s17 + $0x78] sm:$0xff] }
  0x20   : > { %451 = vmatpush1.msra.mxu0 %v407_v14  ;;  %522 = vmatpush1.msra.mxu1 %v409_v15  ;;  %v399_v22 = vld [vmem:[%s9448_s17 + $0x60] sm:$0xff]  ;;  %v401_v23 = vld [vmem:[%s9448_s17 + $0x70] sm:$0xff]  ;;  %v396_v24 = vld [vmem:[%s9448_s17 + $0x48] sm:$0xff] }
  0x21   : > { %452 = vmatprep.subr.mxu0 %v404_v16  ;;  %523 = vmatprep.subr.mxu1 %v406_v17  ;;  %v398_v25 = vld [vmem:[%s9448_s17 + $0x58] sm:$0xff]  ;;  %v395_v26 = vld [vmem:[%s9448_s17 + $0x40] sm:$0xff]  ;;  %v397_v27 = vld [vmem:[%s9448_s17 + $0x50] sm:$0xff] }
  0x22   : > { %453 = vmatpush1.msra.mxu0 %v403_v18  ;;  %524 = vmatpush1.msra.mxu1 %v405_v19  ;;  %v392_v28 = vld [vmem:[%s9448_s17 + $0x28] sm:$0xff]  ;;  %v394_v29 = vld [vmem:[%s9448_s17 + $0x38] sm:$0xff]  ;;  %v391_v30 = vld [vmem:[%s9448_s17 + $0x20] sm:$0xff] }
  0x23   : > { %454 = vmatprep.subr.mxu0 %v400_v20  ;;  %525 = vmatprep.subr.mxu1 %v402_v21  ;;  %v393_v31 = vld [vmem:[%s9448_s17 + $0x30] sm:$0xff]  ;;  %v388_v32 = vld [vmem:[%s9448_s17 + $0x8] sm:$0xff]  ;;  %v390_v33 = vld [vmem:[%s9448_s17 + $0x18] sm:$0xff] }
  0x24   : > { %455 = vmatpush1.msra.mxu0 %v399_v22  ;;  %526 = vmatpush1.msra.mxu1 %v401_v23  ;;  %v387_v34 = vld [vmem:[%s9448_s17] sm:$0xff]  ;;  %v389_v35 = vld [vmem:[%s9448_s17 + $0x10] sm:$0xff]  ;;  %s9317_s17 = smov 80  }
  0x25   : > { %456 = vmatprep.subr.mxu0 %v396_v24  ;;  %527 = vmatprep.subr.mxu1 %v398_v25  ;;  %v6966_v59 = vld [vmem:[%s11317_s3 + $0x20] sm:$0xff] }
  0x26   : > { %457 = vmatpush1.msra.mxu0 %v395_v26  ;;  %528 = vmatpush1.msra.mxu1 %v397_v27  ;;  %v6990_v24 = vld [vmem:[%s11319_s5 + $0x80] sm:$0xff]  ;;  %v4997_v26 = vld [vmem:[%s11321_s7 + $0x78] sm:$0xff]  ;;  %v4995_v27 = vld [vmem:[%s11321_s7 + $0x68] sm:$0xff] }
  0x27   : > { %458 = vmatprep.subr.mxu0 %v392_v28  ;;  %529 = vmatprep.subr.mxu1 %v394_v29  ;;  %v1227_v25 = vld [vmem:[%s11319_s5] sm:$0xff]  ;;  %v4996_v28 = vld [vmem:[%s11321_s7 + $0x70] sm:$0xff]  ;;  %v4993_v29 = vld [vmem:[%s11321_s7 + $0x58] sm:$0xff] }
  0x28   : > { %459 = vmatpush1.msra.mxu0 %v391_v30  ;;  %530 = vmatpush1.msra.mxu1 %v393_v31  ;;  %v4994_v30 = vld [vmem:[%s11321_s7 + $0x60] sm:$0xff]  ;;  %v4991_v31 = vld [vmem:[%s11321_s7 + $0x48] sm:$0xff] }
  0x29   : > { %460 = vmatprep.subr.mxu0 %v388_v32  ;;  %531 = vmatprep.subr.mxu1 %v390_v33  ;;  %v4992_v32 = vld [vmem:[%s11321_s7 + $0x50] sm:$0xff]  ;;  %v4989_v33 = vld [vmem:[%s11321_s7 + $0x38] sm:$0xff] }
  0x2a   : > { %461 = vmatpush1.msra.mxu0 %v387_v34  ;;  %532 = vmatpush1.msra.mxu1 %v389_v35  ;;  %v4990_v34 = vld [vmem:[%s11321_s7 + $0x40] sm:$0xff]  ;;  %v4987_v35 = vld [vmem:[%s11321_s7 + $0x28] sm:$0xff] }
  0x2b   : > { %6957 = vmatmul.mubr.msk.f32.vlgmr.msra.gmra.mxu0 %vm426_vm0, %v419_v36  ;;  %6958 = vmatmul.mubr.msk.f32.vlgmr.msra.gmra.mxu1 %vm426_vm0, %v419_v36  ;;  %v4988_v36 = vld [vmem:[%s11321_s7 + $0x30] sm:$0xff] }
  0x2c   : > { %8118 = vmatprep.subr.mxu1 %v9313_v2  ;;  %8113 = vmatprep.subr.mxu0 %v9313_v2 }
  0x2d   : > { %8120 = vmatprep.mubr.msk.f32.mxu1 %vm9315_vm1, %v9313_v2  ;;  %8115 = vmatprep.mubr.msk.f32.mxu0 %vm9315_vm1, %v9313_v2 }
  0x94   : > { %v424_v37 = vpop.permute.xlu0 %423 }
  0xeb   : > { %v496_v38 = vpop.f32.mrf.mxu0  ;;  %v567_v39 = vpop.f32.mrf.mxu1 }
  0xec   : > { %v497_v40 = vadd.f32 %v496_v38, %v424_v37  ;;  %v568_v47 = vadd.f32 %v567_v39, %v424_v37  ;;  %v4986_v38 = vld [vmem:[%s11321_s7 + $0x20] sm:$0xff]  ;;  %v4983_v39 = vld [vmem:[%s11321_s7 + $0x8] sm:$0xff] }
  0xed   : > { %v498_v41 = vpop.f32.mrf.mxu0  ;;  %v569_v42 = vpop.f32.mrf.mxu1 }
  0xee   : > { %v572_v43 = vmax.f32 %v497_v40, 0.0  ;;  %v499_v44 = vadd.f32 %v498_v41, %v424_v37  ;;  %v570_v45 = vadd.f32 %v569_v42, %v424_v37  ;;  %v574_v50 = vmax.f32 %v568_v47, 0.0  ;;  %v4985_v37 = vld [vmem:[%s11321_s7 + $0x18] sm:$0xff]  ;;  %v4984_v40 = vld [vmem:[%s11321_s7 + $0x10] sm:$0xff]  ;;  %v7482_v41 = vld [vmem:[#allocation2] ss:$0 sm:$0xff] }
  0xef   : > { %v4982_v42 = vld [vmem:[%s11321_s7] sm:$0xff] }
  0xf0   : > { %580 = vrot.lane.b32.xlu0 %v572_v43, %s9316_s30  ;;  %8119 = vmatpush3.msra.mxu1 %v572_v43  ;;  %v573_v48 = vmax.f32 %v499_v44, 0.0  ;;  %v575_v49 = vmax.f32 %v570_v45, 0.0 }
  0xf1   : > { %8121 = vmatmul.mubr.msk.f32.vlgmr.msra.gmra.mxu1 %vm583_vm2, %v576_v46  ;;  %8128 = vmatprep.subr.mxu1 %v9313_v2 }
  0xf2   : > { %809 = vrot.lane.b32.xlu1 %v573_v48, %s9316_s30  ;;  %8130 = vmatprep.mubr.msk.f32.mxu1 %vm9315_vm1, %v9313_v2 }
  0xf4   : > { %1121 = vrot.lane.b32.xlu0 %v575_v49, %s9316_s30 }
  0xf6   : > { %965 = vrot.lane.b32.xlu1 %v574_v50, %s9316_s30  ;;  %s7493_s30 = sshll.u32 %s9411_s10, 9 }
  0xfa   : > { %1201 = vperm.xlu1 %9234, %v1198_v51   ;;  %v7022_v51 = vld [vmem:[%s11320_s6 + $0x8] sm:$0xff] }
 0x162   : > { %v581_v53 = vpop.permute.xlu0 %580 }
 0x163   : > { %8114 = vmatpush3.msra.mxu0 %v581_v53  ;;  %v6992_v53 = vld [vmem:[%s11319_s5 + $0x90] sm:$0xff] }
 0x164   : > { %v810_v55 = vpop.permute.xlu1 %809  ;;  %8116 = vmatmul.mubr.msk.f32.vlgmr.msra.gmra.mxu0 %vm583_vm2, %v6959_v52  ;;  %8123 = vmatprep.subr.mxu0 %v9313_v2  ;;  %v1228_v52 = vld [vmem:[%s11319_s5 + $0x8] sm:$0xff] }
 0x165   : > { %8124 = vmatpush3.msra.mxu0 %v573_v48  ;;  %8129 = vmatpush3.msra.mxu1 %v810_v55  ;;  %v6993_v55 = vld [vmem:[%s11319_s5 + $0x98] sm:$0xff] }
 0x166   : > { %8125 = vmatprep.mubr.msk.f32.mxu0 %vm9315_vm1, %v9313_v2  ;;  %8131 = vmatmul.mubr.msk.f32.vlgmr.msra.gmra.mxu1 %vm583_vm2, %v6964_v54  ;;  %v1122_v60 = vpop.permute.xlu0 %1121  ;;  %v1229_v54 = vld [vmem:[%s11319_s5 + $0x10] sm:$0xff] }
 0x167   : > { %8133 = vmatprep.subr.mxu0 %v9313_v2  ;;  %8138 = vmatprep.subr.mxu1 %v9313_v2 }
 0x168   : > { %v966_v57 = vpop.permute.xlu1 %965  ;;  %8126 = vmatmul.mubr.msk.f32.vlgmr.msra.gmra.mxu0 %vm583_vm2, %v6962_v56  ;;  %8140 = vmatprep.mubr.msk.f32.mxu1 %vm9315_vm1, %v9313_v2  ;;  %v6994_v56 = vld [vmem:[%s11319_s5 + $0xa0] sm:$0xff] }
 0x169   : > { %8134 = vmatpush3.msra.mxu0 %v574_v50  ;;  %8139 = vmatpush3.msra.mxu1 %v966_v57  ;;  %v6991_v50 = vld [vmem:[%s11319_s5 + $0x88] sm:$0xff]  ;;  %v1230_v57 = vld [vmem:[%s11319_s5 + $0x18] sm:$0xff] }
 0x16a   : > { %8148 = vmatprep.subr.mxu1 %v9313_v2  ;;  %8135 = vmatprep.mubr.msk.f32.mxu0 %vm9315_vm1, %v9313_v2 }
 0x16b   : > { %8141 = vmatmul.mubr.msk.f32.vlgmr.msra.gmra.mxu1 %vm583_vm2, %v6968_v58  ;;  %8143 = vmatprep.subr.mxu0 %v9313_v2  ;;  %v1231_v58 = vld [vmem:[%s11319_s5 + $0x20] sm:$0xff] }
 0x16c   : > { %8149 = vmatpush3.msra.mxu1 %v1122_v60  ;;  %8136 = vmatmul.mubr.msk.f32.vlgmr.msra.gmra.mxu0 %vm583_vm2, %v6966_v59  ;;  %v6995_v59 = vld [vmem:[%s11319_s5 + $0xa8] sm:$0xff]  ;;  %v6996_v60 = vld [vmem:[%s11319_s5 + $0xb0] sm:$0xff] }
 0x16d   : > { %8144 = vmatpush3.msra.mxu0 %v575_v49  ;;  %8145 = vmatprep.mubr.msk.f32.mxu0 %vm9315_vm1, %v9313_v2 }
 0x16e   : > { %8150 = vmatprep.mubr.msk.f32.mxu1 %vm9315_vm1, %v9313_v2 }
 0x16f   : > { %8151 = vmatmul.mubr.msk.f32.vlgmr.msra.gmra.mxu1 %vm583_vm2, %v6972_v61  ;;  %v1232_v61 = vld [vmem:[%s11319_s5 + $0x28] sm:$0xff] }
 0x170   : > { %8146 = vmatmul.mubr.msk.f32.vlgmr.msra.gmra.mxu0 %vm583_vm2, %v6970_v62  ;;  %8209 = vmatprep.mubr.msk.f32.mxu1 %vm426_vm0, %v6990_v24  ;;  %v1233_v62 = vld [vmem:[%s11319_s5 + $0x30] sm:$0xff] }
 0x171   : > { %8169 = vmatprep.mubr.msk.f32.mxu0 %vm426_vm0, %v1227_v25 }
 0x175   : > { %v1202_v21 = vpop.permute.xlu1 %1201 }
 0x1b1   : > { %v726_v63 = vpop.f32.mrf.mxu1 }
 0x1b3   : > { %v8122_v0 = vpop.f32.mrf.mxu1 }
 0x1b4   : > { %v6998_v0 = vld [vmem:[%s11319_s5 + $0xc0] sm:$0xff] }
 0x224   : > { %v653_v1 = vpop.f32.mrf.mxu0 }
 0x225   : > { %v727_v5 = vadd.f32 %v726_v63, %v653_v1  ;;  %v6997_v63 = vld [vmem:[%s11319_s5 + $0xb8] sm:$0xff] }
 0x226   : > { %v8117_v3 = vpop.f32.mrf.mxu0  ;;  %v881_v4 = vpop.f32.mrf.mxu1  ;;  %v1234_v1 = vld [vmem:[%s11319_s5 + $0x38] sm:$0xff] }
 0x227   : > { %v1235_v3 = vld [vmem:[%s11319_s5 + $0x40] sm:$0xff] }
 0x228   : > { %v801_v6 = vpop.f32.mrf.mxu0  ;;  %v8132_v7 = vpop.f32.mrf.mxu1 }
 0x229   : > { %v805_v8 = vadd.f32 %v801_v6, %v727_v5  ;;  %v7000_v5 = vld [vmem:[%s11319_s5 + $0xd0] sm:$0xff]  ;;  %v1236_v6 = vld [vmem:[%s11319_s5 + $0x48] sm:$0xff] }
 0x22a   : > { %v8127_v9 = vpop.f32.mrf.mxu0  ;;  %v1237_v7 = vld [vmem:[%s11319_s5 + $0x50] sm:$0xff] }
 0x22b   : > { %v885_v10 = vadd.f32 %v881_v4, %v805_v8  ;;  %v1037_v11 = vpop.f32.mrf.mxu1  ;;  %v6999_v4 = vld [vmem:[%s11319_s5 + $0xc8] sm:$0xff]  ;;  %v7001_v8 = vld [vmem:[%s11319_s5 + $0xd8] sm:$0xff]  ;;  %v7002_v9 = vld [vmem:[%s11319_s5 + $0xe0] sm:$0xff] }
 0x22c   : > { %v957_v12 = vpop.f32.mrf.mxu0 }
 0x22d   : > { %v961_v13 = vadd.f32 %v957_v12, %v885_v10  ;;  %v8142_v14 = vpop.f32.mrf.mxu1  ;;  %v1238_v10 = vld [vmem:[%s11319_s5 + $0x58] sm:$0xff]  ;;  %v7003_v12 = vld [vmem:[%s11319_s5 + $0xe8] sm:$0xff] }
 0x22e   : > { %v8137_v2 = vpop.f32.mrf.mxu0  ;;  %v1240_v14 = vld [vmem:[%s11319_s5 + $0x68] sm:$0xff] }
 0x22f   : > { %v1041_v15 = vadd.f32 %v1037_v11, %v961_v13  ;;  %v1193_v16 = vpop.f32.mrf.mxu1  ;;  %v1239_v11 = vld [vmem:[%s11319_s5 + $0x60] sm:$0xff]  ;;  %v7004_v13 = vld [vmem:[%s11319_s5 + $0xf0] sm:$0xff] }
 0x230   : > { %v1113_v17 = vpop.f32.mrf.mxu0  ;;  %v1241_v2 = vld [vmem:[%s11319_s5 + $0x70] sm:$0xff] }
 0x231   : > { %v1117_v18 = vadd.f32 %v1113_v17, %v1041_v15  ;;  %v8152_v19 = vpop.f32.mrf.mxu1  ;;  %v7005_v15 = vld [vmem:[%s11319_s5 + $0xf8] sm:$0xff]  ;;  %v1436_v17 = vld [vmem:[%s11320_s6] sm:$0xff] }
 0x232   : > { %v8147_v20 = vpop.f32.mrf.mxu0 }
 0x233   : > { %v1197_v22 = vadd.f32 %v1193_v16, %v1117_v18  ;;  %v1242_v16 = vld [vmem:[%s11319_s5 + $0x78] sm:$0xff] }
 0x235   : > { %v9546_v23 = vadd.f32 %v1202_v21, %v1197_v22 }
 0x237   : > { %1221 = vrot.lane.b32.xlu1 %v9546_v23, %s9317_s17  ;;  %1224 = vrot.lane.b32.xlu0 %v9546_v23, %s9318_s18  ;;  %s9323_s18 = smov 120   ;;  %s9324_s17 = smov [#allocation3]  }
 0x23b   : > { %1215 = vrot.lane.b32.xlu1 %v9546_v23, %s9319_s12  ;;  %1218 = vrot.lane.b32.xlu0 %v9546_v23, %s9320_s13  ;;  %s6888_s12 = sshll.u32 %s381_s26, 4  ;;  %s11272_s12 = int_to_ptr.vmem [resolvable:$true] %s6888_s12 }
 0x23c   : > { %s9251_s10 = scalar_lea.vmem %s11272_s12, 512 }
 0x23d   : > { %p9252_p11 = scmp.ne.s32.totalorder %s11272_s12, %s9251_s10 }
 0x23f   : > { %1209 = vrot.lane.b32.xlu1 %v9546_v23, %s9321_s14  ;;  %1212 = vrot.lane.b32.xlu0 %v9546_v23, %s9322_s15  ;;  %s11270_s15 = scalar_lea.hbm %s11325_s11, %s7493_s30  ;;  %p9253_p12 = pnand %p9252_p11, %p9428_p5 }
 0x241   : > { %p9254_p13 = pneg %p9253_p12 }
 0x243   : > { %5075 = vperm.xlu1 %9234, %v4997_v26   ;;  %1206 = vrot.lane.b32.xlu0 %v9546_v23, %s9323_s18  ;;  %s9255_s18 = sshll.u32 %s9324_s17, 4  ;;  %s9256_s18 = int_to_ptr.vmem [resolvable:$false] %s9255_s18 }
 0x244   : > { %s9257_s25 = scalar_lea.vmem %s9256_s18, 1024  ;;  %p9258_p0 = scmp.lt.s32.totalorder %s11272_s12, %s9256_s18 }
 0x245   : > { %p9259_p1 = scmp.lt.s32.totalorder %s9257_s25, %s9251_s10 }
 0x247   : > { %5065 = vperm.xlu1 %9234, %v4995_v27   ;;  %5070 = vperm.xlu0 %9233, %v4996_v28   ;;  %p9260_p2 = por %p9259_p1, %p9258_p0 }
 0x249   : > { %p9261_p3 = pnand %p9260_p2, %p9254_p13 }
 0x24b   : > { %5055 = vperm.xlu1 %9234, %v4993_v29   ;;  %5060 = vperm.xlu0 %9233, %v4994_v30  }
 0x24f   : > { %5045 = vperm.xlu1 %9234, %v4991_v31   ;;  %5050 = vperm.xlu0 %9233, %v4992_v32  }
 0x253   : > { %5035 = vperm.xlu1 %9234, %v4989_v33   ;;  %5040 = vperm.xlu0 %9233, %v4990_v34   ;;  %v7055_v33 = vld [vmem:[%s11319_s5 + $0x100] sm:$0xff] }
 0x257   : > { %5025 = vperm.xlu1 %9234, %v4987_v35   ;;  %5030 = vperm.xlu0 %9233, %v4988_v36   ;;  %v7056_v36 = vld [vmem:[%s11319_s5 + $0x108] sm:$0xff] }
 0x25b   : > { %5015 = vperm.xlu1 %9234, %v4985_v37   ;;  %5020 = vperm.xlu0 %9233, %v4986_v38   ;;  %v7057_v38 = vld [vmem:[%s11319_s5 + $0x110] sm:$0xff] }
 0x25f   : > { %5005 = vperm.xlu1 %9234, %v4983_v39   ;;  %5010 = vperm.xlu0 %9233, %v4984_v40  }
 0x263   : > { %6838 = vperm.xlu1 %9234, %v7482_v41   ;;  %5000 = vperm.xlu0 %9233, %v4982_v42   ;;  %v7058_v42 = vld [vmem:[%s11319_s5 + $0x118] sm:$0xff] }
 0x2a9   : > { %v9611_v43 = vpop.permute.xlu1 %1221  ;;  %v9613_v44 = vpop.permute.xlu0 %1224 }
 0x2aa   : > { %8153 = vmatprep.subr.mxu0 %v9613_v44  ;;  %8193 = vmatprep.subr.mxu1 %v9613_v44 }
 0x2ab   : > { %8154 = vmatpush3.msra.mxu0 %v9613_v44  ;;  %8194 = vmatpush3.msra.mxu1 %v9613_v44 }
 0x2ac   : > { %8155 = vmatprep.subr.mxu0 %v9611_v43  ;;  %8195 = vmatprep.subr.mxu1 %v9611_v43 }
 0x2ad   : > { %v9621_v45 = vpop.permute.xlu1 %1215  ;;  %8156 = vmatpush3.msra.mxu0 %v9611_v43  ;;  %8196 = vmatpush3.msra.mxu1 %v9611_v43  ;;  %v9625_v46 = vpop.permute.xlu0 %1218 }
 0x2ae   : > { %8157 = vmatprep.subr.mxu0 %v9625_v46  ;;  %8197 = vmatprep.subr.mxu1 %v9625_v46 }
 0x2af   : > { %8158 = vmatpush3.msra.mxu0 %v9625_v46  ;;  %8198 = vmatpush3.msra.mxu1 %v9625_v46 }
 0x2b0   : > { %8159 = vmatprep.subr.mxu0 %v9621_v45  ;;  %8199 = vmatprep.subr.mxu1 %v9621_v45 }
 0x2b1   : > { %8160 = vmatpush3.msra.mxu0 %v9621_v45  ;;  %8200 = vmatpush3.msra.mxu1 %v9621_v45  ;;  %v9635_v47 = vpop.permute.xlu0 %1212  ;;  %v9639_v48 = vpop.permute.xlu1 %1209 }
 0x2b2   : > { %8161 = vmatprep.subr.mxu0 %v9635_v47  ;;  %8201 = vmatprep.subr.mxu1 %v9635_v47 }
 0x2b3   : > { %8162 = vmatpush3.msra.mxu0 %v9635_v47  ;;  %8202 = vmatpush3.msra.mxu1 %v9635_v47 }
 0x2b4   : > { %8163 = vmatprep.subr.mxu0 %v9639_v48  ;;  %8203 = vmatprep.subr.mxu1 %v9639_v48 }
 0x2b5   : > { %8164 = vmatpush3.msra.mxu0 %v9639_v48  ;;  %8204 = vmatpush3.msra.mxu1 %v9639_v48  ;;  %v9647_v49 = vpop.permute.xlu0 %1206 }
 0x2b6   : > { %8165 = vmatprep.subr.mxu0 %v9647_v49  ;;  %8205 = vmatprep.subr.mxu1 %v9647_v49 }
 0x2b7   : > { %8166 = vmatpush3.msra.mxu0 %v9647_v49  ;;  %8206 = vmatpush3.msra.mxu1 %v9647_v49 }
 0x2b8   : > { %8167 = vmatprep.subr.mxu0 %v9546_v23  ;;  %8207 = vmatprep.subr.mxu1 %v9546_v23 }
 0x2b9   : > { %8168 = vmatpush3.msra.mxu0 %v9546_v23  ;;  %8208 = vmatpush3.msra.mxu1 %v9546_v23 }
 0x2ba   : > { %8210 = vmatmul.mubr.msk.f32.vlgmr.msra.gmra.mxu1 %vm426_vm0, %v6991_v50  ;;  %8233 = vmatprep.subr.mxu0 %v7022_v51  ;;  %v7059_v50 = vld [vmem:[%s11319_s5 + $0x120] sm:$0xff] }
 0x2bb   : > { %8170 = vmatmul.mubr.msk.f32.vlgmr.msra.gmra.mxu0 %vm426_vm0, %v1228_v52  ;;  %8212 = vmatprep.mubr.msk.f32.mxu1 %vm426_vm0, %v6992_v53 }
 0x2bc   : > { %8234 = vmatpush3.msra.mxu0 %v7022_v51  ;;  %8172 = vmatprep.mubr.msk.f32.mxu0 %vm426_vm0, %v1229_v54  ;;  %v7060_v54 = vld [vmem:[%s11319_s5 + $0x128] sm:$0xff] }
 0x2bd   : > { %8285 = vmatprep.subr.mxu0 %v9613_v44  ;;  %9179 = vmatprep.subr.mxu1 %v7022_v51 }
 0x2be   : > { %8213 = vmatmul.mubr.msk.f32.gmra.mxu1 %vm426_vm0, %v6993_v55 }
 0x2bf   : > { %8215 = vmatprep.mubr.msk.f32.mxu1 %vm426_vm0, %v6994_v56  ;;  %8173 = vmatmul.mubr.msk.f32.gmra.mxu0 %vm426_vm0, %v1230_v57  ;;  %v7061_v56 = vld [vmem:[%s11319_s5 + $0x130] sm:$0xff]  ;;  %v7062_v57 = vld [vmem:[%s11319_s5 + $0x138] sm:$0xff] }
 0x2c0   : > { %8175 = vmatprep.mubr.msk.f32.mxu0 %vm426_vm0, %v1231_v58  ;;  %9180 = vmatpush3.msra.mxu1 %v7022_v51 }
 0x2c1   : > { %8259 = vmatprep.subr.mxu1 %v1436_v17 }
 0x2c2   : > { %8216 = vmatmul.mubr.msk.f32.gmra.mxu1 %vm426_vm0, %v6995_v59  ;;  %v7063_v59 = vld [vmem:[%s11319_s5 + $0x140] sm:$0xff] }
 0x2c3   : > { %8218 = vmatprep.mubr.msk.f32.mxu1 %vm426_vm0, %v6996_v60  ;;  %8176 = vmatmul.mubr.msk.f32.gmra.mxu0 %vm426_vm0, %v1232_v61  ;;  %v7064_v60 = vld [vmem:[%s11319_s5 + $0x148] sm:$0xff]  ;;  %v7065_v61 = vld [vmem:[%s11319_s5 + $0x150] sm:$0xff] }
 0x2c4   : > { %8178 = vmatprep.mubr.msk.f32.mxu0 %vm426_vm0, %v1233_v62 }
 0x2c6   : > { %8219 = vmatmul.mubr.msk.f32.gmra.mxu1 %vm426_vm0, %v6997_v63 }
 0x2c7   : > { %8221 = vmatprep.mubr.msk.f32.mxu1 %vm426_vm0, %v6998_v0  ;;  %8179 = vmatmul.mubr.msk.f32.gmra.mxu0 %vm426_vm0, %v1234_v1  ;;  %v7066_v0 = vld [vmem:[%s11319_s5 + $0x158] sm:$0xff]  ;;  %v7067_v1 = vld [vmem:[%s11319_s5 + $0x160] sm:$0xff] }
 0x2c8   : > { %8181 = vmatprep.mubr.msk.f32.mxu0 %vm426_vm0, %v1235_v3 }
 0x2ca   : > { %8222 = vmatmul.mubr.msk.f32.gmra.mxu1 %vm426_vm0, %v6999_v4  ;;  %v7068_v4 = vld [vmem:[%s11319_s5 + $0x168] sm:$0xff] }
 0x2cb   : > { %8224 = vmatprep.mubr.msk.f32.mxu1 %vm426_vm0, %v7000_v5  ;;  %8182 = vmatmul.mubr.msk.f32.gmra.mxu0 %vm426_vm0, %v1236_v6  ;;  %v7069_v5 = vld [vmem:[%s11319_s5 + $0x170] sm:$0xff] }
 0x2cc   : > { %8184 = vmatprep.mubr.msk.f32.mxu0 %vm426_vm0, %v1237_v7  ;;  %v7070_v7 = vld [vmem:[%s11319_s5 + $0x178] sm:$0xff] }
 0x2ce   : > { %8225 = vmatmul.mubr.msk.f32.gmra.mxu1 %vm426_vm0, %v7001_v8  ;;  %v7104_v8 = vld [vmem:[%s11319_s5 + $0x180] sm:$0xff] }
 0x2cf   : > { %8227 = vmatprep.mubr.msk.f32.mxu1 %vm426_vm0, %v7002_v9  ;;  %8185 = vmatmul.mubr.msk.f32.gmra.mxu0 %vm426_vm0, %v1238_v10  ;;  %v7105_v10 = vld [vmem:[%s11319_s5 + $0x188] sm:$0xff] }
 0x2d0   : > { %8187 = vmatprep.mubr.msk.f32.mxu0 %vm426_vm0, %v1239_v11  ;;  %v7106_v11 = vld [vmem:[%s11319_s5 + $0x190] sm:$0xff] }
 0x2d2   : > { %8228 = vmatmul.mubr.msk.f32.gmra.mxu1 %vm426_vm0, %v7003_v12 }
 0x2d3   : > { %8230 = vmatprep.mubr.msk.f32.mxu1 %vm426_vm0, %v7004_v13  ;;  %8188 = vmatmul.mubr.msk.f32.gmra.mxu0 %vm426_vm0, %v1240_v14  ;;  %v7107_v13 = vld [vmem:[%s11319_s5 + $0x198] sm:$0xff]  ;;  %v7108_v14 = vld [vmem:[%s11319_s5 + $0x1a0] sm:$0xff] }
 0x2d4   : > { %8190 = vmatprep.mubr.msk.f32.mxu0 %vm426_vm0, %v1241_v2 }
 0x2d6   : > { %8231 = vmatmul.mubr.msk.f32.gmra.mxu1 %vm426_vm0, %v7005_v15  ;;  %v7109_v15 = vld [vmem:[%s11319_s5 + $0x1a8] sm:$0xff] }
 0x2d7   : > { %8191 = vmatmul.mubr.msk.f32.gmra.mxu0 %vm426_vm0, %v1242_v16  ;;  %v7110_v16 = vld [vmem:[%s11319_s5 + $0x1b0] sm:$0xff] }
 0x37a   : > { %v8211_v18 = vpop.f32.mrf.mxu1 }
 0x37b   : > { %v9785_v20 = vpop.f32.mrf.mxu0 }
 0x37c   : > { %v1568_v19 = vpop.f32.mrf.mxu1 }
 0x37d   : > { %8235 = vmatprep.mubr.msk.f32.mxu0 %vm583_vm2, %v1568_v19  ;;  %v9792_v24 = vpop.f32.mrf.mxu0  ;;  %v7112_v19 = vld [vmem:[%s11319_s5 + $0x1c0] sm:$0xff] }
 0x37e   : > { %v8214_v21 = vpop.f32.mrf.mxu1  ;;  %8236 = vmatmul.mubr.msk.f32.vlgmr.msra.gmra.mxu0 %vm583_vm2, %v8211_v18  ;;  %v7111_v18 = vld [vmem:[%s11319_s5 + $0x1b8] sm:$0xff] }
 0x37f   : > { %8286 = vmatpush3.msra.mxu0 %v9613_v44  ;;  %v9800_v27 = vpop.f32.mrf.mxu0 }
 0x380   : > { %8287 = vmatprep.subr.mxu0 %v9611_v43  ;;  %v1578_v22 = vpop.f32.mrf.mxu1 }
 0x381   : > { %8288 = vmatpush3.msra.mxu0 %v9611_v43  ;;  %8238 = vmatprep.mubr.msk.f32.mxu0 %vm583_vm2, %v1578_v22  ;;  %v1367_v30 = vpop.f32.mrf.mxu0  ;;  %v7115_v22 = vld [vmem:[%s11319_s5 + $0x1d8] sm:$0xff] }
 0x382   : > { %8289 = vmatprep.subr.mxu0 %v9625_v46  ;;  %v8217_v25 = vpop.f32.mrf.mxu1  ;;  %8239 = vmatmul.mubr.msk.f32.gmra.mxu0 %vm583_vm2, %v8214_v21  ;;  %v7114_v21 = vld [vmem:[%s11319_s5 + $0x1d0] sm:$0xff] }
 0x383   : > { %8290 = vmatpush3.msra.mxu0 %v9625_v46  ;;  %v9817_v34 = vpop.f32.mrf.mxu0 }
 0x384   : > { %8291 = vmatprep.subr.mxu0 %v9621_v45  ;;  %v1588_v26 = vpop.f32.mrf.mxu1 }
 0x385   : > { %8292 = vmatpush3.msra.mxu0 %v9621_v45  ;;  %8241 = vmatprep.mubr.msk.f32.mxu0 %vm583_vm2, %v1588_v26  ;;  %v1377_v39 = vpop.f32.mrf.mxu0  ;;  %v7118_v26 = vld [vmem:[%s11319_s5 + $0x1f0] sm:$0xff] }
 0x386   : > { %8293 = vmatprep.subr.mxu0 %v9635_v47  ;;  %v8220_v28 = vpop.f32.mrf.mxu1  ;;  %8242 = vmatmul.mubr.msk.f32.gmra.mxu0 %vm583_vm2, %v8217_v25  ;;  %v7117_v25 = vld [vmem:[%s11319_s5 + $0x1e8] sm:$0xff] }
 0x387   : > { %8294 = vmatpush3.msra.mxu0 %v9635_v47  ;;  %v8180_v51 = vpop.f32.mrf.mxu0 }
 0x388   : > { %8295 = vmatprep.subr.mxu0 %v9639_v48  ;;  %v1598_v29 = vpop.f32.mrf.mxu1 }
 0x389   : > { %8296 = vmatpush3.msra.mxu0 %v9639_v48  ;;  %8244 = vmatprep.mubr.msk.f32.mxu0 %vm583_vm2, %v1598_v29  ;;  %v1387_v55 = vpop.f32.mrf.mxu0  ;;  %v7154_v29 = vld [vmem:[%s11319_s5 + $0x208] sm:$0xff] }
 0x38a   : > { %8297 = vmatprep.subr.mxu0 %v9647_v49  ;;  %v8223_v31 = vpop.f32.mrf.mxu1  ;;  %8245 = vmatmul.mubr.msk.f32.gmra.mxu0 %vm583_vm2, %v8220_v28  ;;  %v7153_v28 = vld [vmem:[%s11319_s5 + $0x200] sm:$0xff] }
 0x38b   : > { %8298 = vmatpush3.msra.mxu0 %v9647_v49  ;;  %v8183_v58 = vpop.f32.mrf.mxu0 }
 0x38c   : > { %8299 = vmatprep.subr.mxu0 %v9546_v23  ;;  %v1608_v32 = vpop.f32.mrf.mxu1 }
 0x38d   : > { %8300 = vmatpush3.msra.mxu0 %v9546_v23  ;;  %8247 = vmatprep.mubr.msk.f32.mxu0 %vm583_vm2, %v1608_v32  ;;  %v1397_v62 = vpop.f32.mrf.mxu0  ;;  %v7157_v32 = vld [vmem:[%s11319_s5 + $0x220] sm:$0xff] }
 0x38e   : > { %8351 = vmatprep.subr.mxu0 %v9613_v44  ;;  %v8226_v35 = vpop.f32.mrf.mxu1  ;;  %8248 = vmatmul.mubr.msk.f32.gmra.mxu0 %vm583_vm2, %v8223_v31  ;;  %v7156_v31 = vld [vmem:[%s11319_s5 + $0x218] sm:$0xff] }
 0x38f   : > { %8301 = vmatprep.mubr.msk.f32.mxu0 %vm426_vm0, %v7055_v33  ;;  %v8186_v63 = vpop.f32.mrf.mxu0  ;;  %v7158_v33 = vld [vmem:[%s11319_s5 + $0x228] sm:$0xff] }
 0x390   : > { %v1618_v37 = vpop.f32.mrf.mxu1 }
 0x391   : > { %8250 = vmatprep.mubr.msk.f32.mxu1 %vm583_vm2, %v1618_v37  ;;  %v1407_v3 = vpop.f32.mrf.mxu0  ;;  %v7161_v37 = vld [vmem:[%s11319_s5 + $0x240] sm:$0xff] }
 0x392   : > { %v8229_v40 = vpop.f32.mrf.mxu1  ;;  %8251 = vmatmul.mubr.msk.f32.vlgmr.msra.gmra.mxu1 %vm583_vm2, %v8226_v35  ;;  %8302 = vmatmul.mubr.msk.f32.vlgmr.msra.gmra.mxu0 %vm426_vm0, %v7056_v36  ;;  %v10042_v35 = vld [vmem:[%s11320_s6 + $0x18] sm:$0xff] }
 0x393   : > { %8352 = vmatpush3.msra.mxu0 %v9613_v44  ;;  %8304 = vmatprep.mubr.msk.f32.mxu0 %vm426_vm0, %v7057_v38  ;;  %v8189_v6 = vpop.f32.mrf.mxu0  ;;  %v7160_v36 = vld [vmem:[%s11319_s5 + $0x238] sm:$0xff]  ;;  %v7162_v38 = vld [vmem:[%s11319_s5 + $0x248] sm:$0xff] }
 0x394   : > { %8353 = vmatprep.subr.mxu0 %v9611_v43  ;;  %v1628_v41 = vpop.f32.mrf.mxu1  ;;  %8260 = vmatpush3.msra.mxu1 %v1436_v17  ;;  %v7087_v17 = vld [vmem:[%s11320_s6 + $0x10] sm:$0xff] }
 0x395   : > { %8354 = vmatpush3.msra.mxu0 %v9611_v43  ;;  %8253 = vmatprep.mubr.msk.f32.mxu1 %vm583_vm2, %v1628_v41  ;;  %v1417_v9 = vpop.f32.mrf.mxu0  ;;  %v7165_v41 = vld [vmem:[%s11319_s5 + $0x260] sm:$0xff] }
 0x396   : > { %8355 = vmatprep.subr.mxu0 %v9625_v46  ;;  %v8232_v52 = vpop.f32.mrf.mxu1  ;;  %8254 = vmatmul.mubr.msk.f32.gmra.mxu1 %vm583_vm2, %v8229_v40  ;;  %v7164_v40 = vld [vmem:[%s11319_s5 + $0x258] sm:$0xff] }
 0x397   : > { %8305 = vmatmul.mubr.msk.f32.gmra.mxu0 %vm426_vm0, %v7058_v42  ;;  %v8192_v12 = vpop.f32.mrf.mxu0  ;;  %8325 = vmatprep.subr.mxu1 %v7087_v17  ;;  %v7166_v42 = vld [vmem:[%s11319_s5 + $0x268] sm:$0xff] }
 0x398   : > { %8356 = vmatpush3.msra.mxu0 %v9625_v46  ;;  %v1638_v53 = vpop.f32.mrf.mxu1  ;;  %8307 = vmatprep.mubr.msk.f32.mxu0 %vm426_vm0, %v7059_v50  ;;  %v7167_v50 = vld [vmem:[%s11319_s5 + $0x270] sm:$0xff] }
 0x399   : > { %8357 = vmatprep.subr.mxu0 %v9621_v45  ;;  %8256 = vmatprep.mubr.msk.f32.mxu1 %vm583_vm2, %v1638_v53  ;;  %v1427_v2 = vpop.f32.mrf.mxu0  ;;  %v7203_v53 = vld [vmem:[%s11319_s5 + $0x288] sm:$0xff] }
 0x39a   : > { %8358 = vmatpush3.msra.mxu0 %v9621_v45  ;;  %8257 = vmatmul.mubr.msk.f32.gmra.mxu1 %vm583_vm2, %v8232_v52  ;;  %v7202_v52 = vld [vmem:[%s11319_s5 + $0x280] sm:$0xff] }
 0x39b   : > { %8359 = vmatprep.subr.mxu0 %v9635_v47  ;;  %8308 = vmatmul.mubr.msk.f32.gmra.mxu0 %vm426_vm0, %v7060_v54  ;;  %v7204_v54 = vld [vmem:[%s11319_s5 + $0x290] sm:$0xff] }
 0x39c   : > { %8360 = vmatpush3.msra.mxu0 %v9635_v47  ;;  %8261 = vmatprep.mubr.msk.f32.mxu1 %vm583_vm2, %v9792_v24  ;;  %v7116_v24 = vld [vmem:[%s11319_s5 + $0x1e0] sm:$0xff] }
 0x39d   : > { %8361 = vmatprep.subr.mxu0 %v9639_v48  ;;  %8310 = vmatprep.mubr.msk.f32.mxu0 %vm426_vm0, %v7061_v56  ;;  %v7206_v56 = vld [vmem:[%s11319_s5 + $0x2a0] sm:$0xff] }
 0x39e   : > { %8362 = vmatpush3.msra.mxu0 %v9639_v48  ;;  %8262 = vmatmul.mubr.msk.f32.vlgmr.msra.gmra.mxu1 %vm583_vm2, %v9785_v20  ;;  %v7113_v20 = vld [vmem:[%s11319_s5 + $0x1c8] sm:$0xff] }
 0x39f   : > { %8363 = vmatprep.subr.mxu0 %v9647_v49  ;;  %8311 = vmatmul.mubr.msk.f32.gmra.mxu0 %vm426_vm0, %v7062_v57  ;;  %v7207_v57 = vld [vmem:[%s11319_s5 + $0x2a8] sm:$0xff] }
 0x3a0   : > { %8364 = vmatpush3.msra.mxu0 %v9647_v49  ;;  %8264 = vmatprep.mubr.msk.f32.mxu1 %vm583_vm2, %v1367_v30  ;;  %v7155_v30 = vld [vmem:[%s11319_s5 + $0x210] sm:$0xff] }
 0x3a1   : > { %8365 = vmatprep.subr.mxu0 %v9546_v23  ;;  %8313 = vmatprep.mubr.msk.f32.mxu0 %vm426_vm0, %v7063_v59  ;;  %v7209_v59 = vld [vmem:[%s11319_s5 + $0x2b8] sm:$0xff] }
 0x3a2   : > { %8366 = vmatpush3.msra.mxu0 %v9546_v23  ;;  %8265 = vmatmul.mubr.msk.f32.gmra.mxu1 %vm583_vm2, %v9800_v27  ;;  %v7119_v27 = vld [vmem:[%s11319_s5 + $0x1f8] sm:$0xff] }
 0x3a3   : > { %8417 = vmatprep.subr.mxu0 %v9613_v44  ;;  %8314 = vmatmul.mubr.msk.f32.gmra.mxu0 %vm426_vm0, %v7064_v60  ;;  %v7210_v60 = vld [vmem:[%s11319_s5 + $0x2c0] sm:$0xff] }
 0x3a4   : > { %8267 = vmatprep.mubr.msk.f32.mxu1 %vm583_vm2, %v1377_v39  ;;  %8316 = vmatprep.mubr.msk.f32.mxu0 %vm426_vm0, %v7065_v61  ;;  %v7163_v39 = vld [vmem:[%s11319_s5 + $0x250] sm:$0xff]  ;;  %v7211_v61 = vld [vmem:[%s11319_s5 + $0x2c8] sm:$0xff] }
 0x3a5   : > { %8326 = vmatpush3.msra.mxu1 %v7087_v17  ;;  %v7264_v17 = vld [vmem:[%s11319_s5 + $0x368] sm:$0xff] }
 0x3a6   : > { %8268 = vmatmul.mubr.msk.f32.gmra.mxu1 %vm583_vm2, %v9817_v34  ;;  %v7159_v34 = vld [vmem:[%s11319_s5 + $0x230] sm:$0xff]  ;;  %8391 = vmatprep.subr.mxu1 %v10042_v35 }
 0x3a7   : > { %8317 = vmatmul.mubr.msk.f32.gmra.mxu0 %vm426_vm0, %v7066_v0  ;;  %8270 = vmatprep.mubr.msk.f32.mxu1 %vm583_vm2, %v1387_v55  ;;  %v7205_v55 = vld [vmem:[%s11319_s5 + $0x298] sm:$0xff]  ;;  %v7214_v0 = vld [vmem:[%s11319_s5 + $0x2e0] sm:$0xff] }
 0x3a8   : > { %8319 = vmatprep.mubr.msk.f32.mxu0 %vm426_vm0, %v7067_v1  ;;  %v7215_v1 = vld [vmem:[%s11319_s5 + $0x2e8] sm:$0xff] }
 0x3aa   : > { %8271 = vmatmul.mubr.msk.f32.gmra.mxu1 %vm583_vm2, %v8180_v51  ;;  %v7168_v51 = vld [vmem:[%s11319_s5 + $0x278] sm:$0xff] }
 0x3ab   : > { %8320 = vmatmul.mubr.msk.f32.gmra.mxu0 %vm426_vm0, %v7068_v4  ;;  %8273 = vmatprep.mubr.msk.f32.mxu1 %vm583_vm2, %v1397_v62  ;;  %v7212_v62 = vld [vmem:[%s11319_s5 + $0x2d0] sm:$0xff]  ;;  %v7217_v4 = vld [vmem:[%s11319_s5 + $0x2f8] sm:$0xff] }
 0x3ac   : > { %8322 = vmatprep.mubr.msk.f32.mxu0 %vm426_vm0, %v7069_v5  ;;  %v7251_v5 = vld [vmem:[%s11319_s5 + $0x300] sm:$0xff] }
 0x3ae   : > { %8274 = vmatmul.mubr.msk.f32.gmra.mxu1 %vm583_vm2, %v8183_v58  ;;  %v7208_v58 = vld [vmem:[%s11319_s5 + $0x2b0] sm:$0xff] }
 0x3af   : > { %8323 = vmatmul.mubr.msk.f32.gmra.mxu0 %vm426_vm0, %v7070_v7  ;;  %8276 = vmatprep.mubr.msk.f32.mxu1 %vm583_vm2, %v1407_v3  ;;  %v7216_v3 = vld [vmem:[%s11319_s5 + $0x2f0] sm:$0xff] }
 0x3b0   : > { %8367 = vmatprep.mubr.msk.f32.mxu0 %vm426_vm0, %v7104_v8  ;;  %v7253_v7 = vld [vmem:[%s11319_s5 + $0x310] sm:$0xff]  ;;  %v7254_v8 = vld [vmem:[%s11319_s5 + $0x318] sm:$0xff] }
 0x3b2   : > { %8277 = vmatmul.mubr.msk.f32.gmra.mxu1 %vm583_vm2, %v8186_v63  ;;  %v7213_v63 = vld [vmem:[%s11319_s5 + $0x2d8] sm:$0xff] }
 0x3b3   : > { %8368 = vmatmul.mubr.msk.f32.vlgmr.msra.gmra.mxu0 %vm426_vm0, %v7105_v10  ;;  %8279 = vmatprep.mubr.msk.f32.mxu1 %vm583_vm2, %v1417_v9  ;;  %v7255_v9 = vld [vmem:[%s11319_s5 + $0x320] sm:$0xff]  ;;  %v7256_v10 = vld [vmem:[%s11319_s5 + $0x328] sm:$0xff] }
 0x3b4   : > { %8418 = vmatpush3.msra.mxu0 %v9613_v44  ;;  %8370 = vmatprep.mubr.msk.f32.mxu0 %vm426_vm0, %v7106_v11  ;;  %v7257_v11 = vld [vmem:[%s11319_s5 + $0x330] sm:$0xff] }
 0x3b5   : > { %8419 = vmatprep.subr.mxu0 %v9611_v43 }
 0x3b6   : > { %8420 = vmatpush3.msra.mxu0 %v9611_v43  ;;  %8280 = vmatmul.mubr.msk.f32.gmra.mxu1 %vm583_vm2, %v8189_v6  ;;  %v7252_v6 = vld [vmem:[%s11319_s5 + $0x308] sm:$0xff] }
 0x3b7   : > { %8421 = vmatprep.subr.mxu0 %v9625_v46  ;;  %8371 = vmatmul.mubr.msk.f32.gmra.mxu0 %vm426_vm0, %v7107_v13  ;;  %v7259_v13 = vld [vmem:[%s11319_s5 + $0x340] sm:$0xff] }
 0x3b8   : > { %8422 = vmatpush3.msra.mxu0 %v9625_v46  ;;  %8373 = vmatprep.mubr.msk.f32.mxu0 %vm426_vm0, %v7108_v14  ;;  %v7260_v14 = vld [vmem:[%s11319_s5 + $0x348] sm:$0xff] }
 0x3b9   : > { %8423 = vmatprep.subr.mxu0 %v9621_v45  ;;  %8282 = vmatprep.mubr.msk.f32.mxu1 %vm583_vm2, %v1427_v2  ;;  %v7261_v2 = vld [vmem:[%s11319_s5 + $0x350] sm:$0xff] }
 0x3ba   : > { %8424 = vmatpush3.msra.mxu0 %v9621_v45  ;;  %8283 = vmatmul.mubr.msk.f32.gmra.mxu1 %vm583_vm2, %v8192_v12  ;;  %v7258_v12 = vld [vmem:[%s11319_s5 + $0x338] sm:$0xff] }
 0x3bb   : > { %8425 = vmatprep.subr.mxu0 %v9635_v47  ;;  %8374 = vmatmul.mubr.msk.f32.gmra.mxu0 %vm426_vm0, %v7109_v15  ;;  %v7262_v15 = vld [vmem:[%s11319_s5 + $0x358] sm:$0xff] }
 0x3bc   : > { %8426 = vmatpush3.msra.mxu0 %v9635_v47  ;;  %8376 = vmatprep.mubr.msk.f32.mxu0 %vm426_vm0, %v7110_v16  ;;  %v7263_v16 = vld [vmem:[%s11319_s5 + $0x360] sm:$0xff] }
 0x3bd   : > { %8427 = vmatprep.subr.mxu0 %v9639_v48 }
 0x3be   : > { %8428 = vmatpush3.msra.mxu0 %v9639_v48 }
 0x3bf   : > { %8429 = vmatprep.subr.mxu0 %v9647_v49  ;;  %8377 = vmatmul.mubr.msk.f32.gmra.mxu0 %vm426_vm0, %v7111_v18  ;;  %v7265_v18 = vld [vmem:[%s11319_s5 + $0x370] sm:$0xff] }
 0x3c0   : > { %8430 = vmatpush3.msra.mxu0 %v9647_v49  ;;  %8379 = vmatprep.mubr.msk.f32.mxu0 %vm426_vm0, %v7112_v19  ;;  %v7266_v19 = vld [vmem:[%s11319_s5 + $0x378] sm:$0xff] }
 0x3c1   : > { %8431 = vmatprep.subr.mxu0 %v9546_v23 }
 0x3c2   : > { %8432 = vmatpush3.msra.mxu0 %v9546_v23 }
 0x3c3   : > { %8483 = vmatprep.subr.mxu0 %v9613_v44  ;;  %8380 = vmatmul.mubr.msk.f32.gmra.mxu0 %vm426_vm0, %v7113_v20  ;;  %v7300_v20 = vld [vmem:[%s11319_s5 + $0x380] sm:$0xff] }
 0x3c4   : > { %8382 = vmatprep.mubr.msk.f32.mxu0 %vm426_vm0, %v7114_v21  ;;  %v7301_v21 = vld [vmem:[%s11319_s5 + $0x388] sm:$0xff] }
 0x3c7   : > { %8383 = vmatmul.mubr.msk.f32.gmra.mxu0 %vm426_vm0, %v7115_v22  ;;  %v7302_v22 = vld [vmem:[%s11319_s5 + $0x390] sm:$0xff] }
 0x3c8   : > { %8385 = vmatprep.mubr.msk.f32.mxu0 %vm426_vm0, %v7116_v24  ;;  %v7303_v24 = vld [vmem:[%s11319_s5 + $0x398] sm:$0xff] }
 0x3cb   : > { %8386 = vmatmul.mubr.msk.f32.gmra.mxu0 %vm426_vm0, %v7117_v25  ;;  %v7304_v25 = vld [vmem:[%s11319_s5 + $0x3a0] sm:$0xff] }
 0x3cc   : > { %8388 = vmatprep.mubr.msk.f32.mxu0 %vm426_vm0, %v7118_v26  ;;  %v7306_v26 = vld [vmem:[%s11319_s5 + $0x3b0] sm:$0xff] }
 0x3cf   : > { %8389 = vmatmul.mubr.msk.f32.gmra.mxu0 %vm426_vm0, %v7119_v27  ;;  %v7309_v27 = vld [vmem:[%s11319_s5 + $0x3c8] sm:$0xff] }
 0x3d0   : > { %8433 = vmatprep.mubr.msk.f32.mxu0 %vm426_vm0, %v7153_v28 }
 0x3d3   : > { %8434 = vmatmul.mubr.msk.f32.vlgmr.msra.gmra.mxu0 %vm426_vm0, %v7154_v29  ;;  %v7311_v29 = vld [vmem:[%s11319_s5 + $0x3d8] sm:$0xff] }
 0x3d4   : > { %8484 = vmatpush3.msra.mxu0 %v9613_v44  ;;  %8436 = vmatprep.mubr.msk.f32.mxu0 %vm426_vm0, %v7155_v30  ;;  %v7312_v30 = vld [vmem:[%s11319_s5 + $0x3e0] sm:$0xff] }
 0x3d5   : > { %8485 = vmatprep.subr.mxu0 %v9611_v43 }
 0x3d6   : > { %8486 = vmatpush3.msra.mxu0 %v9611_v43 }
 0x3d7   : > { %8487 = vmatprep.subr.mxu0 %v9625_v46  ;;  %8437 = vmatmul.mubr.msk.f32.gmra.mxu0 %vm426_vm0, %v7156_v31 }
 0x3d8   : > { %8488 = vmatpush3.msra.mxu0 %v9625_v46  ;;  %8439 = vmatprep.mubr.msk.f32.mxu0 %vm426_vm0, %v7157_v32  ;;  %v7313_v32 = vld [vmem:[%s11319_s5 + $0x3e8] sm:$0xff] }
 0x3d9   : > { %8489 = vmatprep.subr.mxu0 %v9621_v45 }
 0x3da   : > { %8490 = vmatpush3.msra.mxu0 %v9621_v45 }
 0x3db   : > { %8491 = vmatprep.subr.mxu0 %v9635_v47  ;;  %8440 = vmatmul.mubr.msk.f32.gmra.mxu0 %vm426_vm0, %v7158_v33  ;;  %v7314_v33 = vld [vmem:[%s11319_s5 + $0x3f0] sm:$0xff] }
 0x3dc   : > { %8492 = vmatpush3.msra.mxu0 %v9635_v47  ;;  %8442 = vmatprep.mubr.msk.f32.mxu0 %vm426_vm0, %v7159_v34 }
 0x3dd   : > { %8493 = vmatprep.subr.mxu0 %v9639_v48 }
 0x3de   : > { %8494 = vmatpush3.msra.mxu0 %v9639_v48 }
 0x3df   : > { %8495 = vmatprep.subr.mxu0 %v9647_v49  ;;  %8443 = vmatmul.mubr.msk.f32.gmra.mxu0 %vm426_vm0, %v7160_v36 }
 0x3e0   : > { %8496 = vmatpush3.msra.mxu0 %v9647_v49  ;;  %8445 = vmatprep.mubr.msk.f32.mxu0 %vm426_vm0, %v7161_v37  ;;  %v7315_v37 = vld [vmem:[%s11319_s5 + $0x3f8] sm:$0xff] }
 0x3e1   : > { %8497 = vmatprep.subr.mxu0 %v9546_v23 }
 0x3e2   : > { %8498 = vmatpush3.msra.mxu0 %v9546_v23 }
 0x3e3   : > { %8549 = vmatprep.subr.mxu0 %v9613_v44  ;;  %8446 = vmatmul.mubr.msk.f32.gmra.mxu0 %vm426_vm0, %v7162_v38  ;;  %v7349_v38 = vld [vmem:[%s11319_s5 + $0x400] sm:$0xff] }
 0x3e4   : > { %8448 = vmatprep.mubr.msk.f32.mxu0 %vm426_vm0, %v7163_v39 }
 0x3e7   : > { %8449 = vmatmul.mubr.msk.f32.gmra.mxu0 %vm426_vm0, %v7164_v40 }
 0x3e8   : > { %8451 = vmatprep.mubr.msk.f32.mxu0 %vm426_vm0, %v7165_v41  ;;  %v7350_v41 = vld [vmem:[%s11319_s5 + $0x408] sm:$0xff] }
 0x3eb   : > { %8452 = vmatmul.mubr.msk.f32.gmra.mxu0 %vm426_vm0, %v7166_v42  ;;  %v7351_v42 = vld [vmem:[%s11319_s5 + $0x410] sm:$0xff] }
 0x3ec   : > { %8454 = vmatprep.mubr.msk.f32.mxu0 %vm426_vm0, %v7167_v50 }
 0x3ef   : > { %8455 = vmatmul.mubr.msk.f32.gmra.mxu0 %vm426_vm0, %v7168_v51 }
 0x3f0   : > { %8499 = vmatprep.mubr.msk.f32.mxu0 %vm426_vm0, %v7202_v52 }
 0x3f3   : > { %8500 = vmatmul.mubr.msk.f32.vlgmr.msra.gmra.mxu0 %vm426_vm0, %v7203_v53 }
 0x3f4   : > { %8550 = vmatpush3.msra.mxu0 %v9613_v44  ;;  %8502 = vmatprep.mubr.msk.f32.mxu0 %vm426_vm0, %v7204_v54  ;;  %v7352_v54 = vld [vmem:[%s11319_s5 + $0x418] sm:$0xff] }
 0x3f5   : > { %8551 = vmatprep.subr.mxu0 %v9611_v43 }
 0x3f6   : > { %8552 = vmatpush3.msra.mxu0 %v9611_v43 }
 0x3f7   : > { %8553 = vmatprep.subr.mxu0 %v9625_v46  ;;  %8503 = vmatmul.mubr.msk.f32.gmra.mxu0 %vm426_vm0, %v7205_v55  ;;  %v7353_v55 = vld [vmem:[%s11319_s5 + $0x420] sm:$0xff] }
 0x3f8   : > { %8554 = vmatpush3.msra.mxu0 %v9625_v46  ;;  %8505 = vmatprep.mubr.msk.f32.mxu0 %vm426_vm0, %v7206_v56  ;;  %v10378_v56 = vld [vmem:[%s11320_s6 + $0x20] sm:$0xff] }
 0x3f9   : > { %8555 = vmatprep.subr.mxu0 %v9621_v45 }
 0x3fa   : > { %8556 = vmatpush3.msra.mxu0 %v9621_v45 }
 0x3fb   : > { %8557 = vmatprep.subr.mxu0 %v9635_v47  ;;  %8506 = vmatmul.mubr.msk.f32.gmra.mxu0 %vm426_vm0, %v7207_v57 }
 0x3fc   : > { %8558 = vmatpush3.msra.mxu0 %v9635_v47  ;;  %8508 = vmatprep.mubr.msk.f32.mxu0 %vm426_vm0, %v7208_v58 }
 0x3fd   : > { %8559 = vmatprep.subr.mxu0 %v9639_v48 }
 0x3fe   : > { %8560 = vmatpush3.msra.mxu0 %v9639_v48 }
 0x3ff   : > { %8561 = vmatprep.subr.mxu0 %v9647_v49  ;;  %8509 = vmatmul.mubr.msk.f32.gmra.mxu0 %vm426_vm0, %v7209_v59 }
 0x400   : > { %8562 = vmatpush3.msra.mxu0 %v9647_v49  ;;  %8511 = vmatprep.mubr.msk.f32.mxu0 %vm426_vm0, %v7210_v60  ;;  %v7354_v60 = vld [vmem:[%s11319_s5 + $0x428] sm:$0xff] }
 0x401   : > { %8563 = vmatprep.subr.mxu0 %v9546_v23 }
 0x402   : > { %8564 = vmatpush3.msra.mxu0 %v9546_v23 }
 0x403   : > { %8615 = vmatprep.subr.mxu0 %v9613_v44  ;;  %8512 = vmatmul.mubr.msk.f32.gmra.mxu0 %vm426_vm0, %v7211_v61 }
 0x404   : > { %8514 = vmatprep.mubr.msk.f32.mxu0 %vm426_vm0, %v7212_v62  ;;  %v7355_v62 = vld [vmem:[%s11319_s5 + $0x430] sm:$0xff] }
 0x407   : > { %8515 = vmatmul.mubr.msk.f32.gmra.mxu0 %vm426_vm0, %v7213_v63 }
 0x408   : > { %8517 = vmatprep.mubr.msk.f32.mxu0 %vm426_vm0, %v7214_v0 }
 0x40b   : > { %8518 = vmatmul.mubr.msk.f32.gmra.mxu0 %vm426_vm0, %v7215_v1  ;;  %v7356_v1 = vld [vmem:[%s11319_s5 + $0x438] sm:$0xff] }
 0x40c   : > { %8520 = vmatprep.mubr.msk.f32.mxu0 %vm426_vm0, %v7216_v3 }
 0x40f   : > { %8521 = vmatmul.mubr.msk.f32.gmra.mxu0 %vm426_vm0, %v7217_v4  ;;  %v7357_v4 = vld [vmem:[%s11319_s5 + $0x440] sm:$0xff] }
 0x410   : > { %8565 = vmatprep.mubr.msk.f32.mxu0 %vm426_vm0, %v7251_v5 }
 0x413   : > { %8566 = vmatmul.mubr.msk.f32.vlgmr.msra.gmra.mxu0 %vm426_vm0, %v7252_v6 }
 0x414   : > { %8616 = vmatpush3.msra.mxu0 %v9613_v44  ;;  %8568 = vmatprep.mubr.msk.f32.mxu0 %vm426_vm0, %v7253_v7 }
 0x415   : > { %8617 = vmatprep.subr.mxu0 %v9611_v43 }
 0x416   : > { %8618 = vmatpush3.msra.mxu0 %v9611_v43 }
 0x417   : > { %8619 = vmatprep.subr.mxu0 %v9625_v46  ;;  %8569 = vmatmul.mubr.msk.f32.gmra.mxu0 %vm426_vm0, %v7254_v8 }
 0x418   : > { %8620 = vmatpush3.msra.mxu0 %v9625_v46  ;;  %8571 = vmatprep.mubr.msk.f32.mxu0 %vm426_vm0, %v7255_v9  ;;  %v7358_v9 = vld [vmem:[%s11319_s5 + $0x448] sm:$0xff] }
 0x419   : > { %8621 = vmatprep.subr.mxu0 %v9621_v45 }
 0x41a   : > { %8622 = vmatpush3.msra.mxu0 %v9621_v45 }
 0x41b   : > { %8623 = vmatprep.subr.mxu0 %v9635_v47  ;;  %8572 = vmatmul.mubr.msk.f32.gmra.mxu0 %vm426_vm0, %v7256_v10 }
 0x41c   : > { %8624 = vmatpush3.msra.mxu0 %v9635_v47  ;;  %8574 = vmatprep.mubr.msk.f32.mxu0 %vm426_vm0, %v7257_v11  ;;  %v7359_v11 = vld [vmem:[%s11319_s5 + $0x450] sm:$0xff] }
 0x41d   : > { %8625 = vmatprep.subr.mxu0 %v9639_v48 }
 0x41e   : > { %8626 = vmatpush3.msra.mxu0 %v9639_v48 }
 0x41f   : > { %8627 = vmatprep.subr.mxu0 %v9647_v49  ;;  %8575 = vmatmul.mubr.msk.f32.gmra.mxu0 %vm426_vm0, %v7258_v12 }
 0x420   : > { %8628 = vmatpush3.msra.mxu0 %v9647_v49  ;;  %8577 = vmatprep.mubr.msk.f32.mxu0 %vm426_vm0, %v7259_v13 }
 0x421   : > { %8629 = vmatprep.subr.mxu0 %v9546_v23 }
 0x422   : > { %8630 = vmatpush3.msra.mxu0 %v9546_v23 }
 0x423   : > { %8681 = vmatprep.subr.mxu0 %v9613_v44  ;;  %8578 = vmatmul.mubr.msk.f32.gmra.mxu0 %vm426_vm0, %v7260_v14 }
 0x424   : > { %8580 = vmatprep.mubr.msk.f32.mxu0 %vm426_vm0, %v7261_v2 }
 0x427   : > { %8581 = vmatmul.mubr.msk.f32.gmra.mxu0 %vm426_vm0, %v7262_v15  ;;  %v7360_v15 = vld [vmem:[%s11319_s5 + $0x458] sm:$0xff] }
 0x428   : > { %8583 = vmatprep.mubr.msk.f32.mxu0 %vm426_vm0, %v7263_v16 }
 0x42b   : > { %8584 = vmatmul.mubr.msk.f32.gmra.mxu0 %vm426_vm0, %v7264_v17  ;;  %v7361_v17 = vld [vmem:[%s11319_s5 + $0x460] sm:$0xff] }
 0x42c   : > { %8586 = vmatprep.mubr.msk.f32.mxu0 %vm426_vm0, %v7265_v18 }
 0x42f   : > { %8587 = vmatmul.mubr.msk.f32.gmra.mxu0 %vm426_vm0, %v7266_v19 }
 0x430   : > { %8631 = vmatprep.mubr.msk.f32.mxu0 %vm426_vm0, %v7300_v20 }
 0x433   : > { %8632 = vmatmul.mubr.msk.f32.vlgmr.msra.gmra.mxu0 %vm426_vm0, %v7301_v21 }
 0x434   : > { %8682 = vmatpush3.msra.mxu0 %v9613_v44  ;;  %8634 = vmatprep.mubr.msk.f32.mxu0 %vm426_vm0, %v7302_v22  ;;  %v7305_v44 = vld [vmem:[%s11319_s5 + $0x3a8] sm:$0xff] }
 0x435   : > { %8683 = vmatprep.subr.mxu0 %v9611_v43  ;;  %v7362_v22 = vld [vmem:[%s11319_s5 + $0x468] sm:$0xff] }
 0x436   : > { %8684 = vmatpush3.msra.mxu0 %v9611_v43  ;;  %v7307_v43 = vld [vmem:[%s11319_s5 + $0x3b8] sm:$0xff] }
 0x437   : > { %8685 = vmatprep.subr.mxu0 %v9625_v46  ;;  %8635 = vmatmul.mubr.msk.f32.gmra.mxu0 %vm426_vm0, %v7303_v24 }
 0x438   : > { %8686 = vmatpush3.msra.mxu0 %v9625_v46  ;;  %8637 = vmatprep.mubr.msk.f32.mxu0 %vm426_vm0, %v7304_v25  ;;  %v7308_v46 = vld [vmem:[%s11319_s5 + $0x3c0] sm:$0xff]  ;;  %v7363_v25 = vld [vmem:[%s11319_s5 + $0x470] sm:$0xff] }
 0x439   : > { %8687 = vmatprep.subr.mxu0 %v9621_v45 }
 0x43a   : > { %8688 = vmatpush3.msra.mxu0 %v9621_v45 }
 0x43b   : > { %8689 = vmatprep.subr.mxu0 %v9635_v47  ;;  %8638 = vmatmul.mubr.msk.f32.gmra.mxu0 %vm426_vm0, %v7305_v44 }
 0x43c   : > { %8690 = vmatpush3.msra.mxu0 %v9635_v47  ;;  %8640 = vmatprep.mubr.msk.f32.mxu0 %vm426_vm0, %v7306_v26 }
 0x43d   : > { %8691 = vmatprep.subr.mxu0 %v9639_v48 }
 0x43e   : > { %8692 = vmatpush3.msra.mxu0 %v9639_v48  ;;  %v10298_v45 = vpop.f32.mrf.mxu0  ;;  %v7310_v48 = vld [vmem:[%s11319_s5 + $0x3d0] sm:$0xff] }
 0x43f   : > { %8693 = vmatprep.subr.mxu0 %v9647_v49  ;;  %8641 = vmatmul.mubr.msk.f32.gmra.mxu0 %vm426_vm0, %v7307_v43 }
 0x440   : > { %8694 = vmatpush3.msra.mxu0 %v9647_v49  ;;  %v10303_v47 = vpop.f32.mrf.mxu0  ;;  %8643 = vmatprep.mubr.msk.f32.mxu0 %vm426_vm0, %v7308_v46 }
 0x441   : > { %8695 = vmatprep.subr.mxu0 %v9546_v23 }
 0x442   : > { %8696 = vmatpush3.msra.mxu0 %v9546_v23  ;;  %v10314_v28 = vpop.f32.mrf.mxu0 }
 0x443   : > { %8644 = vmatmul.mubr.msk.f32.gmra.mxu0 %vm426_vm0, %v7309_v27 }
 0x444   : > { %v10317_v49 = vpop.f32.mrf.mxu0  ;;  %8646 = vmatprep.mubr.msk.f32.mxu0 %vm426_vm0, %v7310_v48 }
 0x446   : > { %v10326_v31 = vpop.f32.mrf.mxu0 }
 0x447   : > { %8647 = vmatmul.mubr.msk.f32.gmra.mxu0 %vm426_vm0, %v7311_v29 }
 0x448   : > { %v10329_v23 = vpop.f32.mrf.mxu0  ;;  %8649 = vmatprep.mubr.msk.f32.mxu0 %vm426_vm0, %v7312_v30 }
 0x44a   : > { %v10338_v34 = vpop.f32.mrf.mxu0 }
 0x44b   : > { %8650 = vmatmul.mubr.msk.f32.gmra.mxu0 %vm426_vm0, %v7313_v32 }
 0x44c   : > { %v10341_v36 = vpop.f32.mrf.mxu0  ;;  %8652 = vmatprep.mubr.msk.f32.mxu0 %vm426_vm0, %v7314_v33 }
 0x44e   : > { %v10350_v39 = vpop.f32.mrf.mxu0 }
 0x44f   : > { %8653 = vmatmul.mubr.msk.f32.gmra.mxu0 %vm426_vm0, %v7315_v37 }
 0x450   : > { %v10353_v40 = vpop.f32.mrf.mxu0  ;;  %8697 = vmatprep.mubr.msk.f32.mxu0 %vm426_vm0, %v7349_v38 }
 0x452   : > { %v10362_v50 = vpop.f32.mrf.mxu1  ;;  %v8303_v51 = vpop.f32.mrf.mxu0 }
 0x453   : > { %8698 = vmatmul.mubr.msk.f32.vlgmr.msra.gmra.mxu0 %vm426_vm0, %v7350_v41 }
 0x454   : > { %v10365_v52 = vpop.f32.mrf.mxu1  ;;  %v2166_v53 = vpop.f32.mrf.mxu0  ;;  %8700 = vmatprep.mubr.msk.f32.mxu0 %vm426_vm0, %v7351_v42 }
 0x455   : > { %8327 = vmatprep.mubr.msk.f32.mxu1 %vm583_vm2, %v2166_v53 }
 0x456   : > { %v10380_v57 = vpop.f32.mrf.mxu1  ;;  %8328 = vmatmul.mubr.msk.f32.vlgmr.msra.gmra.mxu1 %vm583_vm2, %v8303_v51 }
 0x457   : > { %v8306_v58 = vpop.f32.mrf.mxu0  ;;  %8701 = vmatmul.mubr.msk.f32.gmra.mxu0 %vm426_vm0, %v7352_v54  ;;  %8392 = vmatpush3.msra.mxu1 %v10042_v35 }
 0x458   : > { %v10385_v59 = vpop.f32.mrf.mxu1  ;;  %8703 = vmatprep.mubr.msk.f32.mxu0 %vm426_vm0, %v7353_v55  ;;  %8457 = vmatprep.subr.mxu1 %v10378_v56 }
 0x459   : > { %v2176_v61 = vpop.f32.mrf.mxu0 }
 0x45a   : > { %8330 = vmatprep.mubr.msk.f32.mxu1 %vm583_vm2, %v2176_v61  ;;  %v10396_v63 = vpop.f32.mrf.mxu1 }
 0x45b   : > { %v8309_v35 = vpop.f32.mrf.mxu0  ;;  %8331 = vmatmul.mubr.msk.f32.gmra.mxu1 %vm583_vm2, %v8306_v58  ;;  %8704 = vmatmul.mubr.msk.f32.gmra.mxu0 %vm426_vm0, %v7354_v60 }
 0x45c   : > { %v10400_v0 = vpop.f32.mrf.mxu1  ;;  %8706 = vmatprep.mubr.msk.f32.mxu0 %vm426_vm0, %v7355_v62 }
 0x45d   : > { %v2186_v3 = vpop.f32.mrf.mxu0 }
 0x45e   : > { %8333 = vmatprep.mubr.msk.f32.mxu1 %vm583_vm2, %v2186_v3  ;;  %v8263_v5 = vpop.f32.mrf.mxu1 }
 0x45f   : > { %v10411_v6 = vadd.f32 %v8263_v5, %v10298_v45  ;;  %v8312_v7 = vpop.f32.mrf.mxu0  ;;  %8334 = vmatmul.mubr.msk.f32.gmra.mxu1 %vm583_vm2, %v8309_v35  ;;  %8707 = vmatmul.mubr.msk.f32.gmra.mxu0 %vm426_vm0, %v7356_v1  ;;  %v7364_v45 = vld [vmem:[%s11319_s5 + $0x478] sm:$0xff] }
 0x460   : > { %v10415_v8 = vpop.f32.mrf.mxu1  ;;  %8709 = vmatprep.mubr.msk.f32.mxu0 %vm426_vm0, %v7357_v4 }
 0x461   : > { %v2196_v10 = vpop.f32.mrf.mxu0 }
 0x462   : > { %8336 = vmatprep.mubr.msk.f32.mxu1 %vm583_vm2, %v2196_v10  ;;  %v8266_v12 = vpop.f32.mrf.mxu1  ;;  %v7283_v10 = vld [vmem:[%s11320_s6 + $0x30] sm:$0xff] }
 0x463   : > { %v10426_v13 = vadd.f32 %v8266_v12, %v10314_v28  ;;  %v8315_v14 = vpop.f32.mrf.mxu0  ;;  %8337 = vmatmul.mubr.msk.f32.gmra.mxu1 %vm583_vm2, %v8312_v7  ;;  %8710 = vmatmul.mubr.msk.f32.gmra.mxu0 %vm426_vm0, %v7358_v9 }
 0x464   : > { %v10430_v2 = vpop.f32.mrf.mxu1  ;;  %8712 = vmatprep.mubr.msk.f32.mxu0 %vm426_vm0, %v7359_v11 }
 0x465   : > { %v2206_v16 = vpop.f32.mrf.mxu0 }
 0x466   : > { %8339 = vmatprep.mubr.msk.f32.mxu1 %vm583_vm2, %v2206_v16  ;;  %v8269_v18 = vpop.f32.mrf.mxu1 }
 0x467   : > { %v10441_v19 = vadd.f32 %v8269_v18, %v10326_v31  ;;  %v8318_v20 = vpop.f32.mrf.mxu0  ;;  %8340 = vmatmul.mubr.msk.f32.gmra.mxu1 %vm583_vm2, %v8315_v14  ;;  %8713 = vmatmul.mubr.msk.f32.gmra.mxu0 %vm426_vm0, %v7360_v15 }
 0x468   : > { %v10445_v21 = vpop.f32.mrf.mxu1  ;;  %8715 = vmatprep.mubr.msk.f32.mxu0 %vm426_vm0, %v7361_v17 }
 0x469   : > { %v2216_v24 = vpop.f32.mrf.mxu0 }
 0x46a   : > { %8342 = vmatprep.mubr.msk.f32.mxu1 %vm583_vm2, %v2216_v24  ;;  %v8272_v44 = vpop.f32.mrf.mxu1 }
 0x46b   : > { %v10456_v26 = vadd.f32 %v8272_v44, %v10338_v34  ;;  %v8321_v43 = vpop.f32.mrf.mxu0  ;;  %8343 = vmatmul.mubr.msk.f32.gmra.mxu1 %vm583_vm2, %v8318_v20  ;;  %8716 = vmatmul.mubr.msk.f32.gmra.mxu0 %vm426_vm0, %v7362_v22 }
 0x46c   : > { %v10460_v46 = vpop.f32.mrf.mxu1  ;;  %8718 = vmatprep.mubr.msk.f32.mxu0 %vm426_vm0, %v7363_v25 }
 0x46d   : > { %v2226_v27 = vpop.f32.mrf.mxu0 }
 0x46e   : > { %8345 = vmatprep.mubr.msk.f32.mxu1 %vm583_vm2, %v2226_v27  ;;  %v8275_v48 = vpop.f32.mrf.mxu1 }
 0x46f   : > { %v10468_v28 = vadd.f32 %v8275_v48, %v10350_v39  ;;  %v8324_v29 = vpop.f32.mrf.mxu0  ;;  %8346 = vmatmul.mubr.msk.f32.gmra.mxu1 %vm583_vm2, %v8321_v43  ;;  %8719 = vmatmul.mubr.msk.f32.gmra.mxu0 %vm426_vm0, %v7364_v45  ;;  %v7234_v39 = vld [vmem:[%s11320_s6 + $0x28] sm:$0xff] }
 0x470   : > { %v10472_v30 = vpop.f32.mrf.mxu1 }
 0x471   : > { %v2236_v31 = vpop.f32.mrf.mxu0 }
 0x472   : > { %8348 = vmatprep.mubr.msk.f32.mxu1 %vm583_vm2, %v2236_v31  ;;  %v8278_v32 = vpop.f32.mrf.mxu1 }
 0x473   : > { %8349 = vmatmul.mubr.msk.f32.gmra.mxu1 %vm583_vm2, %v8324_v29  ;;  %v8369_v33 = vpop.f32.mrf.mxu0  ;;  %v10477_v34 = vadd.f32 %v8278_v32, %v10362_v50  ;;  %v7332_v29 = vld [vmem:[%s11320_s6 + $0x38] sm:$0xff] }
 0x474   : > { %v10479_v37 = vpop.f32.mrf.mxu1 }
 0x475   : > { %v2587_v38 = vpop.f32.mrf.mxu0 }
 0x476   : > { %8393 = vmatprep.mubr.msk.f32.mxu1 %vm583_vm2, %v2587_v38  ;;  %v8281_v41 = vpop.f32.mrf.mxu1 }
 0x477   : > { %v8372_v42 = vpop.f32.mrf.mxu0  ;;  %8394 = vmatmul.mubr.msk.f32.vlgmr.msra.gmra.mxu1 %vm583_vm2, %v8369_v33  ;;  %v10487_v51 = vadd.f32 %v8281_v41, %v10380_v57 }
 0x478   : > { %8458 = vmatpush3.msra.mxu1 %v10378_v56  ;;  %v10490_v50 = vpop.f32.mrf.mxu1 }
 0x479   : > { %v2597_v53 = vpop.f32.mrf.mxu0  ;;  %8523 = vmatprep.subr.mxu1 %v7234_v39 }
 0x47a   : > { %8396 = vmatprep.mubr.msk.f32.mxu1 %vm583_vm2, %v2597_v53  ;;  %v8284_v54 = vpop.f32.mrf.mxu1 }
 0x47b   : > { %v8375_v55 = vpop.f32.mrf.mxu0  ;;  %8397 = vmatmul.mubr.msk.f32.gmra.mxu1 %vm583_vm2, %v8372_v42  ;;  %v10495_v58 = vadd.f32 %v8284_v54, %v10396_v63 }
 0x47d   : > { %v2607_v60 = vpop.f32.mrf.mxu0 }
 0x47e   : > { %8399 = vmatprep.mubr.msk.f32.mxu1 %vm583_vm2, %v2607_v60 }
 0x47f   : > { %v8378_v57 = vpop.f32.mrf.mxu0  ;;  %8400 = vmatmul.mubr.msk.f32.gmra.mxu1 %vm583_vm2, %v8375_v55 }
 0x481   : > { %v2617_v56 = vpop.f32.mrf.mxu0 }
 0x482   : > { %8402 = vmatprep.mubr.msk.f32.mxu1 %vm583_vm2, %v2617_v56 }
 0x483   : > { %v8381_v61 = vpop.f32.mrf.mxu0  ;;  %8403 = vmatmul.mubr.msk.f32.gmra.mxu1 %vm583_vm2, %v8378_v57 }
 0x485   : > { %v2627_v62 = vpop.f32.mrf.mxu0 }
 0x486   : > { %8405 = vmatprep.mubr.msk.f32.mxu1 %vm583_vm2, %v2627_v62 }
 0x487   : > { %v8384_v35 = vpop.f32.mrf.mxu0  ;;  %8406 = vmatmul.mubr.msk.f32.gmra.mxu1 %vm583_vm2, %v8381_v61 }
 0x489   : > { %v2637_v63 = vpop.f32.mrf.mxu0 }
 0x48a   : > { %8408 = vmatprep.mubr.msk.f32.mxu1 %vm583_vm2, %v2637_v63  ;;  %v7381_v63 = vld [vmem:[%s11320_s6 + $0x40] sm:$0xff] }
 0x48b   : > { %v8387_v1 = vpop.f32.mrf.mxu0  ;;  %8409 = vmatmul.mubr.msk.f32.gmra.mxu1 %vm583_vm2, %v8384_v35 }
 0x48d   : > { %v2647_v3 = vpop.f32.mrf.mxu0 }
 0x48e   : > { %8411 = vmatprep.mubr.msk.f32.mxu1 %vm583_vm2, %v2647_v3 }
 0x48f   : > { %v8390_v4 = vpop.f32.mrf.mxu0  ;;  %8412 = vmatmul.mubr.msk.f32.gmra.mxu1 %vm583_vm2, %v8387_v1 }
 0x491   : > { %v2657_v5 = vpop.f32.mrf.mxu0 }
 0x492   : > { %8414 = vmatprep.mubr.msk.f32.mxu1 %vm583_vm2, %v2657_v5 }
 0x493   : > { %8415 = vmatmul.mubr.msk.f32.gmra.mxu1 %vm583_vm2, %v8390_v4  ;;  %v8435_v7 = vpop.f32.mrf.mxu0 }
 0x495   : > { %v3008_v9 = vpop.f32.mrf.mxu0 }
 0x496   : > { %8459 = vmatprep.mubr.msk.f32.mxu1 %vm583_vm2, %v3008_v9 }
 0x497   : > { %v8438_v11 = vpop.f32.mrf.mxu0  ;;  %8460 = vmatmul.mubr.msk.f32.vlgmr.msra.gmra.mxu1 %vm583_vm2, %v8435_v7 }
 0x498   : > { %8524 = vmatpush3.msra.mxu1 %v7234_v39 }
 0x499   : > { %v3018_v12 = vpop.f32.mrf.mxu0  ;;  %8589 = vmatprep.subr.mxu1 %v7283_v10 }
 0x49a   : > { %8462 = vmatprep.mubr.msk.f32.mxu1 %vm583_vm2, %v3018_v12 }
 0x49b   : > { %v8441_v14 = vpop.f32.mrf.mxu0  ;;  %8463 = vmatmul.mubr.msk.f32.gmra.mxu1 %vm583_vm2, %v8438_v11 }
 0x49d   : > { %v3028_v15 = vpop.f32.mrf.mxu0 }
 0x49e   : > { %8465 = vmatprep.mubr.msk.f32.mxu1 %vm583_vm2, %v3028_v15 }
 0x49f   : > { %v8444_v16 = vpop.f32.mrf.mxu0  ;;  %8466 = vmatmul.mubr.msk.f32.gmra.mxu1 %vm583_vm2, %v8441_v14 }
 0x4a1   : > { %v3038_v17 = vpop.f32.mrf.mxu0 }
 0x4a2   : > { %8468 = vmatprep.mubr.msk.f32.mxu1 %vm583_vm2, %v3038_v17 }
 0x4a3   : > { %v8447_v18 = vpop.f32.mrf.mxu0  ;;  %8469 = vmatmul.mubr.msk.f32.gmra.mxu1 %vm583_vm2, %v8444_v16 }
 0x4a5   : > { %v3048_v20 = vpop.f32.mrf.mxu0 }
 0x4a6   : > { %8471 = vmatprep.mubr.msk.f32.mxu1 %vm583_vm2, %v3048_v20 }
 0x4a7   : > { %v8450_v22 = vpop.f32.mrf.mxu0  ;;  %8472 = vmatmul.mubr.msk.f32.gmra.mxu1 %vm583_vm2, %v8447_v18 }
 0x4a9   : > { %v3058_v24 = vpop.f32.mrf.mxu0 }
 0x4aa   : > { %8474 = vmatprep.mubr.msk.f32.mxu1 %vm583_vm2, %v3058_v24 }
 0x4ab   : > { %v8453_v25 = vpop.f32.mrf.mxu0  ;;  %8475 = vmatmul.mubr.msk.f32.gmra.mxu1 %vm583_vm2, %v8450_v22 }
 0x4ad   : > { %v3068_v44 = vpop.f32.mrf.mxu0 }
 0x4ae   : > { %8477 = vmatprep.mubr.msk.f32.mxu1 %vm583_vm2, %v3068_v44 }
 0x4af   : > { %v8456_v43 = vpop.f32.mrf.mxu0  ;;  %8478 = vmatmul.mubr.msk.f32.gmra.mxu1 %vm583_vm2, %v8453_v25 }
 0x4b1   : > { %v3078_v45 = vpop.f32.mrf.mxu0 }
 0x4b2   : > { %8480 = vmatprep.mubr.msk.f32.mxu1 %vm583_vm2, %v3078_v45 }
 0x4b3   : > { %8481 = vmatmul.mubr.msk.f32.gmra.mxu1 %vm583_vm2, %v8456_v43  ;;  %v8501_v27 = vpop.f32.mrf.mxu0 }
 0x4b5   : > { %v3429_v48 = vpop.f32.mrf.mxu0 }
 0x4b6   : > { %8525 = vmatprep.mubr.msk.f32.mxu1 %vm583_vm2, %v3429_v48 }
 0x4b7   : > { %v8504_v31 = vpop.f32.mrf.mxu0  ;;  %8526 = vmatmul.mubr.msk.f32.vlgmr.msra.gmra.mxu1 %vm583_vm2, %v8501_v27 }
 0x4b8   : > { %8590 = vmatpush3.msra.mxu1 %v7283_v10 }
 0x4b9   : > { %v3439_v32 = vpop.f32.mrf.mxu0  ;;  %8655 = vmatprep.subr.mxu1 %v7332_v29 }
 0x4ba   : > { %8528 = vmatprep.mubr.msk.f32.mxu1 %vm583_vm2, %v3439_v32 }
 0x4bb   : > { %v8507_v33 = vpop.f32.mrf.mxu0  ;;  %8529 = vmatmul.mubr.msk.f32.gmra.mxu1 %vm583_vm2, %v8504_v31 }
 0x4bd   : > { %v3449_v38 = vpop.f32.mrf.mxu0 }
 0x4be   : > { %8531 = vmatprep.mubr.msk.f32.mxu1 %vm583_vm2, %v3449_v38 }
 0x4bf   : > { %v8510_v39 = vpop.f32.mrf.mxu0  ;;  %8532 = vmatmul.mubr.msk.f32.gmra.mxu1 %vm583_vm2, %v8507_v33 }
 0x4c1   : > { %v3459_v41 = vpop.f32.mrf.mxu0 }
 0x4c2   : > { %8534 = vmatprep.mubr.msk.f32.mxu1 %vm583_vm2, %v3459_v41 }
 0x4c3   : > { %v8513_v42 = vpop.f32.mrf.mxu0  ;;  %8535 = vmatmul.mubr.msk.f32.gmra.mxu1 %vm583_vm2, %v8510_v39 }
 0x4c5   : > { %v3469_v53 = vpop.f32.mrf.mxu0 }
 0x4c6   : > { %8537 = vmatprep.mubr.msk.f32.mxu1 %vm583_vm2, %v3469_v53  ;;  %v10582_v53 = vpop.f32.mrf.mxu1 }
 0x4c7   : > { %v8516_v54 = vpop.f32.mrf.mxu0  ;;  %8538 = vmatmul.mubr.msk.f32.gmra.mxu1 %vm583_vm2, %v8513_v42 }
 0x4c9   : > { %v3479_v55 = vpop.f32.mrf.mxu0 }
 0x4ca   : > { %8540 = vmatprep.mubr.msk.f32.mxu1 %vm583_vm2, %v3479_v55 }
 0x4cb   : > { %v8519_v60 = vpop.f32.mrf.mxu0  ;;  %8541 = vmatmul.mubr.msk.f32.gmra.mxu1 %vm583_vm2, %v8516_v54 }
 0x4cd   : > { %v3489_v57 = vpop.f32.mrf.mxu0 }
 0x4ce   : > { %8543 = vmatprep.mubr.msk.f32.mxu1 %vm583_vm2, %v3489_v57 }
 0x4cf   : > { %v8522_v56 = vpop.f32.mrf.mxu0  ;;  %8544 = vmatmul.mubr.msk.f32.gmra.mxu1 %vm583_vm2, %v8519_v60 }
 0x4d1   : > { %v3499_v61 = vpop.f32.mrf.mxu0 }
 0x4d2   : > { %8546 = vmatprep.mubr.msk.f32.mxu1 %vm583_vm2, %v3499_v61 }
 0x4d3   : > { %8547 = vmatmul.mubr.msk.f32.gmra.mxu1 %vm583_vm2, %v8522_v56  ;;  %v8567_v62 = vpop.f32.mrf.mxu0 }
 0x4d5   : > { %v3850_v35 = vpop.f32.mrf.mxu0 }
 0x4d6   : > { %8591 = vmatprep.mubr.msk.f32.mxu1 %vm583_vm2, %v3850_v35 }
 0x4d7   : > { %v8570_v1 = vpop.f32.mrf.mxu0  ;;  %8592 = vmatmul.mubr.msk.f32.vlgmr.msra.gmra.mxu1 %vm583_vm2, %v8567_v62 }
 0x4d8   : > { %8656 = vmatpush3.msra.mxu1 %v7332_v29 }
 0x4d9   : > { %v3860_v3 = vpop.f32.mrf.mxu0  ;;  %8721 = vmatprep.subr.mxu1 %v7381_v63 }
 0x4da   : > { %8594 = vmatprep.mubr.msk.f32.mxu1 %vm583_vm2, %v3860_v3 }
 0x4db   : > { %v8573_v4 = vpop.f32.mrf.mxu0  ;;  %8595 = vmatmul.mubr.msk.f32.gmra.mxu1 %vm583_vm2, %v8570_v1 }
 0x4dd   : > { %v3870_v5 = vpop.f32.mrf.mxu0 }
 0x4de   : > { %8597 = vmatprep.mubr.msk.f32.mxu1 %vm583_vm2, %v3870_v5 }
 0x4df   : > { %v8576_v7 = vpop.f32.mrf.mxu0  ;;  %8598 = vmatmul.mubr.msk.f32.gmra.mxu1 %vm583_vm2, %v8573_v4 }
 0x4e1   : > { %v3880_v9 = vpop.f32.mrf.mxu0 }
 0x4e2   : > { %8600 = vmatprep.mubr.msk.f32.mxu1 %vm583_vm2, %v3880_v9 }
 0x4e3   : > { %v8579_v10 = vpop.f32.mrf.mxu0  ;;  %8601 = vmatmul.mubr.msk.f32.gmra.mxu1 %vm583_vm2, %v8576_v7 }
 0x4e5   : > { %v3890_v11 = vpop.f32.mrf.mxu0 }
 0x4e6   : > { %8603 = vmatprep.mubr.msk.f32.mxu1 %vm583_vm2, %v3890_v11 }
 0x4e7   : > { %v8582_v12 = vpop.f32.mrf.mxu0  ;;  %8604 = vmatmul.mubr.msk.f32.gmra.mxu1 %vm583_vm2, %v8579_v10 }
 0x4e9   : > { %v3900_v14 = vpop.f32.mrf.mxu0 }
 0x4ea   : > { %8606 = vmatprep.mubr.msk.f32.mxu1 %vm583_vm2, %v3900_v14 }
 0x4eb   : > { %v8585_v15 = vpop.f32.mrf.mxu0  ;;  %8607 = vmatmul.mubr.msk.f32.gmra.mxu1 %vm583_vm2, %v8582_v12 }
 0x4ed   : > { %v3910_v16 = vpop.f32.mrf.mxu0 }
 0x4ee   : > { %8609 = vmatprep.mubr.msk.f32.mxu1 %vm583_vm2, %v3910_v16 }
 0x4ef   : > { %v8588_v17 = vpop.f32.mrf.mxu0  ;;  %8610 = vmatmul.mubr.msk.f32.gmra.mxu1 %vm583_vm2, %v8585_v15 }
 0x4f1   : > { %v3920_v18 = vpop.f32.mrf.mxu0 }
 0x4f2   : > { %8612 = vmatprep.mubr.msk.f32.mxu1 %vm583_vm2, %v3920_v18 }
 0x4f3   : > { %8613 = vmatmul.mubr.msk.f32.gmra.mxu1 %vm583_vm2, %v8588_v17  ;;  %v8633_v20 = vpop.f32.mrf.mxu0 }
 0x4f5   : > { %v4271_v22 = vpop.f32.mrf.mxu0 }
 0x4f6   : > { %8657 = vmatprep.mubr.msk.f32.mxu1 %vm583_vm2, %v4271_v22 }
 0x4f7   : > { %v8636_v24 = vpop.f32.mrf.mxu0  ;;  %8658 = vmatmul.mubr.msk.f32.vlgmr.msra.gmra.mxu1 %vm583_vm2, %v8633_v20 }
 0x4f8   : > { %8722 = vmatpush3.msra.mxu1 %v7381_v63 }
 0x4f9   : > { %v4281_v25 = vpop.f32.mrf.mxu0 }
 0x4fa   : > { %8660 = vmatprep.mubr.msk.f32.mxu1 %vm583_vm2, %v4281_v25 }
 0x4fb   : > { %v8639_v44 = vpop.f32.mrf.mxu0  ;;  %8661 = vmatmul.mubr.msk.f32.gmra.mxu1 %vm583_vm2, %v8636_v24 }
 0x4fd   : > { %v4291_v43 = vpop.f32.mrf.mxu0 }
 0x4fe   : > { %8663 = vmatprep.mubr.msk.f32.mxu1 %vm583_vm2, %v4291_v43 }
 0x4ff   : > { %v8642_v45 = vpop.f32.mrf.mxu0  ;;  %8664 = vmatmul.mubr.msk.f32.gmra.mxu1 %vm583_vm2, %v8639_v44 }
 0x501   : > { %v4301_v27 = vpop.f32.mrf.mxu0 }
 0x502   : > { %8666 = vmatprep.mubr.msk.f32.mxu1 %vm583_vm2, %v4301_v27 }
 0x503   : > { %v8645_v48 = vpop.f32.mrf.mxu0  ;;  %8667 = vmatmul.mubr.msk.f32.gmra.mxu1 %vm583_vm2, %v8642_v45 }
 0x505   : > { %v4311_v29 = vpop.f32.mrf.mxu0 }
 0x506   : > { %8669 = vmatprep.mubr.msk.f32.mxu1 %vm583_vm2, %v4311_v29 }
 0x507   : > { %v8648_v31 = vpop.f32.mrf.mxu0  ;;  %8670 = vmatmul.mubr.msk.f32.gmra.mxu1 %vm583_vm2, %v8645_v48 }
 0x509   : > { %v4321_v32 = vpop.f32.mrf.mxu0 }
 0x50a   : > { %8672 = vmatprep.mubr.msk.f32.mxu1 %vm583_vm2, %v4321_v32 }
 0x50b   : > { %v8651_v33 = vpop.f32.mrf.mxu0  ;;  %8673 = vmatmul.mubr.msk.f32.gmra.mxu1 %vm583_vm2, %v8648_v31 }
 0x50d   : > { %v4331_v38 = vpop.f32.mrf.mxu0 }
 0x50e   : > { %8675 = vmatprep.mubr.msk.f32.mxu1 %vm583_vm2, %v4331_v38 }
 0x50f   : > { %v8654_v39 = vpop.f32.mrf.mxu0  ;;  %8676 = vmatmul.mubr.msk.f32.gmra.mxu1 %vm583_vm2, %v8651_v33 }
 0x511   : > { %v4341_v41 = vpop.f32.mrf.mxu0 }
 0x512   : > { %8678 = vmatprep.mubr.msk.f32.mxu1 %vm583_vm2, %v4341_v41 }
 0x513   : > { %8679 = vmatmul.mubr.msk.f32.gmra.mxu1 %vm583_vm2, %v8654_v39  ;;  %v8699_v42 = vpop.f32.mrf.mxu0 }
 0x515   : > { %v4692_v54 = vpop.f32.mrf.mxu0 }
 0x516   : > { %8723 = vmatprep.mubr.msk.f32.mxu1 %vm583_vm2, %v4692_v54  ;;  %v8329_v55 = vpop.f32.mrf.mxu1 }
 0x517   : > { %v2441_v60 = vadd.f32 %v8329_v55, %v10411_v6  ;;  %v8702_v57 = vpop.f32.mrf.mxu0  ;;  %8724 = vmatmul.mubr.msk.f32.vlgmr.msra.gmra.mxu1 %vm583_vm2, %v8699_v42 }
 0x518   : > { %v10587_v56 = vpop.f32.mrf.mxu1 }
 0x519   : > { %v4702_v61 = vpop.f32.mrf.mxu0 }
 0x51a   : > { %8726 = vmatprep.mubr.msk.f32.mxu1 %vm583_vm2, %v4702_v61 }
 0x51b   : > { %v8332_v62 = vpop.f32.mrf.mxu1  ;;  %v8705_v35 = vpop.f32.mrf.mxu0  ;;  %8727 = vmatmul.mubr.msk.f32.gmra.mxu1 %vm583_vm2, %v8702_v57 }
 0x51c   : > { %v2443_v63 = vadd.f32 %v8332_v62, %v10426_v13 }
 0x51d   : > { %v10592_v1 = vpop.f32.mrf.mxu1  ;;  %v4712_v3 = vpop.f32.mrf.mxu0 }
 0x51e   : > { %8729 = vmatprep.mubr.msk.f32.mxu1 %vm583_vm2, %v4712_v3 }
 0x51f   : > { %v8335_v6 = vpop.f32.mrf.mxu1  ;;  %v8708_v4 = vpop.f32.mrf.mxu0  ;;  %8730 = vmatmul.mubr.msk.f32.gmra.mxu1 %vm583_vm2, %v8705_v35 }
 0x520   : > { %v2445_v5 = vadd.f32 %v8335_v6, %v10441_v19 }
 0x521   : > { %v10597_v7 = vpop.f32.mrf.mxu1  ;;  %v4722_v9 = vpop.f32.mrf.mxu0 }
 0x522   : > { %8732 = vmatprep.mubr.msk.f32.mxu1 %vm583_vm2, %v4722_v9 }
 0x523   : > { %v8338_v10 = vpop.f32.mrf.mxu1  ;;  %v8711_v11 = vpop.f32.mrf.mxu0  ;;  %8733 = vmatmul.mubr.msk.f32.gmra.mxu1 %vm583_vm2, %v8708_v4 }
 0x524   : > { %v2447_v13 = vadd.f32 %v8338_v10, %v10456_v26 }
 0x525   : > { %v10602_v12 = vpop.f32.mrf.mxu1  ;;  %v4732_v14 = vpop.f32.mrf.mxu0 }
 0x526   : > { %8735 = vmatprep.mubr.msk.f32.mxu1 %vm583_vm2, %v4732_v14 }
 0x527   : > { %v8341_v15 = vpop.f32.mrf.mxu1  ;;  %v8714_v16 = vpop.f32.mrf.mxu0  ;;  %8736 = vmatmul.mubr.msk.f32.gmra.mxu1 %vm583_vm2, %v8711_v11 }
 0x528   : > { %v2449_v19 = vadd.f32 %v8341_v15, %v10468_v28 }
 0x529   : > { %v10607_v17 = vpop.f32.mrf.mxu1  ;;  %v4742_v18 = vpop.f32.mrf.mxu0 }
 0x52a   : > { %8738 = vmatprep.mubr.msk.f32.mxu1 %vm583_vm2, %v4742_v18 }
 0x52b   : > { %v8344_v20 = vpop.f32.mrf.mxu1  ;;  %v8717_v22 = vpop.f32.mrf.mxu0  ;;  %8739 = vmatmul.mubr.msk.f32.gmra.mxu1 %vm583_vm2, %v8714_v16 }
 0x52c   : > { %v2451_v26 = vadd.f32 %v8344_v20, %v10477_v34 }
 0x52d   : > { %v10612_v24 = vpop.f32.mrf.mxu1  ;;  %v4752_v25 = vpop.f32.mrf.mxu0 }
 0x52e   : > { %8741 = vmatprep.mubr.msk.f32.mxu1 %vm583_vm2, %v4752_v25  ;;  %v1987_v25 = vadd.f32 %v10460_v46, %v10341_v36 }
 0x52f   : > { %v8347_v44 = vpop.f32.mrf.mxu1  ;;  %v8720_v43 = vpop.f32.mrf.mxu0  ;;  %8742 = vmatmul.mubr.msk.f32.gmra.mxu1 %vm583_vm2, %v8717_v22 }
 0x530   : > { %v2453_v28 = vadd.f32 %v8347_v44, %v10487_v51 }
 0x531   : > { %v10617_v45 = vpop.f32.mrf.mxu1  ;;  %v4762_v27 = vpop.f32.mrf.mxu0 }
 0x532   : > { %8744 = vmatprep.mubr.msk.f32.mxu1 %vm583_vm2, %v4762_v27  ;;  %v2446_v27 = vadd.f32 %v10602_v12, %v1987_v25 }
 0x533   : > { %v8350_v48 = vpop.f32.mrf.mxu1  ;;  %8745 = vmatmul.mubr.msk.f32.gmra.mxu1 %vm583_vm2, %v8720_v43 }
 0x534   : > { %v2455_v34 = vadd.f32 %v8350_v48, %v10495_v58 }
 0x535   : > { %v10622_v29 = vpop.f32.mrf.mxu1 }
 0x537   : > { %v8395_v31 = vpop.f32.mrf.mxu1 }
 0x538   : > { %v2862_v32 = vadd.f32 %v8395_v31, %v2441_v60  ;;  %v1997_v31 = vadd.f32 %v10472_v30, %v10353_v40  ;;  %v1957_v40 = vadd.f32 %v10415_v8, %v10303_v47 }
 0x539   : > { %v2782_v33 = vpop.f32.mrf.mxu1 }
 0x53b   : > { %v8398_v38 = vpop.f32.mrf.mxu1 }
 0x53c   : > { %v2864_v39 = vadd.f32 %v8398_v38, %v2443_v63  ;;  %v2448_v38 = vadd.f32 %v10607_v17, %v1997_v31 }
 0x53d   : > { %v10624_v41 = vpop.f32.mrf.mxu1 }
 0x53f   : > { %v8401_v51 = vpop.f32.mrf.mxu1 }
 0x540   : > { %v2866_v42 = vadd.f32 %v8401_v51, %v2445_v5 }
 0x541   : > { %v2802_v54 = vpop.f32.mrf.mxu1 }
 0x543   : > { %v8404_v55 = vpop.f32.mrf.mxu1 }
 0x544   : > { %v2868_v57 = vadd.f32 %v8404_v55, %v2447_v13 }
 0x545   : > { %v2812_v61 = vpop.f32.mrf.mxu1 }
 0x547   : > { %v8407_v62 = vpop.f32.mrf.mxu1 }
 0x548   : > { %v2870_v35 = vadd.f32 %v8407_v62, %v2449_v19  ;;  %v1977_v19 = vadd.f32 %v10445_v21, %v10329_v23 }
 0x549   : > { %v2822_v3 = vpop.f32.mrf.mxu1 }
 0x54a   : > { %v2444_v22 = vadd.f32 %v10597_v7, %v1977_v19  ;;  %v2869_v51 = vadd.f32 %v2822_v3, %v2448_v38  ;;  %v1967_v3 = vadd.f32 %v10430_v2, %v10317_v49 }
 0x54b   : > { %v8410_v6 = vpop.f32.mrf.mxu1 }
 0x54c   : > { %v2872_v58 = vadd.f32 %v8410_v6, %v2451_v26  ;;  %v2865_v44 = vadd.f32 %v2802_v54, %v2444_v22 }
 0x54d   : > { %v10626_v4 = vpop.f32.mrf.mxu1 }
 0x54f   : > { %v8413_v9 = vpop.f32.mrf.mxu1 }
 0x550   : > { %v2874_v60 = vadd.f32 %v8413_v9, %v2453_v28 }
 0x551   : > { %v10628_v10 = vpop.f32.mrf.mxu1 }
 0x553   : > { %v8416_v63 = vpop.f32.mrf.mxu1 }
 0x554   : > { %v2876_v11 = vadd.f32 %v8416_v63, %v2455_v34 }
 0x555   : > { %v10630_v14 = vpop.f32.mrf.mxu1 }
 0x557   : > { %v8461_v5 = vpop.f32.mrf.mxu1 }
 0x558   : > { %v3283_v15 = vadd.f32 %v8461_v5, %v2862_v32  ;;  %v2867_v32 = vadd.f32 %v2812_v61, %v2446_v27  ;;  %v2442_v5 = vadd.f32 %v10592_v1, %v1967_v3  ;;  %v2007_v1 = vadd.f32 %v10479_v37, %v10365_v52 }
 0x559   : > { %v3203_v16 = vpop.f32.mrf.mxu1  ;;  %v2027_v52 = vadd.f32 %v10582_v53, %v10400_v0  ;;  %v5094_v53 = vld [vmem:[%s11322_s8] sm:$0xff] }
 0x55a   : > { %8779 = vmatprep.mubr.f32.mxu0 %v5094_v53 }
 0x55b   : > { %v8464_v13 = vpop.f32.mrf.mxu1 }
 0x55c   : > { %v3285_v18 = vadd.f32 %v8464_v13, %v2864_v39 }
 0x55d   : > { %v3213_v20 = vpop.f32.mrf.mxu1 }
 0x55f   : > { %v8467_v26 = vpop.f32.mrf.mxu1 }
 0x560   : > { %v3287_v43 = vadd.f32 %v8467_v26, %v2866_v42 }
 0x561   : > { %v3223_v28 = vpop.f32.mrf.mxu1 }
 0x562   : > { %v3286_v48 = vadd.f32 %v3223_v28, %v2865_v44 }
 0x563   : > { %v8470_v34 = vpop.f32.mrf.mxu1 }
 0x564   : > { %v3289_v23 = vadd.f32 %v8470_v34, %v2868_v57  ;;  %v2440_v57 = vadd.f32 %v10587_v56, %v1957_v40 }
 0x565   : > { %v3233_v21 = vpop.f32.mrf.mxu1 }
 0x566   : > { %v3288_v7 = vadd.f32 %v3233_v21, %v2867_v32 }
 0x567   : > { %v8473_v39 = vpop.f32.mrf.mxu1 }
 0x568   : > { %v3291_v55 = vadd.f32 %v8473_v39, %v2870_v35  ;;  %v2861_v35 = vadd.f32 %v2782_v33, %v2440_v57  ;;  %v2454_v39 = vadd.f32 %v10622_v29, %v2027_v52  ;;  %v7398_v29 = vld [vmem:[%s11322_s8 + $0x20] sm:$0xff] }
 0x569   : > { %v3243_v36 = vpop.f32.mrf.mxu1  ;;  %8817 = vmatprep.mubr.f32.mxu1 %v7398_v29  ;;  %v5071_v29 = vpop.permute.xlu0 %5070 }
 0x56a   : > { %v3290_v46 = vadd.f32 %v3243_v36, %v2869_v51 }
 0x56b   : > { %v8476_v42 = vpop.f32.mrf.mxu1 }
 0x56c   : > { %v3293_v54 = vadd.f32 %v8476_v42, %v2872_v58  ;;  %v3282_v58 = vadd.f32 %v3203_v16, %v2861_v35 }
 0x56d   : > { %v3253_v62 = vpop.f32.mrf.mxu1 }
 0x56f   : > { %v8479_v12 = vpop.f32.mrf.mxu1 }
 0x570   : > { %v3295_v6 = vadd.f32 %v8479_v12, %v2874_v60  ;;  %v2863_v60 = vadd.f32 %v10624_v41, %v2442_v5  ;;  %v2450_v41 = vadd.f32 %v10612_v24, %v2007_v1 }
 0x571   : > { %v3263_v9 = vpop.f32.mrf.mxu1 }
 0x572   : > { %v3284_v47 = vadd.f32 %v3213_v20, %v2863_v60  ;;  %v2871_v20 = vadd.f32 %v10626_v4, %v2450_v41  ;;  %v2875_v4 = vadd.f32 %v10630_v14, %v2454_v39 }
 0x573   : > { %v8482_v30 = vpop.f32.mrf.mxu1 }
 0x574   : > { %v3297_v61 = vadd.f32 %v8482_v30, %v2876_v11 }
 0x575   : > { %v3273_v17 = vpop.f32.mrf.mxu1 }
 0x577   : > { %v8527_v63 = vpop.f32.mrf.mxu1 }
 0x578   : > { %v3704_v13 = vadd.f32 %v8527_v63, %v3283_v15 }
 0x579   : > { %v3624_v19 = vpop.f32.mrf.mxu1 }
 0x57a   : > { %v3703_v22 = vadd.f32 %v3624_v19, %v3282_v58 }
 0x57b   : > { %v8530_v26 = vpop.f32.mrf.mxu1 }
 0x57c   : > { %v3706_v8 = vadd.f32 %v8530_v26, %v3285_v18  ;;  %v2017_v18 = vadd.f32 %v10490_v50, %v10385_v59 }
 0x57d   : > { %v3634_v25 = vpop.f32.mrf.mxu1 }
 0x57e   : > { %v3705_v56 = vadd.f32 %v3634_v25, %v3284_v47 }
 0x57f   : > { %v8533_v11 = vpop.f32.mrf.mxu1 }
 0x580   : > { %v3708_v44 = vadd.f32 %v8533_v11, %v3287_v43 }
 0x581   : > { %v3644_v28 = vpop.f32.mrf.mxu1 }
 0x582   : > { %v3707_v27 = vadd.f32 %v3644_v28, %v3286_v48  ;;  %v2452_v48 = vadd.f32 %v10617_v45, %v2017_v18  ;;  %v3296_v45 = vadd.f32 %v3273_v17, %v2875_v4 }
 0x583   : > { %v8536_v49 = vpop.f32.mrf.mxu1 }
 0x584   : > { %v3710_v2 = vadd.f32 %v8536_v49, %v3289_v23  ;;  %v3292_v23 = vadd.f32 %v3253_v62, %v2871_v20  ;;  %v2873_v37 = vadd.f32 %v10628_v10, %v2452_v48 }
 0x585   : > { %v3654_v33 = vpop.f32.mrf.mxu1 }
 0x586   : > { %v3709_v15 = vadd.f32 %v3654_v33, %v3288_v7  ;;  %v3294_v51 = vadd.f32 %v3263_v9, %v2873_v37 }
 0x587   : > { %v8539_v16 = vpop.f32.mrf.mxu1 }
 0x588   : > { %v3712_v34 = vadd.f32 %v8539_v16, %v3291_v55 }
 0x589   : > { %v3664_v31 = vpop.f32.mrf.mxu1 }
 0x58a   : > { %v3711_v43 = vadd.f32 %v3664_v31, %v3290_v46 }
 0x58b   : > { %v8542_v32 = vpop.f32.mrf.mxu1 }
 0x58c   : > { %v3714_v21 = vadd.f32 %v8542_v32, %v3293_v54 }
 0x58d   : > { %v3674_v38 = vpop.f32.mrf.mxu1 }
 0x58e   : > { %v3713_v24 = vadd.f32 %v3674_v38, %v3292_v23 }
 0x58f   : > { %v8545_v7 = vpop.f32.mrf.mxu1 }
 0x590   : > { %v3716_v59 = vadd.f32 %v8545_v7, %v3295_v6 }
 0x591   : > { %v3684_v50 = vpop.f32.mrf.mxu1 }
 0x592   : > { %v3715_v55 = vadd.f32 %v3684_v50, %v3294_v51 }
 0x593   : > { %v8548_v36 = vpop.f32.mrf.mxu1 }
 0x594   : > { %v10660_v46 = vadd.f32 %v8548_v36, %v3297_v61 }
 0x595   : > { %v3694_v42 = vpop.f32.mrf.mxu1 }
 0x596   : > { %v10662_v54 = vadd.f32 %v3694_v42, %v3296_v45 }
 0x597   : > { %v8593_v0 = vpop.f32.mrf.mxu1 }
 0x598   : > { %v4125_v10 = vadd.f32 %v8593_v0, %v3704_v13  ;;  %v5076_v0 = vpop.permute.xlu1 %5075 }
 0x599   : > { %v4045_v14 = vpop.f32.mrf.mxu1 }
 0x59a   : > { %v4124_v62 = vadd.f32 %v4045_v14, %v3703_v22 }
 0x59b   : > { %v8596_v12 = vpop.f32.mrf.mxu1 }
 0x59c   : > { %v4127_v6 = vadd.f32 %v8596_v12, %v3706_v8 }
 0x59d   : > { %v4055_v9 = vpop.f32.mrf.mxu1 }
 0x59e   : > { %v4126_v40 = vadd.f32 %v4055_v9, %v3705_v56 }
 0x59f   : > { %v8599_v30 = vpop.f32.mrf.mxu1 }
 0x5a0   : > { %v4129_v57 = vadd.f32 %v8599_v30, %v3708_v44 }
 0x5a1   : > { %v4065_v61 = vpop.f32.mrf.mxu1 }
 0x5a2   : > { %v4128_v17 = vadd.f32 %v4065_v61, %v3707_v27 }
 0x5a3   : > { %v8602_v3 = vpop.f32.mrf.mxu1 }
 0x5a4   : > { %v10670_v35 = vadd.f32 %v8602_v3, %v3710_v2 }
 0x5a5   : > { %v4075_v63 = vpop.f32.mrf.mxu1 }
 0x5a6   : > { %v10672_v5 = vadd.f32 %v4075_v63, %v3709_v15 }
 0x5a7   : > { %v8605_v58 = vpop.f32.mrf.mxu1 }
 0x5a8   : > { %v10674_v13 = vadd.f32 %v8605_v58, %v3712_v34 }
 0x5a9   : > { %v4085_v19 = vpop.f32.mrf.mxu1 }
 0x5aa   : > { %v10676_v60 = vadd.f32 %v4085_v19, %v3711_v43 }
 0x5ab   : > { %v8608_v22 = vpop.f32.mrf.mxu1 }
 0x5ac   : > { %v10678_v26 = vadd.f32 %v8608_v22, %v3714_v21 }
 0x5ad   : > { %v4095_v47 = vpop.f32.mrf.mxu1 }
 0x5ae   : > { %v10680_v8 = vadd.f32 %v4095_v47, %v3713_v24 }
 0x5af   : > { %v8611_v25 = vpop.f32.mrf.mxu1 }
 0x5b0   : > { %v4137_v56 = vadd.f32 %v8611_v25, %v3716_v59 }
 0x5b1   : > { %v4105_v11 = vpop.f32.mrf.mxu1 }
 0x5b2   : > { %v4136_v44 = vadd.f32 %v4105_v11, %v3715_v55 }
 0x5b3   : > { %v8614_v28 = vpop.f32.mrf.mxu1 }
 0x5b5   : > { %v4115_v27 = vpop.f32.mrf.mxu1 }
 0x5b7   : > { %v8659_v49 = vpop.f32.mrf.mxu1 }
 0x5b8   : > { %v10682_v2 = vadd.f32 %v8659_v49, %v4125_v10 }
 0x5b9   : > { %v4466_v33 = vpop.f32.mrf.mxu1 }
 0x5ba   : > { %v10684_v1 = vadd.f32 %v4466_v33, %v4124_v62  ;;  %v5066_v62 = vpop.permute.xlu1 %5065 }
 0x5bb   : > { %v8662_v15 = vpop.f32.mrf.mxu1 }
 0x5bc   : > { %v10686_v16 = vadd.f32 %v8662_v15, %v4127_v6  ;;  %v5061_v6 = vpop.permute.xlu0 %5060 }
 0x5bd   : > { %v4476_v41 = vpop.f32.mrf.mxu1 }
 0x5be   : > { %v10688_v34 = vadd.f32 %v4476_v41, %v4126_v40  ;;  %v4139_v40 = vadd.f32 %v8614_v28, %v10660_v46 }
 0x5bf   : > { %v8665_v31 = vpop.f32.mrf.mxu1 }
 0x5c0   : > { %v10690_v18 = vadd.f32 %v8665_v31, %v4129_v57  ;;  %v4138_v57 = vadd.f32 %v4115_v27, %v10662_v54  ;;  %v5051_v22 = vpop.permute.xlu0 %5050 }
 0x5c1   : > { %v4486_v20 = vpop.f32.mrf.mxu1 }
 0x5c2   : > { %v10692_v43 = vadd.f32 %v4486_v20, %v4128_v17  ;;  %v5056_v17 = vpop.permute.xlu1 %5055 }
 0x5c3   : > { %v10694_v32 = vpop.f32.mrf.mxu1 }
 0x5c5   : > { %v10696_v48 = vpop.f32.mrf.mxu1 }
 0x5c6   : > { %v5046_v54 = vpop.permute.xlu1 %5045 }
 0x5c7   : > { %v8671_v23 = vpop.f32.mrf.mxu1 }
 0x5c8   : > { %v4554_v27 = vadd.f32 %v8671_v23, %v10674_v13  ;;  %v4552_v23 = vadd.f32 %v10694_v32, %v10670_v35 }
 0x5c9   : > { %v4506_v21 = vpop.f32.mrf.mxu1 }
 0x5ca   : > { %v5036_v13 = vpop.permute.xlu1 %5035 }
 0x5cb   : > { %v8674_v38 = vpop.f32.mrf.mxu1 }
 0x5cc   : > { %v4556_v15 = vadd.f32 %v8674_v38, %v10678_v26  ;;  %v5041_v26 = vpop.permute.xlu0 %5040 }
 0x5cd   : > { %v4516_v52 = vpop.f32.mrf.mxu1 }
 0x5cf   : > { %v8677_v37 = vpop.f32.mrf.mxu1 }
 0x5d0   : > { %v4558_v63 = vadd.f32 %v8677_v37, %v4137_v56  ;;  %v4555_v56 = vadd.f32 %v4516_v52, %v10680_v8  ;;  %v4553_v8 = vadd.f32 %v4506_v21, %v10676_v60  ;;  %v5031_v60 = vpop.permute.xlu0 %5030  ;;  %v4551_v21 = vadd.f32 %v10696_v48, %v10672_v5  ;;  %v5026_v5 = vpop.permute.xlu1 %5025 }
 0x5d1   : > { %v4526_v24 = vpop.f32.mrf.mxu1 }
 0x5d2   : > { %v4557_v25 = vadd.f32 %v4526_v24, %v4136_v44 }
 0x5d3   : > { %v8680_v7 = vpop.f32.mrf.mxu1 }
 0x5d4   : > { %v4560_v61 = vadd.f32 %v8680_v7, %v4139_v40  ;;  %v7402_v40 = vld [vmem:[%s11323_s9 + $0x10] sm:$0xff] }
 0x5d5   : > { %v4536_v39 = vpop.f32.mrf.mxu1 }
 0x5d6   : > { %v4559_v58 = vadd.f32 %v4536_v39, %v4138_v57  ;;  %v7401_v57 = vld [vmem:[%s11322_s8 + $0x38] sm:$0xff] }
 0x5d7   : > { %v10698_v51 = vpop.f32.mrf.mxu1 }
 0x5d9   : > { %v10700_v59 = vpop.f32.mrf.mxu1 }
 0x5db   : > { %v10702_v50 = vpop.f32.mrf.mxu1 }
 0x5dd   : > { %v10704_v4 = vpop.f32.mrf.mxu1 }
 0x5df   : > { %v10706_v55 = vpop.f32.mrf.mxu1 }
 0x5e0   : > { %v4971_v48 = vadd.f32 %v10706_v55, %v10690_v18  ;;  %v4969_v18 = vadd.f32 %v10702_v50, %v10686_v16  ;;  %v4967_v50 = vadd.f32 %v10698_v51, %v10682_v2 }
 0x5e1   : > { %v10708_v36 = vpop.f32.mrf.mxu1 }
 0x5e2   : > { %v10788_v55 = vadd.f32 %v5026_v5, %v4971_v48 }
 0x5e3   : > { %v10710_v45 = vpop.f32.mrf.mxu1 }
 0x5e4   : > { %v4973_v7 = vadd.f32 %v10710_v45, %v4552_v23 }
 0x5e5   : > { %v10712_v42 = vpop.f32.mrf.mxu1 }
 0x5e6   : > { %v4972_v35 = vadd.f32 %v10712_v42, %v4551_v21  ;;  %v10772_v45 = vadd.f32 %v5036_v13, %v4973_v7  ;;  %v5021_v42 = vpop.permute.xlu0 %5020 }
 0x5e7   : > { %v8737_v53 = vpop.f32.mrf.mxu1 }
 0x5e8   : > { %v4975_v38 = vadd.f32 %v8737_v53, %v4554_v27  ;;  %v10780_v53 = vadd.f32 %v5031_v60, %v4972_v35  ;;  %v7415_v27 = vld [vmem:[%s11322_s8 + $0x58] sm:$0xff] }
 0x5e9   : > { %v4927_v10 = vpop.f32.mrf.mxu1 }
 0x5ea   : > { %v4974_v37 = vadd.f32 %v4927_v10, %v4553_v8  ;;  %v10757_v39 = vadd.f32 %v5046_v54, %v4975_v38  ;;  %v5011_v16 = vpop.permute.xlu0 %5010  ;;  %v7413_v54 = vld [vmem:[%s11322_s8 + $0x48] sm:$0xff] }
 0x5eb   : > { %v8740_v14 = vpop.f32.mrf.mxu1 }
 0x5ec   : > { %v4977_v44 = vadd.f32 %v8740_v14, %v4556_v15  ;;  %v10764_v32 = vadd.f32 %v5041_v26, %v4974_v37  ;;  %v7426_v26 = vld [vmem:[%s11323_s9 + $0x30] sm:$0xff] }
 0x5ed   : > { %v4937_v12 = vpop.f32.mrf.mxu1 }
 0x5ee   : > { %v4976_v31 = vadd.f32 %v4937_v12, %v4555_v56  ;;  %v10740_v52 = vadd.f32 %v5056_v17, %v4977_v44  ;;  %v5001_v14 = vpop.permute.xlu0 %5000  ;;  %v7403_v12 = vld [vmem:[%s11323_s9 + $0x18] sm:$0xff]  ;;  %v5183_v17 = vld [vmem:[%s11323_s9] sm:$0xff]  ;;  %v7414_v44 = vld [vmem:[%s11322_s8 + $0x50] sm:$0xff] }
 0x5ef   : > { %v8743_v9 = vpop.f32.mrf.mxu1  ;;  %v7427_v56 = vld [vmem:[%s11323_s9 + $0x38] sm:$0xff] }
 0x5f0   : > { %v4979_v11 = vadd.f32 %v8743_v9, %v4558_v63  ;;  %v10748_v24 = vadd.f32 %v5051_v22, %v4976_v31  ;;  %v7400_v9 = vld [vmem:[%s11322_s8 + $0x30] sm:$0xff] }
 0x5f1   : > { %v4947_v30 = vpop.f32.mrf.mxu1 }
 0x5f2   : > { %v4978_v41 = vadd.f32 %v4947_v30, %v4557_v25  ;;  %v10726_v28 = vadd.f32 %v5066_v62, %v4979_v11  ;;  %v7399_v62 = vld [vmem:[%s11322_s8 + $0x28] sm:$0xff] }
 0x5f3   : > { %v8746_v3 = vpop.f32.mrf.mxu1  ;;  %v5184_v30 = vld [vmem:[%s11323_s9 + $0x8] sm:$0xff] }
 0x5f4   : > { %v4981_v19 = vadd.f32 %v8746_v3, %v4560_v61  ;;  %v10733_v20 = vadd.f32 %v5061_v6, %v4978_v41  ;;  %v5096_v6 = vld [vmem:[%s11322_s8 + $0x10] sm:$0xff]  ;;  %v5097_v61 = vld [vmem:[%s11322_s8 + $0x18] sm:$0xff]  ;;  %v7417_v3 = vld [vmem:[%s11323_s9 + $0x28] sm:$0xff] }
 0x5f5   : > { %v4957_v47 = vpop.f32.mrf.mxu1  ;;  %v7412_v41 = vld [vmem:[%s11322_s8 + $0x40] sm:$0xff] }
 0x5f6   : > { %v10716_v49 = vadd.f32 %v5076_v0, %v4981_v19  ;;  %v4980_v33 = vadd.f32 %v4957_v47, %v4559_v58  ;;  %v4970_v0 = vadd.f32 %v10708_v36, %v10692_v43  ;;  %v5016_v43 = vpop.permute.xlu1 %5015  ;;  %v4968_v36 = vadd.f32 %v10704_v4, %v10688_v34  ;;  %v7416_v47 = vld [vmem:[%s11323_s9 + $0x20] sm:$0xff] }
 0x5f7   : > { %v10804_v10 = vadd.f32 %v5016_v43, %v4969_v18  ;;  %v4966_v34 = vadd.f32 %v10700_v59, %v10684_v1  ;;  %v5095_v59 = vld [vmem:[%s11322_s8 + $0x8] sm:$0xff]  ;;  %v7422_v18 = vld [vmem:[%s11322_s8 + $0x60] sm:$0xff] }
 0x5f8   : > { %v10719_v46 = vadd.f32 %v5071_v29, %v4980_v33  ;;  %8747 = vmatprep.subr.mxu0 %v10716_v49  ;;  %8785 = vmatprep.subr.mxu1 %v10716_v49  ;;  %v10796_v29 = vadd.f32 %v5021_v42, %v4970_v0  ;;  %v10812_v4 = vadd.f32 %v5011_v16, %v4968_v36  ;;  %v7423_v43 = vld [vmem:[%s11322_s8 + $0x68] sm:$0xff]  ;;  %v7424_v16 = vld [vmem:[%s11322_s8 + $0x70] sm:$0xff] }
 0x5f9   : > { %8748 = vmatpush3.msra.mxu0 %v10716_v49  ;;  %8786 = vmatpush3.msra.mxu1 %v10716_v49  ;;  %v10824_v1 = vadd.f32 %v5001_v14, %v4966_v34  ;;  %v7437_v36 = vld [vmem:[%s11323_s9 + $0x48] sm:$0xff]  ;;  %v7425_v34 = vld [vmem:[%s11322_s8 + $0x78] sm:$0xff] }
 0x5fa   : > { %8749 = vmatprep.subr.mxu0 %v10719_v46  ;;  %8787 = vmatprep.subr.mxu1 %v10719_v46  ;;  %v5006_v2 = vpop.permute.xlu1 %5005 }
 0x5fb   : > { %8750 = vmatpush3.msra.mxu0 %v10719_v46  ;;  %8788 = vmatpush3.msra.mxu1 %v10719_v46  ;;  %v10818_v51 = vadd.f32 %v5006_v2, %v4967_v50  ;;  %v7436_v50 = vld [vmem:[%s11323_s9 + $0x40] sm:$0xff] }
 0x5fc   : > { %8751 = vmatprep.subr.mxu0 %v10726_v28  ;;  %8789 = vmatprep.subr.mxu1 %v10726_v28 }
 0x5fd   : > { %8752 = vmatpush3.msra.mxu0 %v10726_v28  ;;  %8790 = vmatpush3.msra.mxu1 %v10726_v28 }
 0x5fe   : > { %8753 = vmatprep.subr.mxu0 %v10733_v20  ;;  %8791 = vmatprep.subr.mxu1 %v10733_v20 }
 0x5ff   : > { %8754 = vmatpush3.msra.mxu0 %v10733_v20  ;;  %8792 = vmatpush3.msra.mxu1 %v10733_v20 }
 0x600   : > { %8755 = vmatprep.subr.mxu0 %v10740_v52  ;;  %8793 = vmatprep.subr.mxu1 %v10740_v52 }
 0x601   : > { %8756 = vmatpush3.msra.mxu0 %v10740_v52  ;;  %8794 = vmatpush3.msra.mxu1 %v10740_v52 }
 0x602   : > { %8757 = vmatprep.subr.mxu0 %v10748_v24  ;;  %8795 = vmatprep.subr.mxu1 %v10748_v24 }
 0x603   : > { %8758 = vmatpush3.msra.mxu0 %v10748_v24  ;;  %8796 = vmatpush3.msra.mxu1 %v10748_v24 }
 0x604   : > { %8759 = vmatprep.subr.mxu0 %v10757_v39  ;;  %8797 = vmatprep.subr.mxu1 %v10757_v39 }
 0x605   : > { %8760 = vmatpush3.msra.mxu0 %v10757_v39  ;;  %8798 = vmatpush3.msra.mxu1 %v10757_v39 }
 0x606   : > { %8761 = vmatprep.subr.mxu0 %v10764_v32  ;;  %8799 = vmatprep.subr.mxu1 %v10764_v32 }
 0x607   : > { %8762 = vmatpush3.msra.mxu0 %v10764_v32  ;;  %8800 = vmatpush3.msra.mxu1 %v10764_v32 }
 0x608   : > { %8763 = vmatprep.subr.mxu0 %v10772_v45  ;;  %8801 = vmatprep.subr.mxu1 %v10772_v45 }
 0x609   : > { %8764 = vmatpush3.msra.mxu0 %v10772_v45  ;;  %8802 = vmatpush3.msra.mxu1 %v10772_v45 }
 0x60a   : > { %8765 = vmatprep.subr.mxu0 %v10780_v53  ;;  %8803 = vmatprep.subr.mxu1 %v10780_v53 }
 0x60b   : > { %8766 = vmatpush3.msra.mxu0 %v10780_v53  ;;  %8804 = vmatpush3.msra.mxu1 %v10780_v53 }
 0x60c   : > { %8767 = vmatprep.subr.mxu0 %v10788_v55  ;;  %8805 = vmatprep.subr.mxu1 %v10788_v55 }
 0x60d   : > { %8768 = vmatpush3.msra.mxu0 %v10788_v55  ;;  %8806 = vmatpush3.msra.mxu1 %v10788_v55 }
 0x60e   : > { %8769 = vmatprep.subr.mxu0 %v10796_v29  ;;  %8807 = vmatprep.subr.mxu1 %v10796_v29 }
 0x60f   : > { %8770 = vmatpush3.msra.mxu0 %v10796_v29  ;;  %8808 = vmatpush3.msra.mxu1 %v10796_v29 }
 0x610   : > { %8771 = vmatprep.subr.mxu0 %v10804_v10  ;;  %8809 = vmatprep.subr.mxu1 %v10804_v10 }
 0x611   : > { %8772 = vmatpush3.msra.mxu0 %v10804_v10  ;;  %8810 = vmatpush3.msra.mxu1 %v10804_v10 }
 0x612   : > { %8773 = vmatprep.subr.mxu0 %v10812_v4  ;;  %8811 = vmatprep.subr.mxu1 %v10812_v4 }
 0x613   : > { %8774 = vmatpush3.msra.mxu0 %v10812_v4  ;;  %8812 = vmatpush3.msra.mxu1 %v10812_v4 }
 0x614   : > { %8775 = vmatprep.subr.mxu0 %v10818_v51  ;;  %8813 = vmatprep.subr.mxu1 %v10818_v51 }
 0x615   : > { %8776 = vmatpush3.msra.mxu0 %v10818_v51  ;;  %8814 = vmatpush3.msra.mxu1 %v10818_v51 }
 0x616   : > { %8777 = vmatprep.subr.mxu0 %v10824_v1  ;;  %8815 = vmatprep.subr.mxu1 %v10824_v1 }
 0x617   : > { %8778 = vmatpush3.msra.mxu0 %v10824_v1  ;;  %8816 = vmatpush3.msra.mxu1 %v10824_v1 }
 0x618   : > { %8780 = vmatmul.mubr.f32.vlgmr.msra.gmra.mxu0 %v5095_v59  ;;  %8818 = vmatmul.mubr.f32.vlgmr.msra.gmra.mxu1 %v7399_v62 }
 0x619   : > { %8823 = vmatprep.subr.mxu0 %v7403_v12  ;;  %8782 = vmatprep.mubr.f32.mxu0 %v5096_v6 }
 0x61a   : > { %8824 = vmatpush3.msra.mxu0 %v7403_v12  ;;  %8820 = vmatprep.mubr.f32.mxu1 %v7400_v9 }
 0x61b   : > { %8825 = vmatprep.subr.mxu0 %v7402_v40  ;;  %8833 = vmatprep.subr.mxu1 %v5184_v30 }
 0x61c   : > { %8826 = vmatpush3.msra.mxu0 %v7402_v40  ;;  %8821 = vmatmul.mubr.f32.gmra.mxu1 %v7401_v57 }
 0x61d   : > { %8843 = vmatprep.subr.mxu0 %v10716_v49  ;;  %8783 = vmatmul.mubr.f32.gmra.mxu0 %v5097_v61 }
 0x61e   : > { %8834 = vmatpush3.msra.mxu1 %v5184_v30 }
 0x61f   : > { %8835 = vmatprep.subr.mxu1 %v5183_v17 }
 0x620   : > { %8836 = vmatpush3.msra.mxu1 %v5183_v17 }
 0x621   : > { %8881 = vmatprep.subr.mxu1 %v7417_v3 }
 0x6d8   : > { %v8781_v63 = vpop.f32.mrf.mxu0  ;;  %v8819_v58 = vpop.f32.mrf.mxu1 }
 0x6da   : > { %v5164_v19 = vpop.f32.mrf.mxu0  ;;  %v5256_v22 = vpop.f32.mrf.mxu1 }
 0x6db   : > { %8827 = vmatprep.mubr.msk.f32.mxu0 %vm5278_vm3, %v5256_v22  ;;  %8837 = vmatprep.mubr.msk.f32.mxu1 %vm5278_vm3, %v5164_v19  ;;  %v7433_v19 = vld [vmem:[%s11322_s8 + $0x88] sm:$0xff]  ;;  %v7447_v22 = vld [vmem:[%s11323_s9 + $0x58] sm:$0xff] }
 0x6dc   : > { %8828 = vmatmul.mubr.msk.f32.vlgmr.msra.gmra.mxu0 %vm5278_vm3, %v8819_v58  ;;  %8838 = vmatmul.mubr.msk.f32.vlgmr.msra.gmra.mxu1 %vm5278_vm3, %v8781_v63  ;;  %v8822_v25 = vpop.f32.mrf.mxu1  ;;  %v7432_v58 = vld [vmem:[%s11322_s8 + $0x80] sm:$0xff] }
 0x6dd   : > { %8844 = vmatpush3.msra.mxu0 %v10716_v49  ;;  %8882 = vmatpush3.msra.mxu1 %v7417_v3  ;;  %v8784_v11 = vpop.f32.mrf.mxu0 }
 0x6de   : > { %8845 = vmatprep.subr.mxu0 %v10719_v46  ;;  %8883 = vmatprep.subr.mxu1 %v7416_v47  ;;  %v5266_v33 = vpop.f32.mrf.mxu1 }
 0x6df   : > { %8846 = vmatpush3.msra.mxu0 %v10719_v46  ;;  %8884 = vmatpush3.msra.mxu1 %v7416_v47  ;;  %v5174_v15 = vpop.f32.mrf.mxu0  ;;  %v7434_v47 = vld [vmem:[%s11322_s8 + $0x90] sm:$0xff] }
 0x6e0   : > { %8847 = vmatprep.subr.mxu0 %v10726_v28  ;;  %8891 = vmatprep.subr.mxu1 %v10716_v49 }
 0x6e1   : > { %8848 = vmatpush3.msra.mxu0 %v10726_v28  ;;  %8830 = vmatprep.mubr.msk.f32.mxu0 %vm5278_vm3, %v5266_v33 }
 0x6e2   : > { %8849 = vmatprep.subr.mxu0 %v10733_v20  ;;  %8840 = vmatprep.mubr.msk.f32.mxu1 %vm5278_vm3, %v5174_v15 }
 0x6e3   : > { %8850 = vmatpush3.msra.mxu0 %v10733_v20  ;;  %8841 = vmatmul.mubr.msk.f32.gmra.mxu1 %vm5278_vm3, %v8784_v11  ;;  %v7435_v11 = vld [vmem:[%s11322_s8 + $0x98] sm:$0xff] }
 0x6e4   : > { %8851 = vmatprep.subr.mxu0 %v10740_v52  ;;  %8831 = vmatmul.mubr.msk.f32.gmra.mxu0 %vm5278_vm3, %v8822_v25  ;;  %v7446_v25 = vld [vmem:[%s11323_s9 + $0x50] sm:$0xff] }
 0x6e5   : > { %8852 = vmatpush3.msra.mxu0 %v10740_v52  ;;  %8875 = vmatprep.mubr.f32.mxu0 %v7412_v41 }
 0x6e6   : > { %8853 = vmatprep.subr.mxu0 %v10748_v24 }
 0x6e7   : > { %8854 = vmatpush3.msra.mxu0 %v10748_v24 }
 0x6e8   : > { %8855 = vmatprep.subr.mxu0 %v10757_v39 }
 0x6e9   : > { %8856 = vmatpush3.msra.mxu0 %v10757_v39 }
 0x6ea   : > { %8857 = vmatprep.subr.mxu0 %v10764_v32 }
 0x6eb   : > { %8858 = vmatpush3.msra.mxu0 %v10764_v32 }
 0x6ec   : > { %8859 = vmatprep.subr.mxu0 %v10772_v45 }
 0x6ed   : > { %8860 = vmatpush3.msra.mxu0 %v10772_v45 }
 0x6ee   : > { %8861 = vmatprep.subr.mxu0 %v10780_v53 }
 0x6ef   : > { %8862 = vmatpush3.msra.mxu0 %v10780_v53 }
 0x6f0   : > { %8863 = vmatprep.subr.mxu0 %v10788_v55 }
 0x6f1   : > { %8864 = vmatpush3.msra.mxu0 %v10788_v55 }
 0x6f2   : > { %8865 = vmatprep.subr.mxu0 %v10796_v29 }
 0x6f3   : > { %8866 = vmatpush3.msra.mxu0 %v10796_v29 }
 0x6f4   : > { %8867 = vmatprep.subr.mxu0 %v10804_v10 }
 0x6f5   : > { %8868 = vmatpush3.msra.mxu0 %v10804_v10 }
 0x6f6   : > { %8869 = vmatprep.subr.mxu0 %v10812_v4 }
 0x6f7   : > { %8870 = vmatpush3.msra.mxu0 %v10812_v4 }
 0x6f8   : > { %8871 = vmatprep.subr.mxu0 %v10818_v51 }
 0x6f9   : > { %8872 = vmatpush3.msra.mxu0 %v10818_v51 }
 0x6fa   : > { %8873 = vmatprep.subr.mxu0 %v10824_v1 }
 0x6fb   : > { %8874 = vmatpush3.msra.mxu0 %v10824_v1 }
 0x6fc   : > { %8876 = vmatmul.mubr.f32.vlgmr.msra.gmra.mxu0 %v7413_v54  ;;  %8929 = vmatprep.subr.mxu0 %v7427_v56 }
 0x6fd   : > { %8930 = vmatpush3.msra.mxu0 %v7427_v56  ;;  %8878 = vmatprep.mubr.f32.mxu0 %v7414_v44 }
 0x6fe   : > { %8931 = vmatprep.subr.mxu0 %v7426_v26 }
 0x6ff   : > { %8932 = vmatpush3.msra.mxu0 %v7426_v26 }
 0x700   : > { %8879 = vmatmul.mubr.f32.gmra.mxu0 %v7415_v27  ;;  %8939 = vmatprep.subr.mxu0 %v10716_v49 }
 0x79c   : > { %v8829_v31 = vpop.f32.mrf.mxu0  ;;  %v8839_v8 = vpop.f32.mrf.mxu1 }
 0x79d   : > { %v10930_v38 = vadd.f32 %v8839_v8, %v8829_v31 }
 0x79e   : > { %v5357_v13 = vpop.f32.mrf.mxu0  ;;  %v5454_v23 = vpop.f32.mrf.mxu1 }
 0x79f   : > { %v10932_v37 = vadd.f32 %v5454_v23, %v5357_v13  ;;  %v7442_v23 = vld [vmem:[%s11322_s8 + $0xa0] sm:$0xff] }
 0x7a3   : > { %v8842_v21 = vpop.f32.mrf.mxu1 }
 0x7a4   : > { %v8832_v60 = vpop.f32.mrf.mxu0 }
 0x7a5   : > { %v10934_v7 = vadd.f32 %v8842_v21, %v8832_v60  ;;  %v5464_v2 = vpop.f32.mrf.mxu1  ;;  %v7457_v60 = vld [vmem:[%s11323_s9 + $0x68] sm:$0xff]  ;;  %v7444_v21 = vld [vmem:[%s11322_s8 + $0xb0] sm:$0xff] }
 0x7a6   : > { %v5367_v35 = vpop.f32.mrf.mxu0 }
 0x7a7   : > { %v5465_v9 = vadd.f32 %v5464_v2, %v5367_v35  ;;  %v7445_v35 = vld [vmem:[%s11322_s8 + $0xb8] sm:$0xff] }
 0x7bc   : > { %v8877_v5 = vpop.f32.mrf.mxu0 }
 0x7be   : > { %v5544_v48 = vpop.f32.mrf.mxu0 }
 0x7bf   : > { %8885 = vmatprep.mubr.msk.f32.mxu1 %vm5278_vm3, %v5544_v48 }
 0x7c0   : > { %v8880_v42 = vpop.f32.mrf.mxu0  ;;  %8886 = vmatmul.mubr.msk.f32.vlgmr.msra.gmra.mxu1 %vm5278_vm3, %v8877_v5 }
 0x7c1   : > { %8892 = vmatpush3.msra.mxu1 %v10716_v49 }
 0x7c2   : > { %8893 = vmatprep.subr.mxu1 %v10719_v46  ;;  %v5554_v0 = vpop.f32.mrf.mxu0 }
 0x7c3   : > { %8894 = vmatpush3.msra.mxu1 %v10719_v46  ;;  %8888 = vmatprep.mubr.msk.f32.mxu1 %vm5278_vm3, %v5554_v0 }
 0x7c4   : > { %8895 = vmatprep.subr.mxu1 %v10726_v28  ;;  %8889 = vmatmul.mubr.msk.f32.gmra.mxu1 %vm5278_vm3, %v8880_v42 }
 0x7c5   : > { %8896 = vmatpush3.msra.mxu1 %v10726_v28  ;;  %8923 = vmatprep.mubr.f32.mxu1 %v7422_v18 }
 0x7c6   : > { %8897 = vmatprep.subr.mxu1 %v10733_v20 }
 0x7c7   : > { %8898 = vmatpush3.msra.mxu1 %v10733_v20 }
 0x7c8   : > { %8899 = vmatprep.subr.mxu1 %v10740_v52 }
 0x7c9   : > { %8900 = vmatpush3.msra.mxu1 %v10740_v52 }
 0x7ca   : > { %8901 = vmatprep.subr.mxu1 %v10748_v24 }
 0x7cb   : > { %8902 = vmatpush3.msra.mxu1 %v10748_v24 }
 0x7cc   : > { %8903 = vmatprep.subr.mxu1 %v10757_v39 }
 0x7cd   : > { %8904 = vmatpush3.msra.mxu1 %v10757_v39 }
 0x7ce   : > { %8905 = vmatprep.subr.mxu1 %v10764_v32 }
 0x7cf   : > { %8906 = vmatpush3.msra.mxu1 %v10764_v32 }
 0x7d0   : > { %8907 = vmatprep.subr.mxu1 %v10772_v45 }
 0x7d1   : > { %8908 = vmatpush3.msra.mxu1 %v10772_v45 }
 0x7d2   : > { %8909 = vmatprep.subr.mxu1 %v10780_v53 }
 0x7d3   : > { %8910 = vmatpush3.msra.mxu1 %v10780_v53 }
 0x7d4   : > { %8911 = vmatprep.subr.mxu1 %v10788_v55 }
 0x7d5   : > { %8912 = vmatpush3.msra.mxu1 %v10788_v55 }
 0x7d6   : > { %8913 = vmatprep.subr.mxu1 %v10796_v29 }
 0x7d7   : > { %8914 = vmatpush3.msra.mxu1 %v10796_v29 }
 0x7d8   : > { %8915 = vmatprep.subr.mxu1 %v10804_v10 }
 0x7d9   : > { %8916 = vmatpush3.msra.mxu1 %v10804_v10 }
 0x7da   : > { %8917 = vmatprep.subr.mxu1 %v10812_v4 }
 0x7db   : > { %8918 = vmatpush3.msra.mxu1 %v10812_v4 }
 0x7dc   : > { %8919 = vmatprep.subr.mxu1 %v10818_v51 }
 0x7dd   : > { %8920 = vmatpush3.msra.mxu1 %v10818_v51 }
 0x7de   : > { %8921 = vmatprep.subr.mxu1 %v10824_v1 }
 0x7df   : > { %8922 = vmatpush3.msra.mxu1 %v10824_v1 }
 0x7e0   : > { %8924 = vmatmul.mubr.f32.vlgmr.msra.gmra.mxu1 %v7423_v43  ;;  %8977 = vmatprep.subr.mxu1 %v7437_v36 }
 0x7e1   : > { %8978 = vmatpush3.msra.mxu1 %v7437_v36  ;;  %8926 = vmatprep.mubr.f32.mxu1 %v7424_v16 }
 0x7e2   : > { %8979 = vmatprep.subr.mxu1 %v7436_v50 }
 0x7e3   : > { %8980 = vmatpush3.msra.mxu1 %v7436_v50 }
 0x7e4   : > { %8927 = vmatmul.mubr.f32.gmra.mxu1 %v7425_v34  ;;  %8987 = vmatprep.subr.mxu1 %v10716_v49 }
 0x880   : > { %v8887_v14 = vpop.f32.mrf.mxu1 }
 0x881   : > { %v10991_v59 = vadd.f32 %v8887_v14, %v10930_v38 }
 0x882   : > { %v5644_v62 = vpop.f32.mrf.mxu1 }
 0x883   : > { %v10994_v12 = vadd.f32 %v5644_v62, %v10932_v37  ;;  %v7443_v37 = vld [vmem:[%s11322_s8 + $0xa8] sm:$0xff] }
 0x884   : > { %v8890_v6 = vpop.f32.mrf.mxu1  ;;  %v7453_v62 = vld [vmem:[%s11322_s8 + $0xc8] sm:$0xff] }
 0x885   : > { %v5666_v40 = vadd.f32 %v8890_v6, %v10934_v7  ;;  %v7456_v7 = vld [vmem:[%s11323_s9 + $0x60] sm:$0xff]  ;;  %v7454_v6 = vld [vmem:[%s11322_s8 + $0xd0] sm:$0xff] }
 0x886   : > { %v5654_v30 = vpop.f32.mrf.mxu1 }
 0x887   : > { %v5665_v57 = vadd.f32 %v5654_v30, %v5465_v9  ;;  %v7466_v9 = vld [vmem:[%s11323_s9 + $0x70] sm:$0xff] }
 0x8a0   : > { %v8925_v61 = vpop.f32.mrf.mxu1 }
 0x8a2   : > { %v5738_v17 = vpop.f32.mrf.mxu1 }
 0x8a3   : > { %8933 = vmatprep.mubr.msk.f32.mxu0 %vm5278_vm3, %v5738_v17 }
 0x8a4   : > { %v8928_v3 = vpop.f32.mrf.mxu1  ;;  %8934 = vmatmul.mubr.msk.f32.vlgmr.msra.gmra.mxu0 %vm5278_vm3, %v8925_v61 }
 0x8a5   : > { %8940 = vmatpush3.msra.mxu0 %v10716_v49 }
 0x8a6   : > { %8941 = vmatprep.subr.mxu0 %v10719_v46  ;;  %v5748_v63 = vpop.f32.mrf.mxu1 }
 0x8a7   : > { %8942 = vmatpush3.msra.mxu0 %v10719_v46  ;;  %8936 = vmatprep.mubr.msk.f32.mxu0 %vm5278_vm3, %v5748_v63 }
 0x8a8   : > { %8943 = vmatprep.subr.mxu0 %v10726_v28  ;;  %8937 = vmatmul.mubr.msk.f32.gmra.mxu0 %vm5278_vm3, %v8928_v3 }
 0x8a9   : > { %8944 = vmatpush3.msra.mxu0 %v10726_v28  ;;  %8971 = vmatprep.mubr.f32.mxu0 %v7432_v58 }
 0x8aa   : > { %8945 = vmatprep.subr.mxu0 %v10733_v20 }
 0x8ab   : > { %8946 = vmatpush3.msra.mxu0 %v10733_v20 }
 0x8ac   : > { %8947 = vmatprep.subr.mxu0 %v10740_v52 }
 0x8ad   : > { %8948 = vmatpush3.msra.mxu0 %v10740_v52 }
 0x8ae   : > { %8949 = vmatprep.subr.mxu0 %v10748_v24 }
 0x8af   : > { %8950 = vmatpush3.msra.mxu0 %v10748_v24 }
 0x8b0   : > { %8951 = vmatprep.subr.mxu0 %v10757_v39 }
 0x8b1   : > { %8952 = vmatpush3.msra.mxu0 %v10757_v39 }
 0x8b2   : > { %8953 = vmatprep.subr.mxu0 %v10764_v32 }
 0x8b3   : > { %8954 = vmatpush3.msra.mxu0 %v10764_v32 }
 0x8b4   : > { %8955 = vmatprep.subr.mxu0 %v10772_v45 }
 0x8b5   : > { %8956 = vmatpush3.msra.mxu0 %v10772_v45 }
 0x8b6   : > { %8957 = vmatprep.subr.mxu0 %v10780_v53 }
 0x8b7   : > { %8958 = vmatpush3.msra.mxu0 %v10780_v53 }
 0x8b8   : > { %8959 = vmatprep.subr.mxu0 %v10788_v55 }
 0x8b9   : > { %8960 = vmatpush3.msra.mxu0 %v10788_v55 }
 0x8ba   : > { %8961 = vmatprep.subr.mxu0 %v10796_v29 }
 0x8bb   : > { %8962 = vmatpush3.msra.mxu0 %v10796_v29 }
 0x8bc   : > { %8963 = vmatprep.subr.mxu0 %v10804_v10 }
 0x8bd   : > { %8964 = vmatpush3.msra.mxu0 %v10804_v10 }
 0x8be   : > { %8965 = vmatprep.subr.mxu0 %v10812_v4 }
 0x8bf   : > { %8966 = vmatpush3.msra.mxu0 %v10812_v4 }
 0x8c0   : > { %8967 = vmatprep.subr.mxu0 %v10818_v51 }
 0x8c1   : > { %8968 = vmatpush3.msra.mxu0 %v10818_v51 }
 0x8c2   : > { %8969 = vmatprep.subr.mxu0 %v10824_v1 }
 0x8c3   : > { %8970 = vmatpush3.msra.mxu0 %v10824_v1 }
 0x8c4   : > { %8972 = vmatmul.mubr.f32.vlgmr.msra.gmra.mxu0 %v7433_v19  ;;  %9025 = vmatprep.subr.mxu0 %v7447_v22 }
 0x8c5   : > { %9026 = vmatpush3.msra.mxu0 %v7447_v22  ;;  %8974 = vmatprep.mubr.f32.mxu0 %v7434_v47 }
 0x8c6   : > { %9027 = vmatprep.subr.mxu0 %v7446_v25 }
 0x8c7   : > { %9028 = vmatpush3.msra.mxu0 %v7446_v25 }
 0x8c8   : > { %8975 = vmatmul.mubr.f32.gmra.mxu0 %v7435_v11  ;;  %9035 = vmatprep.subr.mxu0 %v10716_v49 }
 0x964   : > { %v8935_v33 = vpop.f32.mrf.mxu0 }
 0x965   : > { %v5858_v15 = vadd.f32 %v8935_v33, %v10991_v59  ;;  %v7452_v59 = vld [vmem:[%s11322_s8 + $0xc0] sm:$0xff] }
 0x966   : > { %v5838_v41 = vpop.f32.mrf.mxu0  ;;  %v7462_v33 = vld [vmem:[%s11322_s8 + $0xe0] sm:$0xff] }
 0x967   : > { %v5857_v54 = vadd.f32 %v5838_v41, %v10994_v12  ;;  %v7467_v12 = vld [vmem:[%s11323_s9 + $0x78] sm:$0xff]  ;;  %v7464_v41 = vld [vmem:[%s11322_s8 + $0xf0] sm:$0xff] }
 0x968   : > { %v8938_v56 = vpop.f32.mrf.mxu0 }
 0x969   : > { %v5860_v44 = vadd.f32 %v8938_v56, %v5666_v40  ;;  %v7455_v40 = vld [vmem:[%s11322_s8 + $0xd8] sm:$0xff] }
 0x96a   : > { %v5848_v26 = vpop.f32.mrf.mxu0 }
 0x96b   : > { %v5859_v27 = vadd.f32 %v5848_v26, %v5665_v57 }
 0x984   : > { %v8973_v31 = vpop.f32.mrf.mxu0 }
 0x986   : > { %v5932_v8 = vpop.f32.mrf.mxu0 }
 0x987   : > { %8981 = vmatprep.mubr.msk.f32.mxu1 %vm5278_vm3, %v5932_v8 }
 0x988   : > { %v8976_v38 = vpop.f32.mrf.mxu0  ;;  %8982 = vmatmul.mubr.msk.f32.vlgmr.msra.gmra.mxu1 %vm5278_vm3, %v8973_v31 }
 0x989   : > { %8988 = vmatpush3.msra.mxu1 %v10716_v49 }
 0x98a   : > { %8989 = vmatprep.subr.mxu1 %v10719_v46  ;;  %v5942_v13 = vpop.f32.mrf.mxu0 }
 0x98b   : > { %8990 = vmatpush3.msra.mxu1 %v10719_v46  ;;  %8984 = vmatprep.mubr.msk.f32.mxu1 %vm5278_vm3, %v5942_v13 }
 0x98c   : > { %8991 = vmatprep.subr.mxu1 %v10726_v28  ;;  %8985 = vmatmul.mubr.msk.f32.gmra.mxu1 %vm5278_vm3, %v8976_v38 }
 0x98d   : > { %8992 = vmatpush3.msra.mxu1 %v10726_v28  ;;  %9019 = vmatprep.mubr.f32.mxu1 %v7442_v23 }
 0x98e   : > { %8993 = vmatprep.subr.mxu1 %v10733_v20 }
 0x98f   : > { %8994 = vmatpush3.msra.mxu1 %v10733_v20 }
 0x990   : > { %8995 = vmatprep.subr.mxu1 %v10740_v52 }
 0x991   : > { %8996 = vmatpush3.msra.mxu1 %v10740_v52 }
 0x992   : > { %8997 = vmatprep.subr.mxu1 %v10748_v24 }
 0x993   : > { %8998 = vmatpush3.msra.mxu1 %v10748_v24 }
 0x994   : > { %8999 = vmatprep.subr.mxu1 %v10757_v39 }
 0x995   : > { %9000 = vmatpush3.msra.mxu1 %v10757_v39 }
 0x996   : > { %9001 = vmatprep.subr.mxu1 %v10764_v32 }
 0x997   : > { %9002 = vmatpush3.msra.mxu1 %v10764_v32 }
 0x998   : > { %9003 = vmatprep.subr.mxu1 %v10772_v45 }
 0x999   : > { %9004 = vmatpush3.msra.mxu1 %v10772_v45 }
 0x99a   : > { %9005 = vmatprep.subr.mxu1 %v10780_v53 }
 0x99b   : > { %9006 = vmatpush3.msra.mxu1 %v10780_v53 }
 0x99c   : > { %9007 = vmatprep.subr.mxu1 %v10788_v55 }
 0x99d   : > { %9008 = vmatpush3.msra.mxu1 %v10788_v55 }
 0x99e   : > { %9009 = vmatprep.subr.mxu1 %v10796_v29 }
 0x99f   : > { %9010 = vmatpush3.msra.mxu1 %v10796_v29 }
 0x9a0   : > { %9011 = vmatprep.subr.mxu1 %v10804_v10 }
 0x9a1   : > { %9012 = vmatpush3.msra.mxu1 %v10804_v10 }
 0x9a2   : > { %9013 = vmatprep.subr.mxu1 %v10812_v4 }
 0x9a3   : > { %9014 = vmatpush3.msra.mxu1 %v10812_v4 }
 0x9a4   : > { %9015 = vmatprep.subr.mxu1 %v10818_v51 }
 0x9a5   : > { %9016 = vmatpush3.msra.mxu1 %v10818_v51 }
 0x9a6   : > { %9017 = vmatprep.subr.mxu1 %v10824_v1 }
 0x9a7   : > { %9018 = vmatpush3.msra.mxu1 %v10824_v1 }
 0x9a8   : > { %9020 = vmatmul.mubr.f32.vlgmr.msra.gmra.mxu1 %v7443_v37  ;;  %9073 = vmatprep.subr.mxu1 %v7457_v60 }
 0x9a9   : > { %9074 = vmatpush3.msra.mxu1 %v7457_v60  ;;  %9022 = vmatprep.mubr.f32.mxu1 %v7444_v21 }
 0x9aa   : > { %9075 = vmatprep.subr.mxu1 %v7456_v7 }
 0x9ab   : > { %9076 = vmatpush3.msra.mxu1 %v7456_v7  ;;  %v7472_v7 = vld [vmem:[%s11322_s8 + $0x100] sm:$0xff] }
 0x9ac   : > { %9023 = vmatmul.mubr.f32.gmra.mxu1 %v7445_v35  ;;  %9083 = vmatprep.subr.mxu1 %v10716_v49 }
 0xa48   : > { %v8983_v5 = vpop.f32.mrf.mxu1 }
 0xa49   : > { %v6052_v48 = vadd.f32 %v8983_v5, %v5858_v15  ;;  %v7463_v15 = vld [vmem:[%s11322_s8 + $0xe8] sm:$0xff] }
 0xa4a   : > { %v6032_v42 = vpop.f32.mrf.mxu1 }
 0xa4b   : > { %v6051_v0 = vadd.f32 %v6032_v42, %v5857_v54  ;;  %v7465_v54 = vld [vmem:[%s11322_s8 + $0xf8] sm:$0xff]  ;;  %v6839_v42 = vpop.permute.xlu1 %6838 }
 0xa4c   : > { %v8986_v18 = vpop.f32.mrf.mxu1 }
 0xa4d   : > { %v6054_v43 = vadd.f32 %v8986_v18, %v5860_v44 }
 0xa4e   : > { %v6042_v36 = vpop.f32.mrf.mxu1 }
 0xa4f   : > { %v6053_v16 = vadd.f32 %v6042_v36, %v5859_v27 }
 0xa68   : > { %v9021_v50 = vpop.f32.mrf.mxu1 }
 0xa6a   : > { %v6126_v34 = vpop.f32.mrf.mxu1 }
 0xa6b   : > { %9029 = vmatprep.mubr.msk.f32.mxu0 %vm5278_vm3, %v6126_v34 }
 0xa6c   : > { %v9024_v2 = vpop.f32.mrf.mxu1  ;;  %9030 = vmatmul.mubr.msk.f32.vlgmr.msra.gmra.mxu0 %vm5278_vm3, %v9021_v50 }
 0xa6d   : > { %9036 = vmatpush3.msra.mxu0 %v10716_v49 }
 0xa6e   : > { %9037 = vmatprep.subr.mxu0 %v10719_v46  ;;  %v6136_v14 = vpop.f32.mrf.mxu1 }
 0xa6f   : > { %9038 = vmatpush3.msra.mxu0 %v10719_v46  ;;  %9032 = vmatprep.mubr.msk.f32.mxu0 %vm5278_vm3, %v6136_v14 }
 0xa70   : > { %9039 = vmatprep.subr.mxu0 %v10726_v28  ;;  %9033 = vmatmul.mubr.msk.f32.gmra.mxu0 %vm5278_vm3, %v9024_v2 }
 0xa71   : > { %9040 = vmatpush3.msra.mxu0 %v10726_v28  ;;  %9067 = vmatprep.mubr.f32.mxu0 %v7452_v59 }
 0xa72   : > { %9041 = vmatprep.subr.mxu0 %v10733_v20 }
 0xa73   : > { %9042 = vmatpush3.msra.mxu0 %v10733_v20 }
 0xa74   : > { %9043 = vmatprep.subr.mxu0 %v10740_v52 }
 0xa75   : > { %9044 = vmatpush3.msra.mxu0 %v10740_v52 }
 0xa76   : > { %9045 = vmatprep.subr.mxu0 %v10748_v24 }
 0xa77   : > { %9046 = vmatpush3.msra.mxu0 %v10748_v24 }
 0xa78   : > { %9047 = vmatprep.subr.mxu0 %v10757_v39 }
 0xa79   : > { %9048 = vmatpush3.msra.mxu0 %v10757_v39 }
 0xa7a   : > { %9049 = vmatprep.subr.mxu0 %v10764_v32 }
 0xa7b   : > { %9050 = vmatpush3.msra.mxu0 %v10764_v32 }
 0xa7c   : > { %9051 = vmatprep.subr.mxu0 %v10772_v45 }
 0xa7d   : > { %9052 = vmatpush3.msra.mxu0 %v10772_v45 }
 0xa7e   : > { %9053 = vmatprep.subr.mxu0 %v10780_v53 }
 0xa7f   : > { %9054 = vmatpush3.msra.mxu0 %v10780_v53 }
 0xa80   : > { %9055 = vmatprep.subr.mxu0 %v10788_v55 }
 0xa81   : > { %9056 = vmatpush3.msra.mxu0 %v10788_v55 }
 0xa82   : > { %9057 = vmatprep.subr.mxu0 %v10796_v29 }
 0xa83   : > { %9058 = vmatpush3.msra.mxu0 %v10796_v29 }
 0xa84   : > { %9059 = vmatprep.subr.mxu0 %v10804_v10 }
 0xa85   : > { %9060 = vmatpush3.msra.mxu0 %v10804_v10 }
 0xa86   : > { %9061 = vmatprep.subr.mxu0 %v10812_v4 }
 0xa87   : > { %9062 = vmatpush3.msra.mxu0 %v10812_v4 }
 0xa88   : > { %9063 = vmatprep.subr.mxu0 %v10818_v51 }
 0xa89   : > { %9064 = vmatpush3.msra.mxu0 %v10818_v51 }
 0xa8a   : > { %9065 = vmatprep.subr.mxu0 %v10824_v1 }
 0xa8b   : > { %9066 = vmatpush3.msra.mxu0 %v10824_v1 }
 0xa8c   : > { %9068 = vmatmul.mubr.f32.vlgmr.msra.gmra.mxu0 %v7453_v62  ;;  %9121 = vmatprep.subr.mxu0 %v7467_v12 }
 0xa8d   : > { %9122 = vmatpush3.msra.mxu0 %v7467_v12  ;;  %9070 = vmatprep.mubr.f32.mxu0 %v7454_v6 }
 0xa8e   : > { %9123 = vmatprep.subr.mxu0 %v7466_v9 }
 0xa8f   : > { %9124 = vmatpush3.msra.mxu0 %v7466_v9 }
 0xa90   : > { %9071 = vmatmul.mubr.f32.gmra.mxu0 %v7455_v40  ;;  %9131 = vmatprep.subr.mxu0 %v10716_v49 }
 0xb2c   : > { %v9031_v30 = vpop.f32.mrf.mxu0 }
 0xb2d   : > { %v6246_v57 = vadd.f32 %v9031_v30, %v6052_v48 }
 0xb2e   : > { %v6226_v61 = vpop.f32.mrf.mxu0 }
 0xb2f   : > { %v6245_v17 = vadd.f32 %v6226_v61, %v6051_v0 }
 0xb30   : > { %v9034_v3 = vpop.f32.mrf.mxu0 }
 0xb31   : > { %v6248_v63 = vadd.f32 %v9034_v3, %v6054_v43 }
 0xb32   : > { %v6236_v58 = vpop.f32.mrf.mxu0 }
 0xb33   : > { %v6247_v19 = vadd.f32 %v6236_v58, %v6053_v16 }
 0xb4c   : > { %v9069_v22 = vpop.f32.mrf.mxu0 }
 0xb4e   : > { %v6320_v47 = vpop.f32.mrf.mxu0 }
 0xb4f   : > { %9077 = vmatprep.mubr.msk.f32.mxu1 %vm5278_vm3, %v6320_v47 }
 0xb50   : > { %v9072_v25 = vpop.f32.mrf.mxu0  ;;  %9078 = vmatmul.mubr.msk.f32.vlgmr.msra.gmra.mxu1 %vm5278_vm3, %v9069_v22 }
 0xb51   : > { %9084 = vmatpush3.msra.mxu1 %v10716_v49 }
 0xb52   : > { %9085 = vmatprep.subr.mxu1 %v10719_v46  ;;  %v6330_v11 = vpop.f32.mrf.mxu0 }
 0xb53   : > { %9086 = vmatpush3.msra.mxu1 %v10719_v46  ;;  %9080 = vmatprep.mubr.msk.f32.mxu1 %vm5278_vm3, %v6330_v11 }
 0xb54   : > { %9087 = vmatprep.subr.mxu1 %v10726_v28  ;;  %9081 = vmatmul.mubr.msk.f32.gmra.mxu1 %vm5278_vm3, %v9072_v25 }
 0xb55   : > { %9088 = vmatpush3.msra.mxu1 %v10726_v28  ;;  %9115 = vmatprep.mubr.f32.mxu1 %v7462_v33 }
 0xb56   : > { %9089 = vmatprep.subr.mxu1 %v10733_v20 }
 0xb57   : > { %9090 = vmatpush3.msra.mxu1 %v10733_v20 }
 0xb58   : > { %9091 = vmatprep.subr.mxu1 %v10740_v52 }
 0xb59   : > { %9092 = vmatpush3.msra.mxu1 %v10740_v52 }
 0xb5a   : > { %9093 = vmatprep.subr.mxu1 %v10748_v24 }
 0xb5b   : > { %9094 = vmatpush3.msra.mxu1 %v10748_v24 }
 0xb5c   : > { %9095 = vmatprep.subr.mxu1 %v10757_v39 }
 0xb5d   : > { %9096 = vmatpush3.msra.mxu1 %v10757_v39 }
 0xb5e   : > { %9097 = vmatprep.subr.mxu1 %v10764_v32 }
 0xb5f   : > { %9098 = vmatpush3.msra.mxu1 %v10764_v32 }
 0xb60   : > { %9099 = vmatprep.subr.mxu1 %v10772_v45 }
 0xb61   : > { %9100 = vmatpush3.msra.mxu1 %v10772_v45 }
 0xb62   : > { %9101 = vmatprep.subr.mxu1 %v10780_v53 }
 0xb63   : > { %9102 = vmatpush3.msra.mxu1 %v10780_v53 }
 0xb64   : > { %9103 = vmatprep.subr.mxu1 %v10788_v55 }
 0xb65   : > { %9104 = vmatpush3.msra.mxu1 %v10788_v55 }
 0xb66   : > { %9105 = vmatprep.subr.mxu1 %v10796_v29 }
 0xb67   : > { %9106 = vmatpush3.msra.mxu1 %v10796_v29 }
 0xb68   : > { %9107 = vmatprep.subr.mxu1 %v10804_v10 }
 0xb69   : > { %9108 = vmatpush3.msra.mxu1 %v10804_v10 }
 0xb6a   : > { %9109 = vmatprep.subr.mxu1 %v10812_v4 }
 0xb6b   : > { %9110 = vmatpush3.msra.mxu1 %v10812_v4 }
 0xb6c   : > { %9111 = vmatprep.subr.mxu1 %v10818_v51 }
 0xb6d   : > { %9112 = vmatpush3.msra.mxu1 %v10818_v51 }
 0xb6e   : > { %9113 = vmatprep.subr.mxu1 %v10824_v1 }
 0xb6f   : > { %9114 = vmatpush3.msra.mxu1 %v10824_v1 }
 0xb70   : > { %9116 = vmatmul.mubr.f32.vlgmr.msra.gmra.mxu1 %v7463_v15 }
 0xb71   : > { %9118 = vmatprep.mubr.f32.mxu1 %v7464_v41 }
 0xb74   : > { %9119 = vmatmul.mubr.f32.gmra.mxu1 %v7465_v54 }
 0xc10   : > { %v9079_v56 = vpop.f32.mrf.mxu1 }
 0xc11   : > { %v6440_v44 = vadd.f32 %v9079_v56, %v6246_v57 }
 0xc12   : > { %v6420_v26 = vpop.f32.mrf.mxu1 }
 0xc13   : > { %v6439_v27 = vadd.f32 %v6420_v26, %v6245_v17 }
 0xc14   : > { %v9082_v31 = vpop.f32.mrf.mxu1 }
 0xc15   : > { %v6442_v8 = vadd.f32 %v9082_v31, %v6248_v63 }
 0xc16   : > { %v6430_v38 = vpop.f32.mrf.mxu1 }
 0xc17   : > { %v6441_v13 = vadd.f32 %v6430_v38, %v6247_v19 }
 0xc30   : > { %v9117_v23 = vpop.f32.mrf.mxu1 }
 0xc32   : > { %v6514_v37 = vpop.f32.mrf.mxu1 }
 0xc33   : > { %9125 = vmatprep.mubr.msk.f32.mxu0 %vm5278_vm3, %v6514_v37 }
 0xc34   : > { %v9120_v60 = vpop.f32.mrf.mxu1  ;;  %9126 = vmatmul.mubr.msk.f32.vlgmr.msra.gmra.mxu0 %vm5278_vm3, %v9117_v23 }
 0xc35   : > { %9132 = vmatpush3.msra.mxu0 %v10716_v49  ;;  %v7473_v49 = vld [vmem:[%s11322_s8 + $0x108] sm:$0xff] }
 0xc36   : > { %9133 = vmatprep.subr.mxu0 %v10719_v46  ;;  %v6524_v21 = vpop.f32.mrf.mxu1 }
 0xc37   : > { %9134 = vmatpush3.msra.mxu0 %v10719_v46  ;;  %9128 = vmatprep.mubr.msk.f32.mxu0 %vm5278_vm3, %v6524_v21  ;;  %v7474_v46 = vld [vmem:[%s11322_s8 + $0x110] sm:$0xff] }
 0xc38   : > { %9135 = vmatprep.subr.mxu0 %v10726_v28  ;;  %9129 = vmatmul.mubr.msk.f32.gmra.mxu0 %vm5278_vm3, %v9120_v60 }
 0xc39   : > { %9136 = vmatpush3.msra.mxu0 %v10726_v28  ;;  %9163 = vmatprep.mubr.f32.mxu0 %v7472_v7  ;;  %v7475_v28 = vld [vmem:[%s11322_s8 + $0x118] sm:$0xff] }
 0xc3a   : > { %9137 = vmatprep.subr.mxu0 %v10733_v20 }
 0xc3b   : > { %9138 = vmatpush3.msra.mxu0 %v10733_v20  ;;  %v7477_v20 = vld [vmem:[%s11323_s9 + $0x88] sm:$0xff] }
 0xc3c   : > { %9139 = vmatprep.subr.mxu0 %v10740_v52  ;;  %9169 = vmatprep.subr.mxu1 %v7477_v20 }
 0xc3d   : > { %9140 = vmatpush3.msra.mxu0 %v10740_v52  ;;  %9170 = vmatpush3.msra.mxu1 %v7477_v20  ;;  %v7476_v52 = vld [vmem:[%s11323_s9 + $0x80] sm:$0xff] }
 0xc3e   : > { %9141 = vmatprep.subr.mxu0 %v10748_v24  ;;  %9171 = vmatprep.subr.mxu1 %v7476_v52 }
 0xc3f   : > { %9142 = vmatpush3.msra.mxu0 %v10748_v24  ;;  %9172 = vmatpush3.msra.mxu1 %v7476_v52 }
 0xc40   : > { %9143 = vmatprep.subr.mxu0 %v10757_v39 }
 0xc41   : > { %9144 = vmatpush3.msra.mxu0 %v10757_v39 }
 0xc42   : > { %9145 = vmatprep.subr.mxu0 %v10764_v32 }
 0xc43   : > { %9146 = vmatpush3.msra.mxu0 %v10764_v32 }
 0xc44   : > { %9147 = vmatprep.subr.mxu0 %v10772_v45 }
 0xc45   : > { %9148 = vmatpush3.msra.mxu0 %v10772_v45 }
 0xc46   : > { %9149 = vmatprep.subr.mxu0 %v10780_v53 }
 0xc47   : > { %9150 = vmatpush3.msra.mxu0 %v10780_v53 }
 0xc48   : > { %9151 = vmatprep.subr.mxu0 %v10788_v55 }
 0xc49   : > { %9152 = vmatpush3.msra.mxu0 %v10788_v55 }
 0xc4a   : > { %9153 = vmatprep.subr.mxu0 %v10796_v29 }
 0xc4b   : > { %9154 = vmatpush3.msra.mxu0 %v10796_v29 }
 0xc4c   : > { %9155 = vmatprep.subr.mxu0 %v10804_v10 }
 0xc4d   : > { %9156 = vmatpush3.msra.mxu0 %v10804_v10 }
 0xc4e   : > { %9157 = vmatprep.subr.mxu0 %v10812_v4 }
 0xc4f   : > { %9158 = vmatpush3.msra.mxu0 %v10812_v4 }
 0xc50   : > { %9159 = vmatprep.subr.mxu0 %v10818_v51 }
 0xc51   : > { %9160 = vmatpush3.msra.mxu0 %v10818_v51 }
 0xc52   : > { %9161 = vmatprep.subr.mxu0 %v10824_v1 }
 0xc53   : > { %9162 = vmatpush3.msra.mxu0 %v10824_v1 }
 0xc54   : > { %9164 = vmatmul.mubr.f32.vlgmr.msra.gmra.mxu0 %v7473_v49 }
 0xc55   : > { %9166 = vmatprep.mubr.f32.mxu0 %v7474_v46 }
 0xc58   : > { %9167 = vmatmul.mubr.f32.gmra.mxu0 %v7475_v28 }
 0xcf4   : > { %v9127_v24 = vpop.f32.mrf.mxu0 }
 0xcf5   : > { %v6634_v39 = vadd.f32 %v9127_v24, %v6440_v44 }
 0xcf6   : > { %v6614_v32 = vpop.f32.mrf.mxu0 }
 0xcf7   : > { %v6633_v45 = vadd.f32 %v6614_v32, %v6439_v27 }
 0xcf8   : > { %v9130_v53 = vpop.f32.mrf.mxu0 }
 0xcf9   : > { %v6636_v55 = vadd.f32 %v9130_v53, %v6442_v8 }
 0xcfa   : > { %v6624_v29 = vpop.f32.mrf.mxu0 }
 0xcfb   : > { %v6635_v10 = vadd.f32 %v6624_v29, %v6441_v13 }
 0xd14   : > { %v9165_v4 = vpop.f32.mrf.mxu0 }
 0xd16   : > { %v6708_v51 = vpop.f32.mrf.mxu0 }
 0xd17   : > { %9173 = vmatprep.mubr.msk.f32.mxu1 %vm5278_vm3, %v6708_v51 }
 0xd18   : > { %v9168_v1 = vpop.f32.mrf.mxu0  ;;  %9174 = vmatmul.mubr.msk.f32.vlgmr.msra.gmra.mxu1 %vm5278_vm3, %v9165_v4 }
 0xd1a   : > { %v6718_v35 = vpop.f32.mrf.mxu0 }
 0xd1b   : > { %9176 = vmatprep.mubr.msk.f32.mxu1 %vm5278_vm3, %v6718_v35 }
 0xd1c   : > { %9177 = vmatmul.mubr.msk.f32.gmra.mxu1 %vm5278_vm3, %v9168_v1 }
 0xdd8   : > { %v9175_v5 = vpop.f32.mrf.mxu1 }
 0xdd9   : > { %v6828_v48 = vadd.f32 %v9175_v5, %v6634_v39 }
 0xdda   : > { %v6808_v0 = vpop.f32.mrf.mxu1 }
 0xddb   : > { %v6842_v18 = vadd.f32 %v6839_v42, %v6828_v48  ;;  %v6827_v43 = vadd.f32 %v6808_v0, %v6633_v45 }
 0xddc   : > { %v9178_v36 = vpop.f32.mrf.mxu1 }
 0xddd   : > { %v7484_v16 = vmul.f32 -1.442695, %v6842_v18  ;;  %v6841_v50 = vadd.f32 %v6839_v42, %v6827_v43  ;;  %v6830_v34 = vadd.f32 %v9178_v36, %v6636_v55 }
 0xdde   : > { %v6818_v2 = vpop.f32.mrf.mxu1 }
 0xddf   : > { %9235 = vpow2.f32 %v7484_v16  ;;  %v7483_v14 = vmul.f32 -1.442695, %v6841_v50  ;;  %v6844_v59 = vadd.f32 %v6839_v42, %v6830_v34  ;;  %v6829_v62 = vadd.f32 %v6818_v2, %v6635_v10 }
 0xde1   : > { %9237 = vpow2.f32 %v7483_v14  ;;  %v7486_v12 = vmul.f32 -1.442695, %v6844_v59  ;;  %v6843_v6 = vadd.f32 %v6839_v42, %v6829_v62 }
 0xde3   : > { %9239 = vpow2.f32 %v7486_v12  ;;  %v7485_v9 = vmul.f32 -1.442695, %v6843_v6 }
 0xde5   : > { %9241 = vpow2.f32 %v7485_v9 }
 0xdec   : > { %v9236_v40 = vpop.eup %9235 }
 0xded   : > { %v6858_v30 = vadd.f32 1.0, %v9236_v40 }
 0xdee   : > { %v9238_v57 = vpop.eup %9237 }
 0xdef   : > { %9243 = vrcp.f32 %v6858_v30  ;;  %v6857_v61 = vadd.f32 1.0, %v9238_v57 }
 0xdf0   : > { %v9240_v17 = vpop.eup %9239 }
 0xdf1   : > { %9245 = vrcp.f32 %v6857_v61  ;;  %v6860_v3 = vadd.f32 1.0, %v9240_v17 }
 0xdf2   : > { %v9242_v63 = vpop.eup %9241 }
 0xdf3   : > { %9247 = vrcp.f32 %v6860_v3  ;;  %v6859_v58 = vadd.f32 1.0, %v9242_v63 }
 0xdf5   : > { %9249 = vrcp.f32 %v6859_v58 }
 0xdfc   : > { %v9244_v19 = vpop.eup %9243 }
 0xdfd   : > { %6871 = vst.msk [vmem:[%s381_s26 + $0x8] sm:$0xff] %vm6869_vm4, %v9244_v19 }
 0xdfe   : > { %v9246_v22 = vpop.eup %9245 }
 0xdff   : > { %6870 = vst.msk [vmem:[%s381_s26] sm:$0xff] %vm6869_vm4, %v9246_v22 }
 0xe00   : > { %v9248_v47 = vpop.eup %9247 }
 0xe01   : > { %6873 = vst.msk [vmem:[%s381_s26 + $0x18] sm:$0xff] %vm6869_vm4, %v9248_v47 }
 0xe02   : > { %v9250_v25 = vpop.eup %9249 }
 0xe03   : > { %6872 = vst.msk [vmem:[%s381_s26 + $0x10] sm:$0xff] %vm6869_vm4, %v9250_v25 }
 0xe04   : > { %9264 = shalt.err (!%p9261_p3)
}
 0xe05   : > { %s9265_s23 = scalar_lea.hbm %s11270_s15, 512  ;;  %s9269_s13 = scalar_lea.hbm %s11325_s11, 1024 }
 0xe06   : > { %p9266_p4 = scmp.ne.s32.totalorder %s11270_s15, %s9265_s23  ;;  %p9270_p9 = scmp.lt.s32.totalorder %s11270_s15, %s11325_s11 }
 0xe07   : > { %p9271_p10 = scmp.lt.s32.totalorder %s9269_s13, %s9265_s23 }
 0xe08   : > { %p9267_p7 = pnand %p9266_p4, %p9428_p5 }
 0xe09   : > { %p9272_p11 = por %p9271_p10, %p9270_p9 }
 0xe0a   : > { %p9268_p8 = pneg %p9267_p7 }
 0xe0c   : > { %p9273_p12 = pnand %p9272_p11, %p9268_p8 }
 0xe0e   : > { %9276 = shalt.err (!%p9273_p12)
}
 0xe0f   : > { %s9325_s10 = smov 128   ;;  %s9326_s18 = smov 8  }
 0xe10   : > { %9181 = dma.vmem_to_hbm [thread:$0]  (%p9428_p5), %s11272_s12, 512, %s11270_s15, %s11274_s16, %s9325_s10, %s9325_s10, %s9326_s18  }
 0xe11 PF: > { %p9187_p13 = scmp.ge.s32.totalorder %s9311_s22, 2  ;;  %s6903_s25 = sand.u32 1, %s9299_s19  }
 0xe12   : > { %s6904_s23 = scalar_lea.sflag [#allocation4], %s6903_s25 }
 0xe13   : > { %p9184_p0 = pnand %p9187_p13, %p9432_p6 }
 0xe15   : > { %p9185_p1 = pneg %p9184_p0 }
 0xe17   : > { %9294 = dma.done.wait (%p9185_p1), %s6904_s23, 512  }
 0xe18   : > { %9296 = vsyncadd (%p9185_p1), %s6904_s23, 4294966784  ;;  %p23_p2 = scmp.ge.s32.totalorder %s9415_s24, 4   ;;  %s11328_s19 = smov %s9303_s20 }
 0xe19   : > { %s11329_s20 = smov %s9307_s21  ;;  %s11330_s21 = smov %s9426_s27 }
 0xe1a   : > { %s11331_s22 = smov %s9415_s24  ;;  %25 = sbr.rel (!%p23_p2) target bundleno = 6 (0x6), region = 138 }
 0xe1f   :  { %6909 = vsyncpa [#allocation4], 1 }
 0xe20   :  { %6911 = vsyncpa [#allocation4 + $0x1], 1 }

</bundles_post_ra>
